<compile_context>
chip_gen: v6e
topology: v6e:2x2x1
jax: 0.10.0
libtpu: 0.0.40
codegen_flags: <defaults>
</compile_context>

<pallas_src>
import functools

import jax
import jax.numpy as jnp
from jax import lax
from jax.experimental import pallas as pl
from jax.experimental.pallas import tpu as pltpu

NUM_GATES = 4  # LSTM gates i, f, g, o


# ------------------------------ fused kernel ---------------------------------
def _fused_cnn_lstm_kernel(xpad_ref, mask_ref, wc_ref, bc_ref, wih_ref,
                           bias_ref, whh_ref, wfc_ref, bfc_ref, y_ref,
                           feat_scr, gx_scr,
                           *, B, T, H, W, Cin, Cout, GP, PADL):
    # xpad_ref: (Cin, N, HWP)   lane-dense activations + flat spatial halo
    # mask_ref: (9, 1, HW)      per-tap boundary masks (0/1)
    # wc_ref:   (Cout*Cin*9,)   conv weights, SMEM scalars
    # bc_ref:   (Cout,)         conv bias, SMEM scalars
    # wih_ref:  (1, F, GP)      this step's gate tile of the input projection
    # bias_ref: (1, 1, GP)      this step's gate tile of b_ih + b_hh
    # whh_ref:  (GP, 4*GP)      gate-tile padded recurrent weights
    # wfc_ref:  (1, GP)         final FC weights (padded lanes zero)
    # bfc_ref:  (1, 1)
    # y_ref:    (B, 1)
    # feat_scr: (N, F)          conv features in torch CHW order (persists)
    # gx_scr:   (4, N, GP)      hoisted input projection per gate (persists)
    N = B * T
    HW = H * W
    g = pl.program_id(0)

    # ---- grid step 0: 3x3 conv, shift-and-accumulate on (N, HW) slabs -------
    @pl.when(g == 0)
    def _conv():
        # 9 taps x Cin masked, shifted activation slabs (shared by all Cout).
        slabs = []
        for k in range(9):
            dy, dx = k // 3 - 1, k % 3 - 1
            start = PADL + dy * W + dx                 # static lane offset
            m = mask_ref[k]                            # (1, HW)
            slabs.append([xpad_ref[ci, :, start:start + HW] * m
                          for ci in range(Cin)])       # each (N, HW)
        # One lane-dense (N, HW) slab per output channel, stored in CHW order.
        for c in range(Cout):
            acc = jnp.zeros((N, HW), jnp.float32) + bc_ref[c]
            for k in range(9):
                for ci in range(Cin):
                    acc = acc + wc_ref[(c * Cin + ci) * 9 + k] * slabs[k][ci]
            feat_scr[:, c * HW:(c + 1) * HW] = acc

    # ---- every grid step: one gate tile of the hoisted input projection -----
    gx = jnp.dot(feat_scr[...], wih_ref[0],
                 preferred_element_type=jnp.float32) + bias_ref[0]   # (N, GP)
    gx_scr[g] = gx

    # ---- last grid step: T-step LSTM recurrence + final FC ------------------
    @pl.when(g == pl.num_programs(0) - 1)
    def _recurrence():
        h = jnp.zeros((B, GP), jnp.float32)
        c = jnp.zeros((B, GP), jnp.float32)
        for t in range(T):                            # static unroll
            ghh = jnp.dot(h, whh_ref[...], preferred_element_type=jnp.float32)
            r0, r1 = t * B, (t + 1) * B
            i_g = jax.nn.sigmoid(gx_scr[0, r0:r1, :] + ghh[:, 0 * GP:1 * GP])
            f_g = jax.nn.sigmoid(gx_scr[1, r0:r1, :] + ghh[:, 1 * GP:2 * GP])
            g_g = jnp.tanh(gx_scr[2, r0:r1, :] + ghh[:, 2 * GP:3 * GP])
            o_g = jax.nn.sigmoid(gx_scr[3, r0:r1, :] + ghh[:, 3 * GP:4 * GP])
            c = f_g * c + i_g * g_g
            h = o_g * jnp.tanh(c)
        y_ref[...] = (jnp.sum(h * wfc_ref[...], axis=-1, keepdims=True)
                      + bfc_ref[...])


def cnn_lstm_fused(xpad, tap_masks, wconv_flat, bconv, wih_r, bias_g, whh_g,
                   wfc_r, bfc, *, B, T, H, W):
    Cin, N, HWP = xpad.shape
    HW = H * W
    _, F, GP = wih_r.shape
    Cout = F // HW
    PADL = W + 1

    kernel = functools.partial(
        _fused_cnn_lstm_kernel, B=B, T=T, H=H, W=W, Cin=Cin, Cout=Cout,
        GP=GP, PADL=PADL)

    return pl.pallas_call(
        kernel,
        out_shape=jax.ShapeDtypeStruct((B, 1), jnp.float32),
        grid=(NUM_GATES,),
        in_specs=[
            pl.BlockSpec((Cin, N, HWP), lambda g: (0, 0, 0)),        # x (halo)
            pl.BlockSpec((9, 1, HW), lambda g: (0, 0, 0)),           # tap masks
            pl.BlockSpec(memory_space=pltpu.MemorySpace.SMEM),       # conv w
            pl.BlockSpec(memory_space=pltpu.MemorySpace.SMEM),       # conv b
            pl.BlockSpec((1, F, GP), lambda g: (g, 0, 0)),           # Wih tile
            pl.BlockSpec((1, 1, GP), lambda g: (g, 0, 0)),           # bias tile
            pl.BlockSpec((GP, NUM_GATES * GP), lambda g: (0, 0)),    # Whh
            pl.BlockSpec((1, GP), lambda g: (0, 0)),                 # fc w
            pl.BlockSpec((1, 1), lambda g: (0, 0)),                  # fc b
        ],
        out_specs=pl.BlockSpec((B, 1), lambda g: (0, 0)),
        scratch_shapes=[
            pltpu.VMEM((N, F), jnp.float32),                 # conv features
            pltpu.VMEM((NUM_GATES, N, GP), jnp.float32),     # hoisted gx
        ],
        compiler_params=pltpu.CompilerParams(
            dimension_semantics=("arbitrary",)),
    )(xpad, tap_masks, wconv_flat, bconv, wih_r, bias_g, whh_g, wfc_r, bfc)


# ------------------------ host-side weight preparation ------------------------
def prepare_params(params, hidden, H, W):
    """Torch-layout params -> kernel-ready layouts.  Run ONCE outside the jitted
    per-call forward (weight reshuffling is off the per-call path)."""
    Cout, Cin, KH, KW = params["conv_w"].shape
    HW = H * W
    F = Cout * HW
    GP = ((hidden + 127) // 128) * 128          # each gate gets its own lane tile

    # conv weights / bias as flat SMEM scalar tables, index (c*Cin+ci)*9 + dy*3+dx
    wconv_flat = params["conv_w"].reshape(-1).astype(jnp.float32)
    bconv = params["conv_b"].reshape(-1).astype(jnp.float32)

    # per-tap spatial boundary masks (shared by all channels / images)
    q = jnp.arange(HW)
    hh, ww = q // W, q % W
    masks = []
    for k in range(9):
        dy, dx = k // 3 - 1, k % 3 - 1
        valid = (hh + dy >= 0) & (hh + dy < H) & (ww + dx >= 0) & (ww + dx < W)
        masks.append(valid.astype(jnp.float32))
    tap_masks = jnp.stack(masks).reshape(9, 1, HW)

    # LSTM input weights: torch (4*hidden, F) -> (4, F, GP), gate-tile padded,
    # columns kept in torch CHW order (matches the feat scratch layout).
    wih = params["w_ih"].reshape(NUM_GATES, hidden, F).transpose(0, 2, 1)
    wih_r = jnp.pad(wih, ((0, 0), (0, 0), (0, GP - hidden)))          # (4, F, GP)

    # recurrent weights: (4*hidden, hidden) -> (GP, 4*GP), gate-tile padded
    whh = params["w_hh"].reshape(NUM_GATES, hidden, hidden).transpose(2, 0, 1)
    whh = jnp.pad(whh, ((0, GP - hidden), (0, 0), (0, GP - hidden)))
    whh_g = whh.reshape(GP, NUM_GATES * GP)                           # (GP, 4*GP)

    bias = (params["b_ih"] + params["b_hh"]).reshape(NUM_GATES, 1, hidden)
    bias_g = jnp.pad(bias, ((0, 0), (0, 0), (0, GP - hidden)))        # (4, 1, GP)

    wfc_r = jnp.pad(params["fc_w"], ((0, 0), (0, GP - hidden)))       # (1, GP)
    bfc = params["fc_b"].reshape(1, 1)

    return dict(wconv_flat=wconv_flat, bconv=bconv, tap_masks=tap_masks,
                wih_r=wih_r, bias_g=bias_g, whh_g=whh_g, wfc_r=wfc_r, bfc=bfc)


# ------------------------------- full forward ---------------------------------
def cnn_lstm_forward(x, kp):
    """x: (B, T, C, H, W) float32 -> (B,).  kp: prepare_params() output."""
    B, T, C, H, W = x.shape
    HW = H * W
    PADL = W + 1
    # lane-dense activation layout: (Cin, T*B, HW) with a flat spatial halo;
    # rows are time-major (row = t*B + b).
    xt = jnp.transpose(x, (2, 1, 0, 3, 4)).reshape(C, T * B, HW)
    HWP = ((HW + 2 * PADL + 127) // 128) * 128
    xpad = jnp.pad(xt, ((0, 0), (0, 0), (PADL, HWP - HW - PADL)))
    y = cnn_lstm_fused(xpad, kp["tap_masks"], kp["wconv_flat"], kp["bconv"],
                       kp["wih_r"], kp["bias_g"], kp["whh_g"], kp["wfc_r"],
                       kp["bfc"], B=B, T=T, H=H, W=W)
    return jnp.squeeze(y, axis=-1)


# ----------------------------- pure-JAX reference ------------------------------
def reference_forward(x, params, hidden):
    B, T, C, H, W = x.shape
    xr = x.reshape(B * T, C, H, W)
    conv = lax.conv_general_dilated(
        xr, params["conv_w"], window_strides=(1, 1), padding=((1, 1), (1, 1)),
        dimension_numbers=("NCHW", "OIHW", "NCHW"))
    conv = conv + params["conv_b"][None, :, None, None]
    feat = conv.reshape(B, T, -1)                                   # torch CHW flatten

    w_ih, w_hh = params["w_ih"], params["w_hh"]
    b = params["b_ih"] + params["b_hh"]

    def step(carry, xt):
        h, c = carry
        gates = xt @ w_ih.T + h @ w_hh.T + b
        i = jax.nn.sigmoid(gates[:, 0 * hidden:1 * hidden])
        f = jax.nn.sigmoid(gates[:, 1 * hidden:2 * hidden])
        g = jnp.tanh(gates[:, 2 * hidden:3 * hidden])
        o = jax.nn.sigmoid(gates[:, 3 * hidden:4 * hidden])
        c = f * c + i * g
        h = o * jnp.tanh(c)
        return (h, c), None

    h0 = jnp.zeros((B, hidden), jnp.float32)
    (h_last, _), _ = lax.scan(step, (h0, h0), jnp.transpose(feat, (1, 0, 2)))
    y = h_last @ params["fc_w"].T + params["fc_b"]
    return jnp.squeeze(y, axis=-1)


# ------------------------------------ main -------------------------------------
if __name__ == "__main__":
    # Small shapes consistent with the module: input_size=3, cnn_channels=8,
    # h=w=8, hidden=32  =>  LSTM input size F = 8*8*8 = 512.
    B, T, C, H, W = 2, 4, 3, 8, 8
    CNN_CH, HIDDEN = 8, 32
    F = CNN_CH * H * W

    key = jax.random.PRNGKey(0)
    ks = jax.random.split(key, 9)
    params = {
        # torch-native layouts; prepare_params does all kernel-side reshuffling.
        "conv_w": 0.1 * jax.random.normal(ks[0], (CNN_CH, C, 3, 3), jnp.float32),
        "conv_b": 0.1 * jax.random.normal(ks[1], (CNN_CH,), jnp.float32),
        "w_ih": 0.05 * jax.random.normal(ks[2], (4 * HIDDEN, F), jnp.float32),
        "w_hh": 0.05 * jax.random.normal(ks[3], (4 * HIDDEN, HIDDEN), jnp.float32),
        "b_ih": 0.05 * jax.random.normal(ks[4], (4 * HIDDEN,), jnp.float32),
        "b_hh": 0.05 * jax.random.normal(ks[5], (4 * HIDDEN,), jnp.float32),
        "fc_w": 0.1 * jax.random.normal(ks[6], (1, HIDDEN), jnp.float32),
        "fc_b": 0.1 * jax.random.normal(ks[7], (1,), jnp.float32),
    }
    x = jax.random.normal(ks[8], (B, T, C, H, W), jnp.float32)

    # One-time weight preparation, hoisted off the per-call (jitted) path.
    kp = prepare_params(params, HIDDEN, H, W)
    kp = jax.tree_util.tree_map(jax.block_until_ready, kp)

    fwd = jax.jit(cnn_lstm_forward)
    out = jax.block_until_ready(fwd(x, kp))
    ref = jax.block_until_ready(reference_forward(x, params, HIDDEN))

    assert out.shape == (B,), out.shape
    assert jnp.allclose(out, ref, rtol=5e-4, atol=5e-4), (out, ref)
    print("KERNEL_OK")
</pallas_src>

<mosaic_0001>
module attributes {stable_mosaic.version = 11 : i64} {
  func.func @_fused_cnn_lstm_kernel(%arg0: i32, %arg1: memref<3x8x128xf32, #tpu.memory_space<vmem>>, %arg2: memref<9x1x64xf32, #tpu.memory_space<vmem>>, %arg3: memref<216xf32, #tpu.memory_space<smem>>, %arg4: memref<8xf32, #tpu.memory_space<smem>>, %arg5: memref<1x512x128xf32, #tpu.memory_space<vmem>>, %arg6: memref<1x1x128xf32, #tpu.memory_space<vmem>>, %arg7: memref<128x512xf32, #tpu.memory_space<vmem>>, %arg8: memref<1x128xf32, #tpu.memory_space<vmem>>, %arg9: memref<1x1xf32, #tpu.memory_space<vmem>>, %arg10: memref<2x1xf32, #tpu.memory_space<vmem>>, %arg11: memref<8x512xf32, #tpu.memory_space<vmem>>, %arg12: memref<4x8x128xf32, #tpu.memory_space<vmem>>) attributes {dimension_semantics = [#tpu.dimension_semantics<arbitrary>], iteration_bounds = array<i64: 4>, scalar_prefetch = 0 : i64, scratch_operands = 2 : i64, tpu.core_type = #tpu.core_type<tc>, window_params = [{pipeline_mode = #tpu.pipeline_mode<synchronous>, transform_indices = @transform_0, window_bounds = array<i64: 3, 8, 128>}, {pipeline_mode = #tpu.pipeline_mode<synchronous>, transform_indices = @transform_1, window_bounds = array<i64: 9, 1, 64>}, {transform_indices = @transform_2, window_bounds = array<i64: 216>}, {transform_indices = @transform_3, window_bounds = array<i64: 8>}, {transform_indices = @transform_4, window_bounds = array<i64: 1, 512, 128>}, {transform_indices = @transform_5, window_bounds = array<i64: 1, 1, 128>}, {pipeline_mode = #tpu.pipeline_mode<synchronous>, transform_indices = @transform_6, window_bounds = array<i64: 128, 512>}, {pipeline_mode = #tpu.pipeline_mode<synchronous>, transform_indices = @transform_7, window_bounds = array<i64: 1, 128>}, {pipeline_mode = #tpu.pipeline_mode<synchronous>, transform_indices = @transform_8, window_bounds = array<i64: 1, 1>}, {pipeline_mode = #tpu.pipeline_mode<synchronous>, transform_indices = @transform_9, window_bounds = array<i64: 2, 1>}]} {
    %c0_i32 = arith.constant 0 : i32
    %0 = arith.cmpi eq, %arg0, %c0_i32 : i32
    %1 = arith.extui %0 : i1 to i32
    %c0_i32_0 = arith.constant 0 : i32
    %2 = arith.cmpi ne, %1, %c0_i32_0 : i32
    scf.if %2 {
      %c0_11 = arith.constant 0 : index
      %c0_12 = arith.constant 0 : index
      %c0_13 = arith.constant 0 : index
      %18 = vector.load %arg2[%c0_11, %c0_12, %c0_13] : memref<9x1x64xf32, #tpu.memory_space<vmem>>, vector<1x1x64xf32>
      %19 = vector.shape_cast %18 : vector<1x1x64xf32> to vector<1x64xf32>
      %c0_14 = arith.constant 0 : index
      %c0_15 = arith.constant 0 : index
      %c0_16 = arith.constant 0 : index
      %20 = vector.load %arg1[%c0_14, %c0_15, %c0_16] : memref<3x8x128xf32, #tpu.memory_space<vmem>>, vector<1x8x64xf32>
      %21 = vector.shape_cast %20 : vector<1x8x64xf32> to vector<8x64xf32>
      %22 = vector.broadcast %19 : vector<1x64xf32> to vector<8x64xf32>
      %23 = arith.mulf %21, %22 : vector<8x64xf32>
      %c1 = arith.constant 1 : index
      %c0_17 = arith.constant 0 : index
      %c0_18 = arith.constant 0 : index
      %24 = vector.load %arg1[%c1, %c0_17, %c0_18] : memref<3x8x128xf32, #tpu.memory_space<vmem>>, vector<1x8x64xf32>
      %25 = vector.shape_cast %24 : vector<1x8x64xf32> to vector<8x64xf32>
      %26 = vector.broadcast %19 : vector<1x64xf32> to vector<8x64xf32>
      %27 = arith.mulf %25, %26 : vector<8x64xf32>
      %c2 = arith.constant 2 : index
      %c0_19 = arith.constant 0 : index
      %c0_20 = arith.constant 0 : index
      %28 = vector.load %arg1[%c2, %c0_19, %c0_20] : memref<3x8x128xf32, #tpu.memory_space<vmem>>, vector<1x8x64xf32>
      %29 = vector.shape_cast %28 : vector<1x8x64xf32> to vector<8x64xf32>
      %30 = vector.broadcast %19 : vector<1x64xf32> to vector<8x64xf32>
      %31 = arith.mulf %29, %30 : vector<8x64xf32>
      %c1_21 = arith.constant 1 : index
      %c0_22 = arith.constant 0 : index
      %c0_23 = arith.constant 0 : index
      %32 = vector.load %arg2[%c1_21, %c0_22, %c0_23] : memref<9x1x64xf32, #tpu.memory_space<vmem>>, vector<1x1x64xf32>
      %33 = vector.shape_cast %32 : vector<1x1x64xf32> to vector<1x64xf32>
      %c0_24 = arith.constant 0 : index
      %c0_25 = arith.constant 0 : index
      %c1_26 = arith.constant 1 : index
      %34 = vector.load %arg1[%c0_24, %c0_25, %c1_26] : memref<3x8x128xf32, #tpu.memory_space<vmem>>, vector<1x8x64xf32>
      %35 = vector.shape_cast %34 : vector<1x8x64xf32> to vector<8x64xf32>
      %36 = vector.broadcast %33 : vector<1x64xf32> to vector<8x64xf32>
      %37 = arith.mulf %35, %36 : vector<8x64xf32>
      %c1_27 = arith.constant 1 : index
      %c0_28 = arith.constant 0 : index
      %c1_29 = arith.constant 1 : index
      %38 = vector.load %arg1[%c1_27, %c0_28, %c1_29] : memref<3x8x128xf32, #tpu.memory_space<vmem>>, vector<1x8x64xf32>
      %39 = vector.shape_cast %38 : vector<1x8x64xf32> to vector<8x64xf32>
      %40 = vector.broadcast %33 : vector<1x64xf32> to vector<8x64xf32>
      %41 = arith.mulf %39, %40 : vector<8x64xf32>
      %c2_30 = arith.constant 2 : index
      %c0_31 = arith.constant 0 : index
      %c1_32 = arith.constant 1 : index
      %42 = vector.load %arg1[%c2_30, %c0_31, %c1_32] : memref<3x8x128xf32, #tpu.memory_space<vmem>>, vector<1x8x64xf32>
      %43 = vector.shape_cast %42 : vector<1x8x64xf32> to vector<8x64xf32>
      %44 = vector.broadcast %33 : vector<1x64xf32> to vector<8x64xf32>
      %45 = arith.mulf %43, %44 : vector<8x64xf32>
      %c2_33 = arith.constant 2 : index
      %c0_34 = arith.constant 0 : index
      %c0_35 = arith.constant 0 : index
      %46 = vector.load %arg2[%c2_33, %c0_34, %c0_35] : memref<9x1x64xf32, #tpu.memory_space<vmem>>, vector<1x1x64xf32>
      %47 = vector.shape_cast %46 : vector<1x1x64xf32> to vector<1x64xf32>
      %c0_36 = arith.constant 0 : index
      %c0_37 = arith.constant 0 : index
      %c2_38 = arith.constant 2 : index
      %48 = vector.load %arg1[%c0_36, %c0_37, %c2_38] : memref<3x8x128xf32, #tpu.memory_space<vmem>>, vector<1x8x64xf32>
      %49 = vector.shape_cast %48 : vector<1x8x64xf32> to vector<8x64xf32>
      %50 = vector.broadcast %47 : vector<1x64xf32> to vector<8x64xf32>
      %51 = arith.mulf %49, %50 : vector<8x64xf32>
      %c1_39 = arith.constant 1 : index
      %c0_40 = arith.constant 0 : index
      %c2_41 = arith.constant 2 : index
      %52 = vector.load %arg1[%c1_39, %c0_40, %c2_41] : memref<3x8x128xf32, #tpu.memory_space<vmem>>, vector<1x8x64xf32>
      %53 = vector.shape_cast %52 : vector<1x8x64xf32> to vector<8x64xf32>
      %54 = vector.broadcast %47 : vector<1x64xf32> to vector<8x64xf32>
      %55 = arith.mulf %53, %54 : vector<8x64xf32>
      %c2_42 = arith.constant 2 : index
      %c0_43 = arith.constant 0 : index
      %c2_44 = arith.constant 2 : index
      %56 = vector.load %arg1[%c2_42, %c0_43, %c2_44] : memref<3x8x128xf32, #tpu.memory_space<vmem>>, vector<1x8x64xf32>
      %57 = vector.shape_cast %56 : vector<1x8x64xf32> to vector<8x64xf32>
      %58 = vector.broadcast %47 : vector<1x64xf32> to vector<8x64xf32>
      %59 = arith.mulf %57, %58 : vector<8x64xf32>
      %c3 = arith.constant 3 : index
      %c0_45 = arith.constant 0 : index
      %c0_46 = arith.constant 0 : index
      %60 = vector.load %arg2[%c3, %c0_45, %c0_46] : memref<9x1x64xf32, #tpu.memory_space<vmem>>, vector<1x1x64xf32>
      %61 = vector.shape_cast %60 : vector<1x1x64xf32> to vector<1x64xf32>
      %c0_47 = arith.constant 0 : index
      %c0_48 = arith.constant 0 : index
      %c8 = arith.constant 8 : index
      %62 = vector.load %arg1[%c0_47, %c0_48, %c8] : memref<3x8x128xf32, #tpu.memory_space<vmem>>, vector<1x8x64xf32>
      %63 = vector.shape_cast %62 : vector<1x8x64xf32> to vector<8x64xf32>
      %64 = vector.broadcast %61 : vector<1x64xf32> to vector<8x64xf32>
      %65 = arith.mulf %63, %64 : vector<8x64xf32>
      %c1_49 = arith.constant 1 : index
      %c0_50 = arith.constant 0 : index
      %c8_51 = arith.constant 8 : index
      %66 = vector.load %arg1[%c1_49, %c0_50, %c8_51] : memref<3x8x128xf32, #tpu.memory_space<vmem>>, vector<1x8x64xf32>
      %67 = vector.shape_cast %66 : vector<1x8x64xf32> to vector<8x64xf32>
      %68 = vector.broadcast %61 : vector<1x64xf32> to vector<8x64xf32>
      %69 = arith.mulf %67, %68 : vector<8x64xf32>
      %c2_52 = arith.constant 2 : index
      %c0_53 = arith.constant 0 : index
      %c8_54 = arith.constant 8 : index
      %70 = vector.load %arg1[%c2_52, %c0_53, %c8_54] : memref<3x8x128xf32, #tpu.memory_space<vmem>>, vector<1x8x64xf32>
      %71 = vector.shape_cast %70 : vector<1x8x64xf32> to vector<8x64xf32>
      %72 = vector.broadcast %61 : vector<1x64xf32> to vector<8x64xf32>
      %73 = arith.mulf %71, %72 : vector<8x64xf32>
      %c4 = arith.constant 4 : index
      %c0_55 = arith.constant 0 : index
      %c0_56 = arith.constant 0 : index
      %74 = vector.load %arg2[%c4, %c0_55, %c0_56] : memref<9x1x64xf32, #tpu.memory_space<vmem>>, vector<1x1x64xf32>
      %75 = vector.shape_cast %74 : vector<1x1x64xf32> to vector<1x64xf32>
      %c0_57 = arith.constant 0 : index
      %c0_58 = arith.constant 0 : index
      %c9 = arith.constant 9 : index
      %76 = vector.load %arg1[%c0_57, %c0_58, %c9] : memref<3x8x128xf32, #tpu.memory_space<vmem>>, vector<1x8x64xf32>
      %77 = vector.shape_cast %76 : vector<1x8x64xf32> to vector<8x64xf32>
      %78 = vector.broadcast %75 : vector<1x64xf32> to vector<8x64xf32>
      %79 = arith.mulf %77, %78 : vector<8x64xf32>
      %c1_59 = arith.constant 1 : index
      %c0_60 = arith.constant 0 : index
      %c9_61 = arith.constant 9 : index
      %80 = vector.load %arg1[%c1_59, %c0_60, %c9_61] : memref<3x8x128xf32, #tpu.memory_space<vmem>>, vector<1x8x64xf32>
      %81 = vector.shape_cast %80 : vector<1x8x64xf32> to vector<8x64xf32>
      %82 = vector.broadcast %75 : vector<1x64xf32> to vector<8x64xf32>
      %83 = arith.mulf %81, %82 : vector<8x64xf32>
      %c2_62 = arith.constant 2 : index
      %c0_63 = arith.constant 0 : index
      %c9_64 = arith.constant 9 : index
      %84 = vector.load %arg1[%c2_62, %c0_63, %c9_64] : memref<3x8x128xf32, #tpu.memory_space<vmem>>, vector<1x8x64xf32>
      %85 = vector.shape_cast %84 : vector<1x8x64xf32> to vector<8x64xf32>
      %86 = vector.broadcast %75 : vector<1x64xf32> to vector<8x64xf32>
      %87 = arith.mulf %85, %86 : vector<8x64xf32>
      %c5 = arith.constant 5 : index
      %c0_65 = arith.constant 0 : index
      %c0_66 = arith.constant 0 : index
      %88 = vector.load %arg2[%c5, %c0_65, %c0_66] : memref<9x1x64xf32, #tpu.memory_space<vmem>>, vector<1x1x64xf32>
      %89 = vector.shape_cast %88 : vector<1x1x64xf32> to vector<1x64xf32>
      %c0_67 = arith.constant 0 : index
      %c0_68 = arith.constant 0 : index
      %c10 = arith.constant 10 : index
      %90 = vector.load %arg1[%c0_67, %c0_68, %c10] : memref<3x8x128xf32, #tpu.memory_space<vmem>>, vector<1x8x64xf32>
      %91 = vector.shape_cast %90 : vector<1x8x64xf32> to vector<8x64xf32>
      %92 = vector.broadcast %89 : vector<1x64xf32> to vector<8x64xf32>
      %93 = arith.mulf %91, %92 : vector<8x64xf32>
      %c1_69 = arith.constant 1 : index
      %c0_70 = arith.constant 0 : index
      %c10_71 = arith.constant 10 : index
      %94 = vector.load %arg1[%c1_69, %c0_70, %c10_71] : memref<3x8x128xf32, #tpu.memory_space<vmem>>, vector<1x8x64xf32>
      %95 = vector.shape_cast %94 : vector<1x8x64xf32> to vector<8x64xf32>
      %96 = vector.broadcast %89 : vector<1x64xf32> to vector<8x64xf32>
      %97 = arith.mulf %95, %96 : vector<8x64xf32>
      %c2_72 = arith.constant 2 : index
      %c0_73 = arith.constant 0 : index
      %c10_74 = arith.constant 10 : index
      %98 = vector.load %arg1[%c2_72, %c0_73, %c10_74] : memref<3x8x128xf32, #tpu.memory_space<vmem>>, vector<1x8x64xf32>
      %99 = vector.shape_cast %98 : vector<1x8x64xf32> to vector<8x64xf32>
      %100 = vector.broadcast %89 : vector<1x64xf32> to vector<8x64xf32>
      %101 = arith.mulf %99, %100 : vector<8x64xf32>
      %c6 = arith.constant 6 : index
      %c0_75 = arith.constant 0 : index
      %c0_76 = arith.constant 0 : index
      %102 = vector.load %arg2[%c6, %c0_75, %c0_76] : memref<9x1x64xf32, #tpu.memory_space<vmem>>, vector<1x1x64xf32>
      %103 = vector.shape_cast %102 : vector<1x1x64xf32> to vector<1x64xf32>
      %c0_77 = arith.constant 0 : index
      %c0_78 = arith.constant 0 : index
      %c16 = arith.constant 16 : index
      %104 = vector.load %arg1[%c0_77, %c0_78, %c16] : memref<3x8x128xf32, #tpu.memory_space<vmem>>, vector<1x8x64xf32>
      %105 = vector.shape_cast %104 : vector<1x8x64xf32> to vector<8x64xf32>
      %106 = vector.broadcast %103 : vector<1x64xf32> to vector<8x64xf32>
      %107 = arith.mulf %105, %106 : vector<8x64xf32>
      %c1_79 = arith.constant 1 : index
      %c0_80 = arith.constant 0 : index
      %c16_81 = arith.constant 16 : index
      %108 = vector.load %arg1[%c1_79, %c0_80, %c16_81] : memref<3x8x128xf32, #tpu.memory_space<vmem>>, vector<1x8x64xf32>
      %109 = vector.shape_cast %108 : vector<1x8x64xf32> to vector<8x64xf32>
      %110 = vector.broadcast %103 : vector<1x64xf32> to vector<8x64xf32>
      %111 = arith.mulf %109, %110 : vector<8x64xf32>
      %c2_82 = arith.constant 2 : index
      %c0_83 = arith.constant 0 : index
      %c16_84 = arith.constant 16 : index
      %112 = vector.load %arg1[%c2_82, %c0_83, %c16_84] : memref<3x8x128xf32, #tpu.memory_space<vmem>>, vector<1x8x64xf32>
      %113 = vector.shape_cast %112 : vector<1x8x64xf32> to vector<8x64xf32>
      %114 = vector.broadcast %103 : vector<1x64xf32> to vector<8x64xf32>
      %115 = arith.mulf %113, %114 : vector<8x64xf32>
      %c7 = arith.constant 7 : index
      %c0_85 = arith.constant 0 : index
      %c0_86 = arith.constant 0 : index
      %116 = vector.load %arg2[%c7, %c0_85, %c0_86] : memref<9x1x64xf32, #tpu.memory_space<vmem>>, vector<1x1x64xf32>
      %117 = vector.shape_cast %116 : vector<1x1x64xf32> to vector<1x64xf32>
      %c0_87 = arith.constant 0 : index
      %c0_88 = arith.constant 0 : index
      %c17 = arith.constant 17 : index
      %118 = vector.load %arg1[%c0_87, %c0_88, %c17] : memref<3x8x128xf32, #tpu.memory_space<vmem>>, vector<1x8x64xf32>
      %119 = vector.shape_cast %118 : vector<1x8x64xf32> to vector<8x64xf32>
      %120 = vector.broadcast %117 : vector<1x64xf32> to vector<8x64xf32>
      %121 = arith.mulf %119, %120 : vector<8x64xf32>
      %c1_89 = arith.constant 1 : index
      %c0_90 = arith.constant 0 : index
      %c17_91 = arith.constant 17 : index
      %122 = vector.load %arg1[%c1_89, %c0_90, %c17_91] : memref<3x8x128xf32, #tpu.memory_space<vmem>>, vector<1x8x64xf32>
      %123 = vector.shape_cast %122 : vector<1x8x64xf32> to vector<8x64xf32>
      %124 = vector.broadcast %117 : vector<1x64xf32> to vector<8x64xf32>
      %125 = arith.mulf %123, %124 : vector<8x64xf32>
      %c2_92 = arith.constant 2 : index
      %c0_93 = arith.constant 0 : index
      %c17_94 = arith.constant 17 : index
      %126 = vector.load %arg1[%c2_92, %c0_93, %c17_94] : memref<3x8x128xf32, #tpu.memory_space<vmem>>, vector<1x8x64xf32>
      %127 = vector.shape_cast %126 : vector<1x8x64xf32> to vector<8x64xf32>
      %128 = vector.broadcast %117 : vector<1x64xf32> to vector<8x64xf32>
      %129 = arith.mulf %127, %128 : vector<8x64xf32>
      %c8_95 = arith.constant 8 : index
      %c0_96 = arith.constant 0 : index
      %c0_97 = arith.constant 0 : index
      %130 = vector.load %arg2[%c8_95, %c0_96, %c0_97] : memref<9x1x64xf32, #tpu.memory_space<vmem>>, vector<1x1x64xf32>
      %131 = vector.shape_cast %130 : vector<1x1x64xf32> to vector<1x64xf32>
      %c0_98 = arith.constant 0 : index
      %c0_99 = arith.constant 0 : index
      %c18 = arith.constant 18 : index
      %132 = vector.load %arg1[%c0_98, %c0_99, %c18] : memref<3x8x128xf32, #tpu.memory_space<vmem>>, vector<1x8x64xf32>
      %133 = vector.shape_cast %132 : vector<1x8x64xf32> to vector<8x64xf32>
      %134 = vector.broadcast %131 : vector<1x64xf32> to vector<8x64xf32>
      %135 = arith.mulf %133, %134 : vector<8x64xf32>
      %c1_100 = arith.constant 1 : index
      %c0_101 = arith.constant 0 : index
      %c18_102 = arith.constant 18 : index
      %136 = vector.load %arg1[%c1_100, %c0_101, %c18_102] : memref<3x8x128xf32, #tpu.memory_space<vmem>>, vector<1x8x64xf32>
      %137 = vector.shape_cast %136 : vector<1x8x64xf32> to vector<8x64xf32>
      %138 = vector.broadcast %131 : vector<1x64xf32> to vector<8x64xf32>
      %139 = arith.mulf %137, %138 : vector<8x64xf32>
      %c2_103 = arith.constant 2 : index
      %c0_104 = arith.constant 0 : index
      %c18_105 = arith.constant 18 : index
      %140 = vector.load %arg1[%c2_103, %c0_104, %c18_105] : memref<3x8x128xf32, #tpu.memory_space<vmem>>, vector<1x8x64xf32>
      %141 = vector.shape_cast %140 : vector<1x8x64xf32> to vector<8x64xf32>
      %142 = vector.broadcast %131 : vector<1x64xf32> to vector<8x64xf32>
      %143 = arith.mulf %141, %142 : vector<8x64xf32>
      %cst_106 = arith.constant 0.000000e+00 : f32
      %144 = vector.broadcast %cst_106 : f32 to vector<8x64xf32>
      %c0_107 = arith.constant 0 : index
      %145 = memref.load %arg4[%c0_107] : memref<8xf32, #tpu.memory_space<smem>>
      %146 = vector.broadcast %145 : f32 to vector<8x64xf32>
      %147 = arith.addf %144, %146 : vector<8x64xf32>
      %c0_108 = arith.constant 0 : index
      %148 = memref.load %arg3[%c0_108] : memref<216xf32, #tpu.memory_space<smem>>
      %149 = vector.broadcast %148 : f32 to vector<8x64xf32>
      %150 = arith.mulf %149, %23 : vector<8x64xf32>
      %151 = arith.addf %147, %150 : vector<8x64xf32>
      %c9_109 = arith.constant 9 : index
      %152 = memref.load %arg3[%c9_109] : memref<216xf32, #tpu.memory_space<smem>>
      %153 = vector.broadcast %152 : f32 to vector<8x64xf32>
      %154 = arith.mulf %153, %27 : vector<8x64xf32>
      %155 = arith.addf %151, %154 : vector<8x64xf32>
      %c18_110 = arith.constant 18 : index
      %156 = memref.load %arg3[%c18_110] : memref<216xf32, #tpu.memory_space<smem>>
      %157 = vector.broadcast %156 : f32 to vector<8x64xf32>
      %158 = arith.mulf %157, %31 : vector<8x64xf32>
      %159 = arith.addf %155, %158 : vector<8x64xf32>
      %c1_111 = arith.constant 1 : index
      %160 = memref.load %arg3[%c1_111] : memref<216xf32, #tpu.memory_space<smem>>
      %161 = vector.broadcast %160 : f32 to vector<8x64xf32>
      %162 = arith.mulf %161, %37 : vector<8x64xf32>
      %163 = arith.addf %159, %162 : vector<8x64xf32>
      %c10_112 = arith.constant 10 : index
      %164 = memref.load %arg3[%c10_112] : memref<216xf32, #tpu.memory_space<smem>>
      %165 = vector.broadcast %164 : f32 to vector<8x64xf32>
      %166 = arith.mulf %165, %41 : vector<8x64xf32>
      %167 = arith.addf %163, %166 : vector<8x64xf32>
      %c19 = arith.constant 19 : index
      %168 = memref.load %arg3[%c19] : memref<216xf32, #tpu.memory_space<smem>>
      %169 = vector.broadcast %168 : f32 to vector<8x64xf32>
      %170 = arith.mulf %169, %45 : vector<8x64xf32>
      %171 = arith.addf %167, %170 : vector<8x64xf32>
      %c2_113 = arith.constant 2 : index
      %172 = memref.load %arg3[%c2_113] : memref<216xf32, #tpu.memory_space<smem>>
      %173 = vector.broadcast %172 : f32 to vector<8x64xf32>
      %174 = arith.mulf %173, %51 : vector<8x64xf32>
      %175 = arith.addf %171, %174 : vector<8x64xf32>
      %c11 = arith.constant 11 : index
      %176 = memref.load %arg3[%c11] : memref<216xf32, #tpu.memory_space<smem>>
      %177 = vector.broadcast %176 : f32 to vector<8x64xf32>
      %178 = arith.mulf %177, %55 : vector<8x64xf32>
      %179 = arith.addf %175, %178 : vector<8x64xf32>
      %c20 = arith.constant 20 : index
      %180 = memref.load %arg3[%c20] : memref<216xf32, #tpu.memory_space<smem>>
      %181 = vector.broadcast %180 : f32 to vector<8x64xf32>
      %182 = arith.mulf %181, %59 : vector<8x64xf32>
      %183 = arith.addf %179, %182 : vector<8x64xf32>
      %c3_114 = arith.constant 3 : index
      %184 = memref.load %arg3[%c3_114] : memref<216xf32, #tpu.memory_space<smem>>
      %185 = vector.broadcast %184 : f32 to vector<8x64xf32>
      %186 = arith.mulf %185, %65 : vector<8x64xf32>
      %187 = arith.addf %183, %186 : vector<8x64xf32>
      %c12 = arith.constant 12 : index
      %188 = memref.load %arg3[%c12] : memref<216xf32, #tpu.memory_space<smem>>
      %189 = vector.broadcast %188 : f32 to vector<8x64xf32>
      %190 = arith.mulf %189, %69 : vector<8x64xf32>
      %191 = arith.addf %187, %190 : vector<8x64xf32>
      %c21 = arith.constant 21 : index
      %192 = memref.load %arg3[%c21] : memref<216xf32, #tpu.memory_space<smem>>
      %193 = vector.broadcast %192 : f32 to vector<8x64xf32>
      %194 = arith.mulf %193, %73 : vector<8x64xf32>
      %195 = arith.addf %191, %194 : vector<8x64xf32>
      %c4_115 = arith.constant 4 : index
      %196 = memref.load %arg3[%c4_115] : memref<216xf32, #tpu.memory_space<smem>>
      %197 = vector.broadcast %196 : f32 to vector<8x64xf32>
      %198 = arith.mulf %197, %79 : vector<8x64xf32>
      %199 = arith.addf %195, %198 : vector<8x64xf32>
      %c13 = arith.constant 13 : index
      %200 = memref.load %arg3[%c13] : memref<216xf32, #tpu.memory_space<smem>>
      %201 = vector.broadcast %200 : f32 to vector<8x64xf32>
      %202 = arith.mulf %201, %83 : vector<8x64xf32>
      %203 = arith.addf %199, %202 : vector<8x64xf32>
      %c22 = arith.constant 22 : index
      %204 = memref.load %arg3[%c22] : memref<216xf32, #tpu.memory_space<smem>>
      %205 = vector.broadcast %204 : f32 to vector<8x64xf32>
      %206 = arith.mulf %205, %87 : vector<8x64xf32>
      %207 = arith.addf %203, %206 : vector<8x64xf32>
      %c5_116 = arith.constant 5 : index
      %208 = memref.load %arg3[%c5_116] : memref<216xf32, #tpu.memory_space<smem>>
      %209 = vector.broadcast %208 : f32 to vector<8x64xf32>
      %210 = arith.mulf %209, %93 : vector<8x64xf32>
      %211 = arith.addf %207, %210 : vector<8x64xf32>
      %c14 = arith.constant 14 : index
      %212 = memref.load %arg3[%c14] : memref<216xf32, #tpu.memory_space<smem>>
      %213 = vector.broadcast %212 : f32 to vector<8x64xf32>
      %214 = arith.mulf %213, %97 : vector<8x64xf32>
      %215 = arith.addf %211, %214 : vector<8x64xf32>
      %c23 = arith.constant 23 : index
      %216 = memref.load %arg3[%c23] : memref<216xf32, #tpu.memory_space<smem>>
      %217 = vector.broadcast %216 : f32 to vector<8x64xf32>
      %218 = arith.mulf %217, %101 : vector<8x64xf32>
      %219 = arith.addf %215, %218 : vector<8x64xf32>
      %c6_117 = arith.constant 6 : index
      %220 = memref.load %arg3[%c6_117] : memref<216xf32, #tpu.memory_space<smem>>
      %221 = vector.broadcast %220 : f32 to vector<8x64xf32>
      %222 = arith.mulf %221, %107 : vector<8x64xf32>
      %223 = arith.addf %219, %222 : vector<8x64xf32>
      %c15 = arith.constant 15 : index
      %224 = memref.load %arg3[%c15] : memref<216xf32, #tpu.memory_space<smem>>
      %225 = vector.broadcast %224 : f32 to vector<8x64xf32>
      %226 = arith.mulf %225, %111 : vector<8x64xf32>
      %227 = arith.addf %223, %226 : vector<8x64xf32>
      %c24 = arith.constant 24 : index
      %228 = memref.load %arg3[%c24] : memref<216xf32, #tpu.memory_space<smem>>
      %229 = vector.broadcast %228 : f32 to vector<8x64xf32>
      %230 = arith.mulf %229, %115 : vector<8x64xf32>
      %231 = arith.addf %227, %230 : vector<8x64xf32>
      %c7_118 = arith.constant 7 : index
      %232 = memref.load %arg3[%c7_118] : memref<216xf32, #tpu.memory_space<smem>>
      %233 = vector.broadcast %232 : f32 to vector<8x64xf32>
      %234 = arith.mulf %233, %121 : vector<8x64xf32>
      %235 = arith.addf %231, %234 : vector<8x64xf32>
      %c16_119 = arith.constant 16 : index
      %236 = memref.load %arg3[%c16_119] : memref<216xf32, #tpu.memory_space<smem>>
      %237 = vector.broadcast %236 : f32 to vector<8x64xf32>
      %238 = arith.mulf %237, %125 : vector<8x64xf32>
      %239 = arith.addf %235, %238 : vector<8x64xf32>
      %c25 = arith.constant 25 : index
      %240 = memref.load %arg3[%c25] : memref<216xf32, #tpu.memory_space<smem>>
      %241 = vector.broadcast %240 : f32 to vector<8x64xf32>
      %242 = arith.mulf %241, %129 : vector<8x64xf32>
      %243 = arith.addf %239, %242 : vector<8x64xf32>
      %c8_120 = arith.constant 8 : index
      %244 = memref.load %arg3[%c8_120] : memref<216xf32, #tpu.memory_space<smem>>
      %245 = vector.broadcast %244 : f32 to vector<8x64xf32>
      %246 = arith.mulf %245, %135 : vector<8x64xf32>
      %247 = arith.addf %243, %246 : vector<8x64xf32>
      %c17_121 = arith.constant 17 : index
      %248 = memref.load %arg3[%c17_121] : memref<216xf32, #tpu.memory_space<smem>>
      %249 = vector.broadcast %248 : f32 to vector<8x64xf32>
      %250 = arith.mulf %249, %139 : vector<8x64xf32>
      %251 = arith.addf %247, %250 : vector<8x64xf32>
      %c26 = arith.constant 26 : index
      %252 = memref.load %arg3[%c26] : memref<216xf32, #tpu.memory_space<smem>>
      %253 = vector.broadcast %252 : f32 to vector<8x64xf32>
      %254 = arith.mulf %253, %143 : vector<8x64xf32>
      %255 = arith.addf %251, %254 : vector<8x64xf32>
      %c0_122 = arith.constant 0 : index
      %c0_123 = arith.constant 0 : index
      %256 = vector.load %arg11[%c0_122, %c0_123] : memref<8x512xf32, #tpu.memory_space<vmem>>, vector<8x64xf32>
      tpu.vector_store %arg11[%c0_122, %c0_123], %255 {strides = array<i32>} : memref<8x512xf32, #tpu.memory_space<vmem>>, vector<8x64xf32>,
      %cst_124 = arith.constant 0.000000e+00 : f32
      %257 = vector.broadcast %cst_124 : f32 to vector<8x64xf32>
      %c1_125 = arith.constant 1 : index
      %258 = memref.load %arg4[%c1_125] : memref<8xf32, #tpu.memory_space<smem>>
      %259 = vector.broadcast %258 : f32 to vector<8x64xf32>
      %260 = arith.addf %257, %259 : vector<8x64xf32>
      %c27 = arith.constant 27 : index
      %261 = memref.load %arg3[%c27] : memref<216xf32, #tpu.memory_space<smem>>
      %262 = vector.broadcast %261 : f32 to vector<8x64xf32>
      %263 = arith.mulf %262, %23 : vector<8x64xf32>
      %264 = arith.addf %260, %263 : vector<8x64xf32>
      %c36 = arith.constant 36 : index
      %265 = memref.load %arg3[%c36] : memref<216xf32, #tpu.memory_space<smem>>
      %266 = vector.broadcast %265 : f32 to vector<8x64xf32>
      %267 = arith.mulf %266, %27 : vector<8x64xf32>
      %268 = arith.addf %264, %267 : vector<8x64xf32>
      %c45 = arith.constant 45 : index
      %269 = memref.load %arg3[%c45] : memref<216xf32, #tpu.memory_space<smem>>
      %270 = vector.broadcast %269 : f32 to vector<8x64xf32>
      %271 = arith.mulf %270, %31 : vector<8x64xf32>
      %272 = arith.addf %268, %271 : vector<8x64xf32>
      %c28 = arith.constant 28 : index
      %273 = memref.load %arg3[%c28] : memref<216xf32, #tpu.memory_space<smem>>
      %274 = vector.broadcast %273 : f32 to vector<8x64xf32>
      %275 = arith.mulf %274, %37 : vector<8x64xf32>
      %276 = arith.addf %272, %275 : vector<8x64xf32>
      %c37 = arith.constant 37 : index
      %277 = memref.load %arg3[%c37] : memref<216xf32, #tpu.memory_space<smem>>
      %278 = vector.broadcast %277 : f32 to vector<8x64xf32>
      %279 = arith.mulf %278, %41 : vector<8x64xf32>
      %280 = arith.addf %276, %279 : vector<8x64xf32>
      %c46 = arith.constant 46 : index
      %281 = memref.load %arg3[%c46] : memref<216xf32, #tpu.memory_space<smem>>
      %282 = vector.broadcast %281 : f32 to vector<8x64xf32>
      %283 = arith.mulf %282, %45 : vector<8x64xf32>
      %284 = arith.addf %280, %283 : vector<8x64xf32>
      %c29 = arith.constant 29 : index
      %285 = memref.load %arg3[%c29] : memref<216xf32, #tpu.memory_space<smem>>
      %286 = vector.broadcast %285 : f32 to vector<8x64xf32>
      %287 = arith.mulf %286, %51 : vector<8x64xf32>
      %288 = arith.addf %284, %287 : vector<8x64xf32>
      %c38 = arith.constant 38 : index
      %289 = memref.load %arg3[%c38] : memref<216xf32, #tpu.memory_space<smem>>
      %290 = vector.broadcast %289 : f32 to vector<8x64xf32>
      %291 = arith.mulf %290, %55 : vector<8x64xf32>
      %292 = arith.addf %288, %291 : vector<8x64xf32>
      %c47 = arith.constant 47 : index
      %293 = memref.load %arg3[%c47] : memref<216xf32, #tpu.memory_space<smem>>
      %294 = vector.broadcast %293 : f32 to vector<8x64xf32>
      %295 = arith.mulf %294, %59 : vector<8x64xf32>
      %296 = arith.addf %292, %295 : vector<8x64xf32>
      %c30 = arith.constant 30 : index
      %297 = memref.load %arg3[%c30] : memref<216xf32, #tpu.memory_space<smem>>
      %298 = vector.broadcast %297 : f32 to vector<8x64xf32>
      %299 = arith.mulf %298, %65 : vector<8x64xf32>
      %300 = arith.addf %296, %299 : vector<8x64xf32>
      %c39 = arith.constant 39 : index
      %301 = memref.load %arg3[%c39] : memref<216xf32, #tpu.memory_space<smem>>
      %302 = vector.broadcast %301 : f32 to vector<8x64xf32>
      %303 = arith.mulf %302, %69 : vector<8x64xf32>
      %304 = arith.addf %300, %303 : vector<8x64xf32>
      %c48 = arith.constant 48 : index
      %305 = memref.load %arg3[%c48] : memref<216xf32, #tpu.memory_space<smem>>
      %306 = vector.broadcast %305 : f32 to vector<8x64xf32>
      %307 = arith.mulf %306, %73 : vector<8x64xf32>
      %308 = arith.addf %304, %307 : vector<8x64xf32>
      %c31 = arith.constant 31 : index
      %309 = memref.load %arg3[%c31] : memref<216xf32, #tpu.memory_space<smem>>
      %310 = vector.broadcast %309 : f32 to vector<8x64xf32>
      %311 = arith.mulf %310, %79 : vector<8x64xf32>
      %312 = arith.addf %308, %311 : vector<8x64xf32>
      %c40 = arith.constant 40 : index
      %313 = memref.load %arg3[%c40] : memref<216xf32, #tpu.memory_space<smem>>
      %314 = vector.broadcast %313 : f32 to vector<8x64xf32>
      %315 = arith.mulf %314, %83 : vector<8x64xf32>
      %316 = arith.addf %312, %315 : vector<8x64xf32>
      %c49 = arith.constant 49 : index
      %317 = memref.load %arg3[%c49] : memref<216xf32, #tpu.memory_space<smem>>
      %318 = vector.broadcast %317 : f32 to vector<8x64xf32>
      %319 = arith.mulf %318, %87 : vector<8x64xf32>
      %320 = arith.addf %316, %319 : vector<8x64xf32>
      %c32 = arith.constant 32 : index
      %321 = memref.load %arg3[%c32] : memref<216xf32, #tpu.memory_space<smem>>
      %322 = vector.broadcast %321 : f32 to vector<8x64xf32>
      %323 = arith.mulf %322, %93 : vector<8x64xf32>
      %324 = arith.addf %320, %323 : vector<8x64xf32>
      %c41 = arith.constant 41 : index
      %325 = memref.load %arg3[%c41] : memref<216xf32, #tpu.memory_space<smem>>
      %326 = vector.broadcast %325 : f32 to vector<8x64xf32>
      %327 = arith.mulf %326, %97 : vector<8x64xf32>
      %328 = arith.addf %324, %327 : vector<8x64xf32>
      %c50 = arith.constant 50 : index
      %329 = memref.load %arg3[%c50] : memref<216xf32, #tpu.memory_space<smem>>
      %330 = vector.broadcast %329 : f32 to vector<8x64xf32>
      %331 = arith.mulf %330, %101 : vector<8x64xf32>
      %332 = arith.addf %328, %331 : vector<8x64xf32>
      %c33 = arith.constant 33 : index
      %333 = memref.load %arg3[%c33] : memref<216xf32, #tpu.memory_space<smem>>
      %334 = vector.broadcast %333 : f32 to vector<8x64xf32>
      %335 = arith.mulf %334, %107 : vector<8x64xf32>
      %336 = arith.addf %332, %335 : vector<8x64xf32>
      %c42 = arith.constant 42 : index
      %337 = memref.load %arg3[%c42] : memref<216xf32, #tpu.memory_space<smem>>
      %338 = vector.broadcast %337 : f32 to vector<8x64xf32>
      %339 = arith.mulf %338, %111 : vector<8x64xf32>
      %340 = arith.addf %336, %339 : vector<8x64xf32>
      %c51 = arith.constant 51 : index
      %341 = memref.load %arg3[%c51] : memref<216xf32, #tpu.memory_space<smem>>
      %342 = vector.broadcast %341 : f32 to vector<8x64xf32>
      %343 = arith.mulf %342, %115 : vector<8x64xf32>
      %344 = arith.addf %340, %343 : vector<8x64xf32>
      %c34 = arith.constant 34 : index
      %345 = memref.load %arg3[%c34] : memref<216xf32, #tpu.memory_space<smem>>
      %346 = vector.broadcast %345 : f32 to vector<8x64xf32>
      %347 = arith.mulf %346, %121 : vector<8x64xf32>
      %348 = arith.addf %344, %347 : vector<8x64xf32>
      %c43 = arith.constant 43 : index
      %349 = memref.load %arg3[%c43] : memref<216xf32, #tpu.memory_space<smem>>
      %350 = vector.broadcast %349 : f32 to vector<8x64xf32>
      %351 = arith.mulf %350, %125 : vector<8x64xf32>
      %352 = arith.addf %348, %351 : vector<8x64xf32>
      %c52 = arith.constant 52 : index
      %353 = memref.load %arg3[%c52] : memref<216xf32, #tpu.memory_space<smem>>
      %354 = vector.broadcast %353 : f32 to vector<8x64xf32>
      %355 = arith.mulf %354, %129 : vector<8x64xf32>
      %356 = arith.addf %352, %355 : vector<8x64xf32>
      %c35 = arith.constant 35 : index
      %357 = memref.load %arg3[%c35] : memref<216xf32, #tpu.memory_space<smem>>
      %358 = vector.broadcast %357 : f32 to vector<8x64xf32>
      %359 = arith.mulf %358, %135 : vector<8x64xf32>
      %360 = arith.addf %356, %359 : vector<8x64xf32>
      %c44 = arith.constant 44 : index
      %361 = memref.load %arg3[%c44] : memref<216xf32, #tpu.memory_space<smem>>
      %362 = vector.broadcast %361 : f32 to vector<8x64xf32>
      %363 = arith.mulf %362, %139 : vector<8x64xf32>
      %364 = arith.addf %360, %363 : vector<8x64xf32>
      %c53 = arith.constant 53 : index
      %365 = memref.load %arg3[%c53] : memref<216xf32, #tpu.memory_space<smem>>
      %366 = vector.broadcast %365 : f32 to vector<8x64xf32>
      %367 = arith.mulf %366, %143 : vector<8x64xf32>
      %368 = arith.addf %364, %367 : vector<8x64xf32>
      %c0_126 = arith.constant 0 : index
      %c64 = arith.constant 64 : index
      %369 = vector.load %arg11[%c0_126, %c64] : memref<8x512xf32, #tpu.memory_space<vmem>>, vector<8x64xf32>
      tpu.vector_store %arg11[%c0_126, %c64], %368 {strides = array<i32>} : memref<8x512xf32, #tpu.memory_space<vmem>>, vector<8x64xf32>,
      %cst_127 = arith.constant 0.000000e+00 : f32
      %370 = vector.broadcast %cst_127 : f32 to vector<8x64xf32>
      %c2_128 = arith.constant 2 : index
      %371 = memref.load %arg4[%c2_128] : memref<8xf32, #tpu.memory_space<smem>>
      %372 = vector.broadcast %371 : f32 to vector<8x64xf32>
      %373 = arith.addf %370, %372 : vector<8x64xf32>
      %c54 = arith.constant 54 : index
      %374 = memref.load %arg3[%c54] : memref<216xf32, #tpu.memory_space<smem>>
      %375 = vector.broadcast %374 : f32 to vector<8x64xf32>
      %376 = arith.mulf %375, %23 : vector<8x64xf32>
      %377 = arith.addf %373, %376 : vector<8x64xf32>
      %c63 = arith.constant 63 : index
      %378 = memref.load %arg3[%c63] : memref<216xf32, #tpu.memory_space<smem>>
      %379 = vector.broadcast %378 : f32 to vector<8x64xf32>
      %380 = arith.mulf %379, %27 : vector<8x64xf32>
      %381 = arith.addf %377, %380 : vector<8x64xf32>
      %c72 = arith.constant 72 : index
      %382 = memref.load %arg3[%c72] : memref<216xf32, #tpu.memory_space<smem>>
      %383 = vector.broadcast %382 : f32 to vector<8x64xf32>
      %384 = arith.mulf %383, %31 : vector<8x64xf32>
      %385 = arith.addf %381, %384 : vector<8x64xf32>
      %c55 = arith.constant 55 : index
      %386 = memref.load %arg3[%c55] : memref<216xf32, #tpu.memory_space<smem>>
      %387 = vector.broadcast %386 : f32 to vector<8x64xf32>
      %388 = arith.mulf %387, %37 : vector<8x64xf32>
      %389 = arith.addf %385, %388 : vector<8x64xf32>
      %c64_129 = arith.constant 64 : index
      %390 = memref.load %arg3[%c64_129] : memref<216xf32, #tpu.memory_space<smem>>
      %391 = vector.broadcast %390 : f32 to vector<8x64xf32>
      %392 = arith.mulf %391, %41 : vector<8x64xf32>
      %393 = arith.addf %389, %392 : vector<8x64xf32>
      %c73 = arith.constant 73 : index
      %394 = memref.load %arg3[%c73] : memref<216xf32, #tpu.memory_space<smem>>
      %395 = vector.broadcast %394 : f32 to vector<8x64xf32>
      %396 = arith.mulf %395, %45 : vector<8x64xf32>
      %397 = arith.addf %393, %396 : vector<8x64xf32>
      %c56 = arith.constant 56 : index
      %398 = memref.load %arg3[%c56] : memref<216xf32, #tpu.memory_space<smem>>
      %399 = vector.broadcast %398 : f32 to vector<8x64xf32>
      %400 = arith.mulf %399, %51 : vector<8x64xf32>
      %401 = arith.addf %397, %400 : vector<8x64xf32>
      %c65 = arith.constant 65 : index
      %402 = memref.load %arg3[%c65] : memref<216xf32, #tpu.memory_space<smem>>
      %403 = vector.broadcast %402 : f32 to vector<8x64xf32>
      %404 = arith.mulf %403, %55 : vector<8x64xf32>
      %405 = arith.addf %401, %404 : vector<8x64xf32>
      %c74 = arith.constant 74 : index
      %406 = memref.load %arg3[%c74] : memref<216xf32, #tpu.memory_space<smem>>
      %407 = vector.broadcast %406 : f32 to vector<8x64xf32>
      %408 = arith.mulf %407, %59 : vector<8x64xf32>
      %409 = arith.addf %405, %408 : vector<8x64xf32>
      %c57 = arith.constant 57 : index
      %410 = memref.load %arg3[%c57] : memref<216xf32, #tpu.memory_space<smem>>
      %411 = vector.broadcast %410 : f32 to vector<8x64xf32>
      %412 = arith.mulf %411, %65 : vector<8x64xf32>
      %413 = arith.addf %409, %412 : vector<8x64xf32>
      %c66 = arith.constant 66 : index
      %414 = memref.load %arg3[%c66] : memref<216xf32, #tpu.memory_space<smem>>
      %415 = vector.broadcast %414 : f32 to vector<8x64xf32>
      %416 = arith.mulf %415, %69 : vector<8x64xf32>
      %417 = arith.addf %413, %416 : vector<8x64xf32>
      %c75 = arith.constant 75 : index
      %418 = memref.load %arg3[%c75] : memref<216xf32, #tpu.memory_space<smem>>
      %419 = vector.broadcast %418 : f32 to vector<8x64xf32>
      %420 = arith.mulf %419, %73 : vector<8x64xf32>
      %421 = arith.addf %417, %420 : vector<8x64xf32>
      %c58 = arith.constant 58 : index
      %422 = memref.load %arg3[%c58] : memref<216xf32, #tpu.memory_space<smem>>
      %423 = vector.broadcast %422 : f32 to vector<8x64xf32>
      %424 = arith.mulf %423, %79 : vector<8x64xf32>
      %425 = arith.addf %421, %424 : vector<8x64xf32>
      %c67 = arith.constant 67 : index
      %426 = memref.load %arg3[%c67] : memref<216xf32, #tpu.memory_space<smem>>
      %427 = vector.broadcast %426 : f32 to vector<8x64xf32>
      %428 = arith.mulf %427, %83 : vector<8x64xf32>
      %429 = arith.addf %425, %428 : vector<8x64xf32>
      %c76 = arith.constant 76 : index
      %430 = memref.load %arg3[%c76] : memref<216xf32, #tpu.memory_space<smem>>
      %431 = vector.broadcast %430 : f32 to vector<8x64xf32>
      %432 = arith.mulf %431, %87 : vector<8x64xf32>
      %433 = arith.addf %429, %432 : vector<8x64xf32>
      %c59 = arith.constant 59 : index
      %434 = memref.load %arg3[%c59] : memref<216xf32, #tpu.memory_space<smem>>
      %435 = vector.broadcast %434 : f32 to vector<8x64xf32>
      %436 = arith.mulf %435, %93 : vector<8x64xf32>
      %437 = arith.addf %433, %436 : vector<8x64xf32>
      %c68 = arith.constant 68 : index
      %438 = memref.load %arg3[%c68] : memref<216xf32, #tpu.memory_space<smem>>
      %439 = vector.broadcast %438 : f32 to vector<8x64xf32>
      %440 = arith.mulf %439, %97 : vector<8x64xf32>
      %441 = arith.addf %437, %440 : vector<8x64xf32>
      %c77 = arith.constant 77 : index
      %442 = memref.load %arg3[%c77] : memref<216xf32, #tpu.memory_space<smem>>
      %443 = vector.broadcast %442 : f32 to vector<8x64xf32>
      %444 = arith.mulf %443, %101 : vector<8x64xf32>
      %445 = arith.addf %441, %444 : vector<8x64xf32>
      %c60 = arith.constant 60 : index
      %446 = memref.load %arg3[%c60] : memref<216xf32, #tpu.memory_space<smem>>
      %447 = vector.broadcast %446 : f32 to vector<8x64xf32>
      %448 = arith.mulf %447, %107 : vector<8x64xf32>
      %449 = arith.addf %445, %448 : vector<8x64xf32>
      %c69 = arith.constant 69 : index
      %450 = memref.load %arg3[%c69] : memref<216xf32, #tpu.memory_space<smem>>
      %451 = vector.broadcast %450 : f32 to vector<8x64xf32>
      %452 = arith.mulf %451, %111 : vector<8x64xf32>
      %453 = arith.addf %449, %452 : vector<8x64xf32>
      %c78 = arith.constant 78 : index
      %454 = memref.load %arg3[%c78] : memref<216xf32, #tpu.memory_space<smem>>
      %455 = vector.broadcast %454 : f32 to vector<8x64xf32>
      %456 = arith.mulf %455, %115 : vector<8x64xf32>
      %457 = arith.addf %453, %456 : vector<8x64xf32>
      %c61 = arith.constant 61 : index
      %458 = memref.load %arg3[%c61] : memref<216xf32, #tpu.memory_space<smem>>
      %459 = vector.broadcast %458 : f32 to vector<8x64xf32>
      %460 = arith.mulf %459, %121 : vector<8x64xf32>
      %461 = arith.addf %457, %460 : vector<8x64xf32>
      %c70 = arith.constant 70 : index
      %462 = memref.load %arg3[%c70] : memref<216xf32, #tpu.memory_space<smem>>
      %463 = vector.broadcast %462 : f32 to vector<8x64xf32>
      %464 = arith.mulf %463, %125 : vector<8x64xf32>
      %465 = arith.addf %461, %464 : vector<8x64xf32>
      %c79 = arith.constant 79 : index
      %466 = memref.load %arg3[%c79] : memref<216xf32, #tpu.memory_space<smem>>
      %467 = vector.broadcast %466 : f32 to vector<8x64xf32>
      %468 = arith.mulf %467, %129 : vector<8x64xf32>
      %469 = arith.addf %465, %468 : vector<8x64xf32>
      %c62 = arith.constant 62 : index
      %470 = memref.load %arg3[%c62] : memref<216xf32, #tpu.memory_space<smem>>
      %471 = vector.broadcast %470 : f32 to vector<8x64xf32>
      %472 = arith.mulf %471, %135 : vector<8x64xf32>
      %473 = arith.addf %469, %472 : vector<8x64xf32>
      %c71 = arith.constant 71 : index
      %474 = memref.load %arg3[%c71] : memref<216xf32, #tpu.memory_space<smem>>
      %475 = vector.broadcast %474 : f32 to vector<8x64xf32>
      %476 = arith.mulf %475, %139 : vector<8x64xf32>
      %477 = arith.addf %473, %476 : vector<8x64xf32>
      %c80 = arith.constant 80 : index
      %478 = memref.load %arg3[%c80] : memref<216xf32, #tpu.memory_space<smem>>
      %479 = vector.broadcast %478 : f32 to vector<8x64xf32>
      %480 = arith.mulf %479, %143 : vector<8x64xf32>
      %481 = arith.addf %477, %480 : vector<8x64xf32>
      %c0_130 = arith.constant 0 : index
      %c128 = arith.constant 128 : index
      %482 = vector.load %arg11[%c0_130, %c128] : memref<8x512xf32, #tpu.memory_space<vmem>>, vector<8x64xf32>
      tpu.vector_store %arg11[%c0_130, %c128], %481 {strides = array<i32>} : memref<8x512xf32, #tpu.memory_space<vmem>>, vector<8x64xf32>,
      %cst_131 = arith.constant 0.000000e+00 : f32
      %483 = vector.broadcast %cst_131 : f32 to vector<8x64xf32>
      %c3_132 = arith.constant 3 : index
      %484 = memref.load %arg4[%c3_132] : memref<8xf32, #tpu.memory_space<smem>>
      %485 = vector.broadcast %484 : f32 to vector<8x64xf32>
      %486 = arith.addf %483, %485 : vector<8x64xf32>
      %c81 = arith.constant 81 : index
      %487 = memref.load %arg3[%c81] : memref<216xf32, #tpu.memory_space<smem>>
      %488 = vector.broadcast %487 : f32 to vector<8x64xf32>
      %489 = arith.mulf %488, %23 : vector<8x64xf32>
      %490 = arith.addf %486, %489 : vector<8x64xf32>
      %c90 = arith.constant 90 : index
      %491 = memref.load %arg3[%c90] : memref<216xf32, #tpu.memory_space<smem>>
      %492 = vector.broadcast %491 : f32 to vector<8x64xf32>
      %493 = arith.mulf %492, %27 : vector<8x64xf32>
      %494 = arith.addf %490, %493 : vector<8x64xf32>
      %c99 = arith.constant 99 : index
      %495 = memref.load %arg3[%c99] : memref<216xf32, #tpu.memory_space<smem>>
      %496 = vector.broadcast %495 : f32 to vector<8x64xf32>
      %497 = arith.mulf %496, %31 : vector<8x64xf32>
      %498 = arith.addf %494, %497 : vector<8x64xf32>
      %c82 = arith.constant 82 : index
      %499 = memref.load %arg3[%c82] : memref<216xf32, #tpu.memory_space<smem>>
      %500 = vector.broadcast %499 : f32 to vector<8x64xf32>
      %501 = arith.mulf %500, %37 : vector<8x64xf32>
      %502 = arith.addf %498, %501 : vector<8x64xf32>
      %c91 = arith.constant 91 : index
      %503 = memref.load %arg3[%c91] : memref<216xf32, #tpu.memory_space<smem>>
      %504 = vector.broadcast %503 : f32 to vector<8x64xf32>
      %505 = arith.mulf %504, %41 : vector<8x64xf32>
      %506 = arith.addf %502, %505 : vector<8x64xf32>
      %c100 = arith.constant 100 : index
      %507 = memref.load %arg3[%c100] : memref<216xf32, #tpu.memory_space<smem>>
      %508 = vector.broadcast %507 : f32 to vector<8x64xf32>
      %509 = arith.mulf %508, %45 : vector<8x64xf32>
      %510 = arith.addf %506, %509 : vector<8x64xf32>
      %c83 = arith.constant 83 : index
      %511 = memref.load %arg3[%c83] : memref<216xf32, #tpu.memory_space<smem>>
      %512 = vector.broadcast %511 : f32 to vector<8x64xf32>
      %513 = arith.mulf %512, %51 : vector<8x64xf32>
      %514 = arith.addf %510, %513 : vector<8x64xf32>
      %c92 = arith.constant 92 : index
      %515 = memref.load %arg3[%c92] : memref<216xf32, #tpu.memory_space<smem>>
      %516 = vector.broadcast %515 : f32 to vector<8x64xf32>
      %517 = arith.mulf %516, %55 : vector<8x64xf32>
      %518 = arith.addf %514, %517 : vector<8x64xf32>
      %c101 = arith.constant 101 : index
      %519 = memref.load %arg3[%c101] : memref<216xf32, #tpu.memory_space<smem>>
      %520 = vector.broadcast %519 : f32 to vector<8x64xf32>
      %521 = arith.mulf %520, %59 : vector<8x64xf32>
      %522 = arith.addf %518, %521 : vector<8x64xf32>
      %c84 = arith.constant 84 : index
      %523 = memref.load %arg3[%c84] : memref<216xf32, #tpu.memory_space<smem>>
      %524 = vector.broadcast %523 : f32 to vector<8x64xf32>
      %525 = arith.mulf %524, %65 : vector<8x64xf32>
      %526 = arith.addf %522, %525 : vector<8x64xf32>
      %c93 = arith.constant 93 : index
      %527 = memref.load %arg3[%c93] : memref<216xf32, #tpu.memory_space<smem>>
      %528 = vector.broadcast %527 : f32 to vector<8x64xf32>
      %529 = arith.mulf %528, %69 : vector<8x64xf32>
      %530 = arith.addf %526, %529 : vector<8x64xf32>
      %c102 = arith.constant 102 : index
      %531 = memref.load %arg3[%c102] : memref<216xf32, #tpu.memory_space<smem>>
      %532 = vector.broadcast %531 : f32 to vector<8x64xf32>
      %533 = arith.mulf %532, %73 : vector<8x64xf32>
      %534 = arith.addf %530, %533 : vector<8x64xf32>
      %c85 = arith.constant 85 : index
      %535 = memref.load %arg3[%c85] : memref<216xf32, #tpu.memory_space<smem>>
      %536 = vector.broadcast %535 : f32 to vector<8x64xf32>
      %537 = arith.mulf %536, %79 : vector<8x64xf32>
      %538 = arith.addf %534, %537 : vector<8x64xf32>
      %c94 = arith.constant 94 : index
      %539 = memref.load %arg3[%c94] : memref<216xf32, #tpu.memory_space<smem>>
      %540 = vector.broadcast %539 : f32 to vector<8x64xf32>
      %541 = arith.mulf %540, %83 : vector<8x64xf32>
      %542 = arith.addf %538, %541 : vector<8x64xf32>
      %c103 = arith.constant 103 : index
      %543 = memref.load %arg3[%c103] : memref<216xf32, #tpu.memory_space<smem>>
      %544 = vector.broadcast %543 : f32 to vector<8x64xf32>
      %545 = arith.mulf %544, %87 : vector<8x64xf32>
      %546 = arith.addf %542, %545 : vector<8x64xf32>
      %c86 = arith.constant 86 : index
      %547 = memref.load %arg3[%c86] : memref<216xf32, #tpu.memory_space<smem>>
      %548 = vector.broadcast %547 : f32 to vector<8x64xf32>
      %549 = arith.mulf %548, %93 : vector<8x64xf32>
      %550 = arith.addf %546, %549 : vector<8x64xf32>
      %c95 = arith.constant 95 : index
      %551 = memref.load %arg3[%c95] : memref<216xf32, #tpu.memory_space<smem>>
      %552 = vector.broadcast %551 : f32 to vector<8x64xf32>
      %553 = arith.mulf %552, %97 : vector<8x64xf32>
      %554 = arith.addf %550, %553 : vector<8x64xf32>
      %c104 = arith.constant 104 : index
      %555 = memref.load %arg3[%c104] : memref<216xf32, #tpu.memory_space<smem>>
      %556 = vector.broadcast %555 : f32 to vector<8x64xf32>
      %557 = arith.mulf %556, %101 : vector<8x64xf32>
      %558 = arith.addf %554, %557 : vector<8x64xf32>
      %c87 = arith.constant 87 : index
      %559 = memref.load %arg3[%c87] : memref<216xf32, #tpu.memory_space<smem>>
      %560 = vector.broadcast %559 : f32 to vector<8x64xf32>
      %561 = arith.mulf %560, %107 : vector<8x64xf32>
      %562 = arith.addf %558, %561 : vector<8x64xf32>
      %c96 = arith.constant 96 : index
      %563 = memref.load %arg3[%c96] : memref<216xf32, #tpu.memory_space<smem>>
      %564 = vector.broadcast %563 : f32 to vector<8x64xf32>
      %565 = arith.mulf %564, %111 : vector<8x64xf32>
      %566 = arith.addf %562, %565 : vector<8x64xf32>
      %c105 = arith.constant 105 : index
      %567 = memref.load %arg3[%c105] : memref<216xf32, #tpu.memory_space<smem>>
      %568 = vector.broadcast %567 : f32 to vector<8x64xf32>
      %569 = arith.mulf %568, %115 : vector<8x64xf32>
      %570 = arith.addf %566, %569 : vector<8x64xf32>
      %c88 = arith.constant 88 : index
      %571 = memref.load %arg3[%c88] : memref<216xf32, #tpu.memory_space<smem>>
      %572 = vector.broadcast %571 : f32 to vector<8x64xf32>
      %573 = arith.mulf %572, %121 : vector<8x64xf32>
      %574 = arith.addf %570, %573 : vector<8x64xf32>
      %c97 = arith.constant 97 : index
      %575 = memref.load %arg3[%c97] : memref<216xf32, #tpu.memory_space<smem>>
      %576 = vector.broadcast %575 : f32 to vector<8x64xf32>
      %577 = arith.mulf %576, %125 : vector<8x64xf32>
      %578 = arith.addf %574, %577 : vector<8x64xf32>
      %c106 = arith.constant 106 : index
      %579 = memref.load %arg3[%c106] : memref<216xf32, #tpu.memory_space<smem>>
      %580 = vector.broadcast %579 : f32 to vector<8x64xf32>
      %581 = arith.mulf %580, %129 : vector<8x64xf32>
      %582 = arith.addf %578, %581 : vector<8x64xf32>
      %c89 = arith.constant 89 : index
      %583 = memref.load %arg3[%c89] : memref<216xf32, #tpu.memory_space<smem>>
      %584 = vector.broadcast %583 : f32 to vector<8x64xf32>
      %585 = arith.mulf %584, %135 : vector<8x64xf32>
      %586 = arith.addf %582, %585 : vector<8x64xf32>
      %c98 = arith.constant 98 : index
      %587 = memref.load %arg3[%c98] : memref<216xf32, #tpu.memory_space<smem>>
      %588 = vector.broadcast %587 : f32 to vector<8x64xf32>
      %589 = arith.mulf %588, %139 : vector<8x64xf32>
      %590 = arith.addf %586, %589 : vector<8x64xf32>
      %c107 = arith.constant 107 : index
      %591 = memref.load %arg3[%c107] : memref<216xf32, #tpu.memory_space<smem>>
      %592 = vector.broadcast %591 : f32 to vector<8x64xf32>
      %593 = arith.mulf %592, %143 : vector<8x64xf32>
      %594 = arith.addf %590, %593 : vector<8x64xf32>
      %c0_133 = arith.constant 0 : index
      %c192 = arith.constant 192 : index
      %595 = vector.load %arg11[%c0_133, %c192] : memref<8x512xf32, #tpu.memory_space<vmem>>, vector<8x64xf32>
      tpu.vector_store %arg11[%c0_133, %c192], %594 {strides = array<i32>} : memref<8x512xf32, #tpu.memory_space<vmem>>, vector<8x64xf32>,
      %cst_134 = arith.constant 0.000000e+00 : f32
      %596 = vector.broadcast %cst_134 : f32 to vector<8x64xf32>
      %c4_135 = arith.constant 4 : index
      %597 = memref.load %arg4[%c4_135] : memref<8xf32, #tpu.memory_space<smem>>
      %598 = vector.broadcast %597 : f32 to vector<8x64xf32>
      %599 = arith.addf %596, %598 : vector<8x64xf32>
      %c108 = arith.constant 108 : index
      %600 = memref.load %arg3[%c108] : memref<216xf32, #tpu.memory_space<smem>>
      %601 = vector.broadcast %600 : f32 to vector<8x64xf32>
      %602 = arith.mulf %601, %23 : vector<8x64xf32>
      %603 = arith.addf %599, %602 : vector<8x64xf32>
      %c117 = arith.constant 117 : index
      %604 = memref.load %arg3[%c117] : memref<216xf32, #tpu.memory_space<smem>>
      %605 = vector.broadcast %604 : f32 to vector<8x64xf32>
      %606 = arith.mulf %605, %27 : vector<8x64xf32>
      %607 = arith.addf %603, %606 : vector<8x64xf32>
      %c126 = arith.constant 126 : index
      %608 = memref.load %arg3[%c126] : memref<216xf32, #tpu.memory_space<smem>>
      %609 = vector.broadcast %608 : f32 to vector<8x64xf32>
      %610 = arith.mulf %609, %31 : vector<8x64xf32>
      %611 = arith.addf %607, %610 : vector<8x64xf32>
      %c109 = arith.constant 109 : index
      %612 = memref.load %arg3[%c109] : memref<216xf32, #tpu.memory_space<smem>>
      %613 = vector.broadcast %612 : f32 to vector<8x64xf32>
      %614 = arith.mulf %613, %37 : vector<8x64xf32>
      %615 = arith.addf %611, %614 : vector<8x64xf32>
      %c118 = arith.constant 118 : index
      %616 = memref.load %arg3[%c118] : memref<216xf32, #tpu.memory_space<smem>>
      %617 = vector.broadcast %616 : f32 to vector<8x64xf32>
      %618 = arith.mulf %617, %41 : vector<8x64xf32>
      %619 = arith.addf %615, %618 : vector<8x64xf32>
      %c127 = arith.constant 127 : index
      %620 = memref.load %arg3[%c127] : memref<216xf32, #tpu.memory_space<smem>>
      %621 = vector.broadcast %620 : f32 to vector<8x64xf32>
      %622 = arith.mulf %621, %45 : vector<8x64xf32>
      %623 = arith.addf %619, %622 : vector<8x64xf32>
      %c110 = arith.constant 110 : index
      %624 = memref.load %arg3[%c110] : memref<216xf32, #tpu.memory_space<smem>>
      %625 = vector.broadcast %624 : f32 to vector<8x64xf32>
      %626 = arith.mulf %625, %51 : vector<8x64xf32>
      %627 = arith.addf %623, %626 : vector<8x64xf32>
      %c119 = arith.constant 119 : index
      %628 = memref.load %arg3[%c119] : memref<216xf32, #tpu.memory_space<smem>>
      %629 = vector.broadcast %628 : f32 to vector<8x64xf32>
      %630 = arith.mulf %629, %55 : vector<8x64xf32>
      %631 = arith.addf %627, %630 : vector<8x64xf32>
      %c128_136 = arith.constant 128 : index
      %632 = memref.load %arg3[%c128_136] : memref<216xf32, #tpu.memory_space<smem>>
      %633 = vector.broadcast %632 : f32 to vector<8x64xf32>
      %634 = arith.mulf %633, %59 : vector<8x64xf32>
      %635 = arith.addf %631, %634 : vector<8x64xf32>
      %c111 = arith.constant 111 : index
      %636 = memref.load %arg3[%c111] : memref<216xf32, #tpu.memory_space<smem>>
      %637 = vector.broadcast %636 : f32 to vector<8x64xf32>
      %638 = arith.mulf %637, %65 : vector<8x64xf32>
      %639 = arith.addf %635, %638 : vector<8x64xf32>
      %c120 = arith.constant 120 : index
      %640 = memref.load %arg3[%c120] : memref<216xf32, #tpu.memory_space<smem>>
      %641 = vector.broadcast %640 : f32 to vector<8x64xf32>
      %642 = arith.mulf %641, %69 : vector<8x64xf32>
      %643 = arith.addf %639, %642 : vector<8x64xf32>
      %c129 = arith.constant 129 : index
      %644 = memref.load %arg3[%c129] : memref<216xf32, #tpu.memory_space<smem>>
      %645 = vector.broadcast %644 : f32 to vector<8x64xf32>
      %646 = arith.mulf %645, %73 : vector<8x64xf32>
      %647 = arith.addf %643, %646 : vector<8x64xf32>
      %c112 = arith.constant 112 : index
      %648 = memref.load %arg3[%c112] : memref<216xf32, #tpu.memory_space<smem>>
      %649 = vector.broadcast %648 : f32 to vector<8x64xf32>
      %650 = arith.mulf %649, %79 : vector<8x64xf32>
      %651 = arith.addf %647, %650 : vector<8x64xf32>
      %c121 = arith.constant 121 : index
      %652 = memref.load %arg3[%c121] : memref<216xf32, #tpu.memory_space<smem>>
      %653 = vector.broadcast %652 : f32 to vector<8x64xf32>
      %654 = arith.mulf %653, %83 : vector<8x64xf32>
      %655 = arith.addf %651, %654 : vector<8x64xf32>
      %c130 = arith.constant 130 : index
      %656 = memref.load %arg3[%c130] : memref<216xf32, #tpu.memory_space<smem>>
      %657 = vector.broadcast %656 : f32 to vector<8x64xf32>
      %658 = arith.mulf %657, %87 : vector<8x64xf32>
      %659 = arith.addf %655, %658 : vector<8x64xf32>
      %c113 = arith.constant 113 : index
      %660 = memref.load %arg3[%c113] : memref<216xf32, #tpu.memory_space<smem>>
      %661 = vector.broadcast %660 : f32 to vector<8x64xf32>
      %662 = arith.mulf %661, %93 : vector<8x64xf32>
      %663 = arith.addf %659, %662 : vector<8x64xf32>
      %c122 = arith.constant 122 : index
      %664 = memref.load %arg3[%c122] : memref<216xf32, #tpu.memory_space<smem>>
      %665 = vector.broadcast %664 : f32 to vector<8x64xf32>
      %666 = arith.mulf %665, %97 : vector<8x64xf32>
      %667 = arith.addf %663, %666 : vector<8x64xf32>
      %c131 = arith.constant 131 : index
      %668 = memref.load %arg3[%c131] : memref<216xf32, #tpu.memory_space<smem>>
      %669 = vector.broadcast %668 : f32 to vector<8x64xf32>
      %670 = arith.mulf %669, %101 : vector<8x64xf32>
      %671 = arith.addf %667, %670 : vector<8x64xf32>
      %c114 = arith.constant 114 : index
      %672 = memref.load %arg3[%c114] : memref<216xf32, #tpu.memory_space<smem>>
      %673 = vector.broadcast %672 : f32 to vector<8x64xf32>
      %674 = arith.mulf %673, %107 : vector<8x64xf32>
      %675 = arith.addf %671, %674 : vector<8x64xf32>
      %c123 = arith.constant 123 : index
      %676 = memref.load %arg3[%c123] : memref<216xf32, #tpu.memory_space<smem>>
      %677 = vector.broadcast %676 : f32 to vector<8x64xf32>
      %678 = arith.mulf %677, %111 : vector<8x64xf32>
      %679 = arith.addf %675, %678 : vector<8x64xf32>
      %c132 = arith.constant 132 : index
      %680 = memref.load %arg3[%c132] : memref<216xf32, #tpu.memory_space<smem>>
      %681 = vector.broadcast %680 : f32 to vector<8x64xf32>
      %682 = arith.mulf %681, %115 : vector<8x64xf32>
      %683 = arith.addf %679, %682 : vector<8x64xf32>
      %c115 = arith.constant 115 : index
      %684 = memref.load %arg3[%c115] : memref<216xf32, #tpu.memory_space<smem>>
      %685 = vector.broadcast %684 : f32 to vector<8x64xf32>
      %686 = arith.mulf %685, %121 : vector<8x64xf32>
      %687 = arith.addf %683, %686 : vector<8x64xf32>
      %c124 = arith.constant 124 : index
      %688 = memref.load %arg3[%c124] : memref<216xf32, #tpu.memory_space<smem>>
      %689 = vector.broadcast %688 : f32 to vector<8x64xf32>
      %690 = arith.mulf %689, %125 : vector<8x64xf32>
      %691 = arith.addf %687, %690 : vector<8x64xf32>
      %c133 = arith.constant 133 : index
      %692 = memref.load %arg3[%c133] : memref<216xf32, #tpu.memory_space<smem>>
      %693 = vector.broadcast %692 : f32 to vector<8x64xf32>
      %694 = arith.mulf %693, %129 : vector<8x64xf32>
      %695 = arith.addf %691, %694 : vector<8x64xf32>
      %c116 = arith.constant 116 : index
      %696 = memref.load %arg3[%c116] : memref<216xf32, #tpu.memory_space<smem>>
      %697 = vector.broadcast %696 : f32 to vector<8x64xf32>
      %698 = arith.mulf %697, %135 : vector<8x64xf32>
      %699 = arith.addf %695, %698 : vector<8x64xf32>
      %c125 = arith.constant 125 : index
      %700 = memref.load %arg3[%c125] : memref<216xf32, #tpu.memory_space<smem>>
      %701 = vector.broadcast %700 : f32 to vector<8x64xf32>
      %702 = arith.mulf %701, %139 : vector<8x64xf32>
      %703 = arith.addf %699, %702 : vector<8x64xf32>
      %c134 = arith.constant 134 : index
      %704 = memref.load %arg3[%c134] : memref<216xf32, #tpu.memory_space<smem>>
      %705 = vector.broadcast %704 : f32 to vector<8x64xf32>
      %706 = arith.mulf %705, %143 : vector<8x64xf32>
      %707 = arith.addf %703, %706 : vector<8x64xf32>
      %c0_137 = arith.constant 0 : index
      %c256 = arith.constant 256 : index
      %708 = vector.load %arg11[%c0_137, %c256] : memref<8x512xf32, #tpu.memory_space<vmem>>, vector<8x64xf32>
      tpu.vector_store %arg11[%c0_137, %c256], %707 {strides = array<i32>} : memref<8x512xf32, #tpu.memory_space<vmem>>, vector<8x64xf32>,
      %cst_138 = arith.constant 0.000000e+00 : f32
      %709 = vector.broadcast %cst_138 : f32 to vector<8x64xf32>
      %c5_139 = arith.constant 5 : index
      %710 = memref.load %arg4[%c5_139] : memref<8xf32, #tpu.memory_space<smem>>
      %711 = vector.broadcast %710 : f32 to vector<8x64xf32>
      %712 = arith.addf %709, %711 : vector<8x64xf32>
      %c135 = arith.constant 135 : index
      %713 = memref.load %arg3[%c135] : memref<216xf32, #tpu.memory_space<smem>>
      %714 = vector.broadcast %713 : f32 to vector<8x64xf32>
      %715 = arith.mulf %714, %23 : vector<8x64xf32>
      %716 = arith.addf %712, %715 : vector<8x64xf32>
      %c144 = arith.constant 144 : index
      %717 = memref.load %arg3[%c144] : memref<216xf32, #tpu.memory_space<smem>>
      %718 = vector.broadcast %717 : f32 to vector<8x64xf32>
      %719 = arith.mulf %718, %27 : vector<8x64xf32>
      %720 = arith.addf %716, %719 : vector<8x64xf32>
      %c153 = arith.constant 153 : index
      %721 = memref.load %arg3[%c153] : memref<216xf32, #tpu.memory_space<smem>>
      %722 = vector.broadcast %721 : f32 to vector<8x64xf32>
      %723 = arith.mulf %722, %31 : vector<8x64xf32>
      %724 = arith.addf %720, %723 : vector<8x64xf32>
      %c136 = arith.constant 136 : index
      %725 = memref.load %arg3[%c136] : memref<216xf32, #tpu.memory_space<smem>>
      %726 = vector.broadcast %725 : f32 to vector<8x64xf32>
      %727 = arith.mulf %726, %37 : vector<8x64xf32>
      %728 = arith.addf %724, %727 : vector<8x64xf32>
      %c145 = arith.constant 145 : index
      %729 = memref.load %arg3[%c145] : memref<216xf32, #tpu.memory_space<smem>>
      %730 = vector.broadcast %729 : f32 to vector<8x64xf32>
      %731 = arith.mulf %730, %41 : vector<8x64xf32>
      %732 = arith.addf %728, %731 : vector<8x64xf32>
      %c154 = arith.constant 154 : index
      %733 = memref.load %arg3[%c154] : memref<216xf32, #tpu.memory_space<smem>>
      %734 = vector.broadcast %733 : f32 to vector<8x64xf32>
      %735 = arith.mulf %734, %45 : vector<8x64xf32>
      %736 = arith.addf %732, %735 : vector<8x64xf32>
      %c137 = arith.constant 137 : index
      %737 = memref.load %arg3[%c137] : memref<216xf32, #tpu.memory_space<smem>>
      %738 = vector.broadcast %737 : f32 to vector<8x64xf32>
      %739 = arith.mulf %738, %51 : vector<8x64xf32>
      %740 = arith.addf %736, %739 : vector<8x64xf32>
      %c146 = arith.constant 146 : index
      %741 = memref.load %arg3[%c146] : memref<216xf32, #tpu.memory_space<smem>>
      %742 = vector.broadcast %741 : f32 to vector<8x64xf32>
      %743 = arith.mulf %742, %55 : vector<8x64xf32>
      %744 = arith.addf %740, %743 : vector<8x64xf32>
      %c155 = arith.constant 155 : index
      %745 = memref.load %arg3[%c155] : memref<216xf32, #tpu.memory_space<smem>>
      %746 = vector.broadcast %745 : f32 to vector<8x64xf32>
      %747 = arith.mulf %746, %59 : vector<8x64xf32>
      %748 = arith.addf %744, %747 : vector<8x64xf32>
      %c138 = arith.constant 138 : index
      %749 = memref.load %arg3[%c138] : memref<216xf32, #tpu.memory_space<smem>>
      %750 = vector.broadcast %749 : f32 to vector<8x64xf32>
      %751 = arith.mulf %750, %65 : vector<8x64xf32>
      %752 = arith.addf %748, %751 : vector<8x64xf32>
      %c147 = arith.constant 147 : index
      %753 = memref.load %arg3[%c147] : memref<216xf32, #tpu.memory_space<smem>>
      %754 = vector.broadcast %753 : f32 to vector<8x64xf32>
      %755 = arith.mulf %754, %69 : vector<8x64xf32>
      %756 = arith.addf %752, %755 : vector<8x64xf32>
      %c156 = arith.constant 156 : index
      %757 = memref.load %arg3[%c156] : memref<216xf32, #tpu.memory_space<smem>>
      %758 = vector.broadcast %757 : f32 to vector<8x64xf32>
      %759 = arith.mulf %758, %73 : vector<8x64xf32>
      %760 = arith.addf %756, %759 : vector<8x64xf32>
      %c139 = arith.constant 139 : index
      %761 = memref.load %arg3[%c139] : memref<216xf32, #tpu.memory_space<smem>>
      %762 = vector.broadcast %761 : f32 to vector<8x64xf32>
      %763 = arith.mulf %762, %79 : vector<8x64xf32>
      %764 = arith.addf %760, %763 : vector<8x64xf32>
      %c148 = arith.constant 148 : index
      %765 = memref.load %arg3[%c148] : memref<216xf32, #tpu.memory_space<smem>>
      %766 = vector.broadcast %765 : f32 to vector<8x64xf32>
      %767 = arith.mulf %766, %83 : vector<8x64xf32>
      %768 = arith.addf %764, %767 : vector<8x64xf32>
      %c157 = arith.constant 157 : index
      %769 = memref.load %arg3[%c157] : memref<216xf32, #tpu.memory_space<smem>>
      %770 = vector.broadcast %769 : f32 to vector<8x64xf32>
      %771 = arith.mulf %770, %87 : vector<8x64xf32>
      %772 = arith.addf %768, %771 : vector<8x64xf32>
      %c140 = arith.constant 140 : index
      %773 = memref.load %arg3[%c140] : memref<216xf32, #tpu.memory_space<smem>>
      %774 = vector.broadcast %773 : f32 to vector<8x64xf32>
      %775 = arith.mulf %774, %93 : vector<8x64xf32>
      %776 = arith.addf %772, %775 : vector<8x64xf32>
      %c149 = arith.constant 149 : index
      %777 = memref.load %arg3[%c149] : memref<216xf32, #tpu.memory_space<smem>>
      %778 = vector.broadcast %777 : f32 to vector<8x64xf32>
      %779 = arith.mulf %778, %97 : vector<8x64xf32>
      %780 = arith.addf %776, %779 : vector<8x64xf32>
      %c158 = arith.constant 158 : index
      %781 = memref.load %arg3[%c158] : memref<216xf32, #tpu.memory_space<smem>>
      %782 = vector.broadcast %781 : f32 to vector<8x64xf32>
      %783 = arith.mulf %782, %101 : vector<8x64xf32>
      %784 = arith.addf %780, %783 : vector<8x64xf32>
      %c141 = arith.constant 141 : index
      %785 = memref.load %arg3[%c141] : memref<216xf32, #tpu.memory_space<smem>>
      %786 = vector.broadcast %785 : f32 to vector<8x64xf32>
      %787 = arith.mulf %786, %107 : vector<8x64xf32>
      %788 = arith.addf %784, %787 : vector<8x64xf32>
      %c150 = arith.constant 150 : index
      %789 = memref.load %arg3[%c150] : memref<216xf32, #tpu.memory_space<smem>>
      %790 = vector.broadcast %789 : f32 to vector<8x64xf32>
      %791 = arith.mulf %790, %111 : vector<8x64xf32>
      %792 = arith.addf %788, %791 : vector<8x64xf32>
      %c159 = arith.constant 159 : index
      %793 = memref.load %arg3[%c159] : memref<216xf32, #tpu.memory_space<smem>>
      %794 = vector.broadcast %793 : f32 to vector<8x64xf32>
      %795 = arith.mulf %794, %115 : vector<8x64xf32>
      %796 = arith.addf %792, %795 : vector<8x64xf32>
      %c142 = arith.constant 142 : index
      %797 = memref.load %arg3[%c142] : memref<216xf32, #tpu.memory_space<smem>>
      %798 = vector.broadcast %797 : f32 to vector<8x64xf32>
      %799 = arith.mulf %798, %121 : vector<8x64xf32>
      %800 = arith.addf %796, %799 : vector<8x64xf32>
      %c151 = arith.constant 151 : index
      %801 = memref.load %arg3[%c151] : memref<216xf32, #tpu.memory_space<smem>>
      %802 = vector.broadcast %801 : f32 to vector<8x64xf32>
      %803 = arith.mulf %802, %125 : vector<8x64xf32>
      %804 = arith.addf %800, %803 : vector<8x64xf32>
      %c160 = arith.constant 160 : index
      %805 = memref.load %arg3[%c160] : memref<216xf32, #tpu.memory_space<smem>>
      %806 = vector.broadcast %805 : f32 to vector<8x64xf32>
      %807 = arith.mulf %806, %129 : vector<8x64xf32>
      %808 = arith.addf %804, %807 : vector<8x64xf32>
      %c143 = arith.constant 143 : index
      %809 = memref.load %arg3[%c143] : memref<216xf32, #tpu.memory_space<smem>>
      %810 = vector.broadcast %809 : f32 to vector<8x64xf32>
      %811 = arith.mulf %810, %135 : vector<8x64xf32>
      %812 = arith.addf %808, %811 : vector<8x64xf32>
      %c152 = arith.constant 152 : index
      %813 = memref.load %arg3[%c152] : memref<216xf32, #tpu.memory_space<smem>>
      %814 = vector.broadcast %813 : f32 to vector<8x64xf32>
      %815 = arith.mulf %814, %139 : vector<8x64xf32>
      %816 = arith.addf %812, %815 : vector<8x64xf32>
      %c161 = arith.constant 161 : index
      %817 = memref.load %arg3[%c161] : memref<216xf32, #tpu.memory_space<smem>>
      %818 = vector.broadcast %817 : f32 to vector<8x64xf32>
      %819 = arith.mulf %818, %143 : vector<8x64xf32>
      %820 = arith.addf %816, %819 : vector<8x64xf32>
      %c0_140 = arith.constant 0 : index
      %c320 = arith.constant 320 : index
      %821 = vector.load %arg11[%c0_140, %c320] : memref<8x512xf32, #tpu.memory_space<vmem>>, vector<8x64xf32>
      tpu.vector_store %arg11[%c0_140, %c320], %820 {strides = array<i32>} : memref<8x512xf32, #tpu.memory_space<vmem>>, vector<8x64xf32>,
      %cst_141 = arith.constant 0.000000e+00 : f32
      %822 = vector.broadcast %cst_141 : f32 to vector<8x64xf32>
      %c6_142 = arith.constant 6 : index
      %823 = memref.load %arg4[%c6_142] : memref<8xf32, #tpu.memory_space<smem>>
      %824 = vector.broadcast %823 : f32 to vector<8x64xf32>
      %825 = arith.addf %822, %824 : vector<8x64xf32>
      %c162 = arith.constant 162 : index
      %826 = memref.load %arg3[%c162] : memref<216xf32, #tpu.memory_space<smem>>
      %827 = vector.broadcast %826 : f32 to vector<8x64xf32>
      %828 = arith.mulf %827, %23 : vector<8x64xf32>
      %829 = arith.addf %825, %828 : vector<8x64xf32>
      %c171 = arith.constant 171 : index
      %830 = memref.load %arg3[%c171] : memref<216xf32, #tpu.memory_space<smem>>
      %831 = vector.broadcast %830 : f32 to vector<8x64xf32>
      %832 = arith.mulf %831, %27 : vector<8x64xf32>
      %833 = arith.addf %829, %832 : vector<8x64xf32>
      %c180 = arith.constant 180 : index
      %834 = memref.load %arg3[%c180] : memref<216xf32, #tpu.memory_space<smem>>
      %835 = vector.broadcast %834 : f32 to vector<8x64xf32>
      %836 = arith.mulf %835, %31 : vector<8x64xf32>
      %837 = arith.addf %833, %836 : vector<8x64xf32>
      %c163 = arith.constant 163 : index
      %838 = memref.load %arg3[%c163] : memref<216xf32, #tpu.memory_space<smem>>
      %839 = vector.broadcast %838 : f32 to vector<8x64xf32>
      %840 = arith.mulf %839, %37 : vector<8x64xf32>
      %841 = arith.addf %837, %840 : vector<8x64xf32>
      %c172 = arith.constant 172 : index
      %842 = memref.load %arg3[%c172] : memref<216xf32, #tpu.memory_space<smem>>
      %843 = vector.broadcast %842 : f32 to vector<8x64xf32>
      %844 = arith.mulf %843, %41 : vector<8x64xf32>
      %845 = arith.addf %841, %844 : vector<8x64xf32>
      %c181 = arith.constant 181 : index
      %846 = memref.load %arg3[%c181] : memref<216xf32, #tpu.memory_space<smem>>
      %847 = vector.broadcast %846 : f32 to vector<8x64xf32>
      %848 = arith.mulf %847, %45 : vector<8x64xf32>
      %849 = arith.addf %845, %848 : vector<8x64xf32>
      %c164 = arith.constant 164 : index
      %850 = memref.load %arg3[%c164] : memref<216xf32, #tpu.memory_space<smem>>
      %851 = vector.broadcast %850 : f32 to vector<8x64xf32>
      %852 = arith.mulf %851, %51 : vector<8x64xf32>
      %853 = arith.addf %849, %852 : vector<8x64xf32>
      %c173 = arith.constant 173 : index
      %854 = memref.load %arg3[%c173] : memref<216xf32, #tpu.memory_space<smem>>
      %855 = vector.broadcast %854 : f32 to vector<8x64xf32>
      %856 = arith.mulf %855, %55 : vector<8x64xf32>
      %857 = arith.addf %853, %856 : vector<8x64xf32>
      %c182 = arith.constant 182 : index
      %858 = memref.load %arg3[%c182] : memref<216xf32, #tpu.memory_space<smem>>
      %859 = vector.broadcast %858 : f32 to vector<8x64xf32>
      %860 = arith.mulf %859, %59 : vector<8x64xf32>
      %861 = arith.addf %857, %860 : vector<8x64xf32>
      %c165 = arith.constant 165 : index
      %862 = memref.load %arg3[%c165] : memref<216xf32, #tpu.memory_space<smem>>
      %863 = vector.broadcast %862 : f32 to vector<8x64xf32>
      %864 = arith.mulf %863, %65 : vector<8x64xf32>
      %865 = arith.addf %861, %864 : vector<8x64xf32>
      %c174 = arith.constant 174 : index
      %866 = memref.load %arg3[%c174] : memref<216xf32, #tpu.memory_space<smem>>
      %867 = vector.broadcast %866 : f32 to vector<8x64xf32>
      %868 = arith.mulf %867, %69 : vector<8x64xf32>
      %869 = arith.addf %865, %868 : vector<8x64xf32>
      %c183 = arith.constant 183 : index
      %870 = memref.load %arg3[%c183] : memref<216xf32, #tpu.memory_space<smem>>
      %871 = vector.broadcast %870 : f32 to vector<8x64xf32>
      %872 = arith.mulf %871, %73 : vector<8x64xf32>
      %873 = arith.addf %869, %872 : vector<8x64xf32>
      %c166 = arith.constant 166 : index
      %874 = memref.load %arg3[%c166] : memref<216xf32, #tpu.memory_space<smem>>
      %875 = vector.broadcast %874 : f32 to vector<8x64xf32>
      %876 = arith.mulf %875, %79 : vector<8x64xf32>
      %877 = arith.addf %873, %876 : vector<8x64xf32>
      %c175 = arith.constant 175 : index
      %878 = memref.load %arg3[%c175] : memref<216xf32, #tpu.memory_space<smem>>
      %879 = vector.broadcast %878 : f32 to vector<8x64xf32>
      %880 = arith.mulf %879, %83 : vector<8x64xf32>
      %881 = arith.addf %877, %880 : vector<8x64xf32>
      %c184 = arith.constant 184 : index
      %882 = memref.load %arg3[%c184] : memref<216xf32, #tpu.memory_space<smem>>
      %883 = vector.broadcast %882 : f32 to vector<8x64xf32>
      %884 = arith.mulf %883, %87 : vector<8x64xf32>
      %885 = arith.addf %881, %884 : vector<8x64xf32>
      %c167 = arith.constant 167 : index
      %886 = memref.load %arg3[%c167] : memref<216xf32, #tpu.memory_space<smem>>
      %887 = vector.broadcast %886 : f32 to vector<8x64xf32>
      %888 = arith.mulf %887, %93 : vector<8x64xf32>
      %889 = arith.addf %885, %888 : vector<8x64xf32>
      %c176 = arith.constant 176 : index
      %890 = memref.load %arg3[%c176] : memref<216xf32, #tpu.memory_space<smem>>
      %891 = vector.broadcast %890 : f32 to vector<8x64xf32>
      %892 = arith.mulf %891, %97 : vector<8x64xf32>
      %893 = arith.addf %889, %892 : vector<8x64xf32>
      %c185 = arith.constant 185 : index
      %894 = memref.load %arg3[%c185] : memref<216xf32, #tpu.memory_space<smem>>
      %895 = vector.broadcast %894 : f32 to vector<8x64xf32>
      %896 = arith.mulf %895, %101 : vector<8x64xf32>
      %897 = arith.addf %893, %896 : vector<8x64xf32>
      %c168 = arith.constant 168 : index
      %898 = memref.load %arg3[%c168] : memref<216xf32, #tpu.memory_space<smem>>
      %899 = vector.broadcast %898 : f32 to vector<8x64xf32>
      %900 = arith.mulf %899, %107 : vector<8x64xf32>
      %901 = arith.addf %897, %900 : vector<8x64xf32>
      %c177 = arith.constant 177 : index
      %902 = memref.load %arg3[%c177] : memref<216xf32, #tpu.memory_space<smem>>
      %903 = vector.broadcast %902 : f32 to vector<8x64xf32>
      %904 = arith.mulf %903, %111 : vector<8x64xf32>
      %905 = arith.addf %901, %904 : vector<8x64xf32>
      %c186 = arith.constant 186 : index
      %906 = memref.load %arg3[%c186] : memref<216xf32, #tpu.memory_space<smem>>
      %907 = vector.broadcast %906 : f32 to vector<8x64xf32>
      %908 = arith.mulf %907, %115 : vector<8x64xf32>
      %909 = arith.addf %905, %908 : vector<8x64xf32>
      %c169 = arith.constant 169 : index
      %910 = memref.load %arg3[%c169] : memref<216xf32, #tpu.memory_space<smem>>
      %911 = vector.broadcast %910 : f32 to vector<8x64xf32>
      %912 = arith.mulf %911, %121 : vector<8x64xf32>
      %913 = arith.addf %909, %912 : vector<8x64xf32>
      %c178 = arith.constant 178 : index
      %914 = memref.load %arg3[%c178] : memref<216xf32, #tpu.memory_space<smem>>
      %915 = vector.broadcast %914 : f32 to vector<8x64xf32>
      %916 = arith.mulf %915, %125 : vector<8x64xf32>
      %917 = arith.addf %913, %916 : vector<8x64xf32>
      %c187 = arith.constant 187 : index
      %918 = memref.load %arg3[%c187] : memref<216xf32, #tpu.memory_space<smem>>
      %919 = vector.broadcast %918 : f32 to vector<8x64xf32>
      %920 = arith.mulf %919, %129 : vector<8x64xf32>
      %921 = arith.addf %917, %920 : vector<8x64xf32>
      %c170 = arith.constant 170 : index
      %922 = memref.load %arg3[%c170] : memref<216xf32, #tpu.memory_space<smem>>
      %923 = vector.broadcast %922 : f32 to vector<8x64xf32>
      %924 = arith.mulf %923, %135 : vector<8x64xf32>
      %925 = arith.addf %921, %924 : vector<8x64xf32>
      %c179 = arith.constant 179 : index
      %926 = memref.load %arg3[%c179] : memref<216xf32, #tpu.memory_space<smem>>
      %927 = vector.broadcast %926 : f32 to vector<8x64xf32>
      %928 = arith.mulf %927, %139 : vector<8x64xf32>
      %929 = arith.addf %925, %928 : vector<8x64xf32>
      %c188 = arith.constant 188 : index
      %930 = memref.load %arg3[%c188] : memref<216xf32, #tpu.memory_space<smem>>
      %931 = vector.broadcast %930 : f32 to vector<8x64xf32>
      %932 = arith.mulf %931, %143 : vector<8x64xf32>
      %933 = arith.addf %929, %932 : vector<8x64xf32>
      %c0_143 = arith.constant 0 : index
      %c384 = arith.constant 384 : index
      %934 = vector.load %arg11[%c0_143, %c384] : memref<8x512xf32, #tpu.memory_space<vmem>>, vector<8x64xf32>
      tpu.vector_store %arg11[%c0_143, %c384], %933 {strides = array<i32>} : memref<8x512xf32, #tpu.memory_space<vmem>>, vector<8x64xf32>,
      %cst_144 = arith.constant 0.000000e+00 : f32
      %935 = vector.broadcast %cst_144 : f32 to vector<8x64xf32>
      %c7_145 = arith.constant 7 : index
      %936 = memref.load %arg4[%c7_145] : memref<8xf32, #tpu.memory_space<smem>>
      %937 = vector.broadcast %936 : f32 to vector<8x64xf32>
      %938 = arith.addf %935, %937 : vector<8x64xf32>
      %c189 = arith.constant 189 : index
      %939 = memref.load %arg3[%c189] : memref<216xf32, #tpu.memory_space<smem>>
      %940 = vector.broadcast %939 : f32 to vector<8x64xf32>
      %941 = arith.mulf %940, %23 : vector<8x64xf32>
      %942 = arith.addf %938, %941 : vector<8x64xf32>
      %c198 = arith.constant 198 : index
      %943 = memref.load %arg3[%c198] : memref<216xf32, #tpu.memory_space<smem>>
      %944 = vector.broadcast %943 : f32 to vector<8x64xf32>
      %945 = arith.mulf %944, %27 : vector<8x64xf32>
      %946 = arith.addf %942, %945 : vector<8x64xf32>
      %c207 = arith.constant 207 : index
      %947 = memref.load %arg3[%c207] : memref<216xf32, #tpu.memory_space<smem>>
      %948 = vector.broadcast %947 : f32 to vector<8x64xf32>
      %949 = arith.mulf %948, %31 : vector<8x64xf32>
      %950 = arith.addf %946, %949 : vector<8x64xf32>
      %c190 = arith.constant 190 : index
      %951 = memref.load %arg3[%c190] : memref<216xf32, #tpu.memory_space<smem>>
      %952 = vector.broadcast %951 : f32 to vector<8x64xf32>
      %953 = arith.mulf %952, %37 : vector<8x64xf32>
      %954 = arith.addf %950, %953 : vector<8x64xf32>
      %c199 = arith.constant 199 : index
      %955 = memref.load %arg3[%c199] : memref<216xf32, #tpu.memory_space<smem>>
      %956 = vector.broadcast %955 : f32 to vector<8x64xf32>
      %957 = arith.mulf %956, %41 : vector<8x64xf32>
      %958 = arith.addf %954, %957 : vector<8x64xf32>
      %c208 = arith.constant 208 : index
      %959 = memref.load %arg3[%c208] : memref<216xf32, #tpu.memory_space<smem>>
      %960 = vector.broadcast %959 : f32 to vector<8x64xf32>
      %961 = arith.mulf %960, %45 : vector<8x64xf32>
      %962 = arith.addf %958, %961 : vector<8x64xf32>
      %c191 = arith.constant 191 : index
      %963 = memref.load %arg3[%c191] : memref<216xf32, #tpu.memory_space<smem>>
      %964 = vector.broadcast %963 : f32 to vector<8x64xf32>
      %965 = arith.mulf %964, %51 : vector<8x64xf32>
      %966 = arith.addf %962, %965 : vector<8x64xf32>
      %c200 = arith.constant 200 : index
      %967 = memref.load %arg3[%c200] : memref<216xf32, #tpu.memory_space<smem>>
      %968 = vector.broadcast %967 : f32 to vector<8x64xf32>
      %969 = arith.mulf %968, %55 : vector<8x64xf32>
      %970 = arith.addf %966, %969 : vector<8x64xf32>
      %c209 = arith.constant 209 : index
      %971 = memref.load %arg3[%c209] : memref<216xf32, #tpu.memory_space<smem>>
      %972 = vector.broadcast %971 : f32 to vector<8x64xf32>
      %973 = arith.mulf %972, %59 : vector<8x64xf32>
      %974 = arith.addf %970, %973 : vector<8x64xf32>
      %c192_146 = arith.constant 192 : index
      %975 = memref.load %arg3[%c192_146] : memref<216xf32, #tpu.memory_space<smem>>
      %976 = vector.broadcast %975 : f32 to vector<8x64xf32>
      %977 = arith.mulf %976, %65 : vector<8x64xf32>
      %978 = arith.addf %974, %977 : vector<8x64xf32>
      %c201 = arith.constant 201 : index
      %979 = memref.load %arg3[%c201] : memref<216xf32, #tpu.memory_space<smem>>
      %980 = vector.broadcast %979 : f32 to vector<8x64xf32>
      %981 = arith.mulf %980, %69 : vector<8x64xf32>
      %982 = arith.addf %978, %981 : vector<8x64xf32>
      %c210 = arith.constant 210 : index
      %983 = memref.load %arg3[%c210] : memref<216xf32, #tpu.memory_space<smem>>
      %984 = vector.broadcast %983 : f32 to vector<8x64xf32>
      %985 = arith.mulf %984, %73 : vector<8x64xf32>
      %986 = arith.addf %982, %985 : vector<8x64xf32>
      %c193 = arith.constant 193 : index
      %987 = memref.load %arg3[%c193] : memref<216xf32, #tpu.memory_space<smem>>
      %988 = vector.broadcast %987 : f32 to vector<8x64xf32>
      %989 = arith.mulf %988, %79 : vector<8x64xf32>
      %990 = arith.addf %986, %989 : vector<8x64xf32>
      %c202 = arith.constant 202 : index
      %991 = memref.load %arg3[%c202] : memref<216xf32, #tpu.memory_space<smem>>
      %992 = vector.broadcast %991 : f32 to vector<8x64xf32>
      %993 = arith.mulf %992, %83 : vector<8x64xf32>
      %994 = arith.addf %990, %993 : vector<8x64xf32>
      %c211 = arith.constant 211 : index
      %995 = memref.load %arg3[%c211] : memref<216xf32, #tpu.memory_space<smem>>
      %996 = vector.broadcast %995 : f32 to vector<8x64xf32>
      %997 = arith.mulf %996, %87 : vector<8x64xf32>
      %998 = arith.addf %994, %997 : vector<8x64xf32>
      %c194 = arith.constant 194 : index
      %999 = memref.load %arg3[%c194] : memref<216xf32, #tpu.memory_space<smem>>
      %1000 = vector.broadcast %999 : f32 to vector<8x64xf32>
      %1001 = arith.mulf %1000, %93 : vector<8x64xf32>
      %1002 = arith.addf %998, %1001 : vector<8x64xf32>
      %c203 = arith.constant 203 : index
      %1003 = memref.load %arg3[%c203] : memref<216xf32, #tpu.memory_space<smem>>
      %1004 = vector.broadcast %1003 : f32 to vector<8x64xf32>
      %1005 = arith.mulf %1004, %97 : vector<8x64xf32>
      %1006 = arith.addf %1002, %1005 : vector<8x64xf32>
      %c212 = arith.constant 212 : index
      %1007 = memref.load %arg3[%c212] : memref<216xf32, #tpu.memory_space<smem>>
      %1008 = vector.broadcast %1007 : f32 to vector<8x64xf32>
      %1009 = arith.mulf %1008, %101 : vector<8x64xf32>
      %1010 = arith.addf %1006, %1009 : vector<8x64xf32>
      %c195 = arith.constant 195 : index
      %1011 = memref.load %arg3[%c195] : memref<216xf32, #tpu.memory_space<smem>>
      %1012 = vector.broadcast %1011 : f32 to vector<8x64xf32>
      %1013 = arith.mulf %1012, %107 : vector<8x64xf32>
      %1014 = arith.addf %1010, %1013 : vector<8x64xf32>
      %c204 = arith.constant 204 : index
      %1015 = memref.load %arg3[%c204] : memref<216xf32, #tpu.memory_space<smem>>
      %1016 = vector.broadcast %1015 : f32 to vector<8x64xf32>
      %1017 = arith.mulf %1016, %111 : vector<8x64xf32>
      %1018 = arith.addf %1014, %1017 : vector<8x64xf32>
      %c213 = arith.constant 213 : index
      %1019 = memref.load %arg3[%c213] : memref<216xf32, #tpu.memory_space<smem>>
      %1020 = vector.broadcast %1019 : f32 to vector<8x64xf32>
      %1021 = arith.mulf %1020, %115 : vector<8x64xf32>
      %1022 = arith.addf %1018, %1021 : vector<8x64xf32>
      %c196 = arith.constant 196 : index
      %1023 = memref.load %arg3[%c196] : memref<216xf32, #tpu.memory_space<smem>>
      %1024 = vector.broadcast %1023 : f32 to vector<8x64xf32>
      %1025 = arith.mulf %1024, %121 : vector<8x64xf32>
      %1026 = arith.addf %1022, %1025 : vector<8x64xf32>
      %c205 = arith.constant 205 : index
      %1027 = memref.load %arg3[%c205] : memref<216xf32, #tpu.memory_space<smem>>
      %1028 = vector.broadcast %1027 : f32 to vector<8x64xf32>
      %1029 = arith.mulf %1028, %125 : vector<8x64xf32>
      %1030 = arith.addf %1026, %1029 : vector<8x64xf32>
      %c214 = arith.constant 214 : index
      %1031 = memref.load %arg3[%c214] : memref<216xf32, #tpu.memory_space<smem>>
      %1032 = vector.broadcast %1031 : f32 to vector<8x64xf32>
      %1033 = arith.mulf %1032, %129 : vector<8x64xf32>
      %1034 = arith.addf %1030, %1033 : vector<8x64xf32>
      %c197 = arith.constant 197 : index
      %1035 = memref.load %arg3[%c197] : memref<216xf32, #tpu.memory_space<smem>>
      %1036 = vector.broadcast %1035 : f32 to vector<8x64xf32>
      %1037 = arith.mulf %1036, %135 : vector<8x64xf32>
      %1038 = arith.addf %1034, %1037 : vector<8x64xf32>
      %c206 = arith.constant 206 : index
      %1039 = memref.load %arg3[%c206] : memref<216xf32, #tpu.memory_space<smem>>
      %1040 = vector.broadcast %1039 : f32 to vector<8x64xf32>
      %1041 = arith.mulf %1040, %139 : vector<8x64xf32>
      %1042 = arith.addf %1038, %1041 : vector<8x64xf32>
      %c215 = arith.constant 215 : index
      %1043 = memref.load %arg3[%c215] : memref<216xf32, #tpu.memory_space<smem>>
      %1044 = vector.broadcast %1043 : f32 to vector<8x64xf32>
      %1045 = arith.mulf %1044, %143 : vector<8x64xf32>
      %1046 = arith.addf %1042, %1045 : vector<8x64xf32>
      %c0_147 = arith.constant 0 : index
      %c448 = arith.constant 448 : index
      %1047 = vector.load %arg11[%c0_147, %c448] : memref<8x512xf32, #tpu.memory_space<vmem>>, vector<8x64xf32>
      tpu.vector_store %arg11[%c0_147, %c448], %1046 {strides = array<i32>} : memref<8x512xf32, #tpu.memory_space<vmem>>, vector<8x64xf32>,
    } else {
    }
    %c0 = arith.constant 0 : index
    %c0_1 = arith.constant 0 : index
    %3 = vector.load %arg11[%c0, %c0_1] : memref<8x512xf32, #tpu.memory_space<vmem>>, vector<8x512xf32>
    %c0_2 = arith.constant 0 : index
    %c0_3 = arith.constant 0 : index
    %c0_4 = arith.constant 0 : index
    %4 = vector.load %arg5[%c0_2, %c0_3, %c0_4] : memref<1x512x128xf32, #tpu.memory_space<vmem>>, vector<1x512x128xf32>
    %5 = vector.shape_cast %4 : vector<1x512x128xf32> to vector<512x128xf32>
    %cst = arith.constant dense<0.000000e+00> : vector<8x128xf32>
    %6 = tpu.matmul %3, %5, %cst {dimension_numbers = #tpu.dot_dimension_numbers<[1], [0], [0], [1], [0, 0, 1, 1], [], []>} : vector<8x512xf32>, vector<512x128xf32>, vector<8x128xf32> -> vector<8x128xf32>
    %c0_5 = arith.constant 0 : index
    %c0_6 = arith.constant 0 : index
    %c0_7 = arith.constant 0 : index
    %7 = vector.load %arg6[%c0_5, %c0_6, %c0_7] : memref<1x1x128xf32, #tpu.memory_space<vmem>>, vector<1x1x128xf32>
    %8 = vector.shape_cast %7 : vector<1x1x128xf32> to vector<1x128xf32>
    %9 = vector.broadcast %8 : vector<1x128xf32> to vector<8x128xf32>
    %10 = arith.addf %6, %9 : vector<8x128xf32>
    %11 = arith.index_cast %arg0 : i32 to index
    %c0_8 = arith.constant 0 : index
    %c0_9 = arith.constant 0 : index
    %12 = vector.load %arg12[%11, %c0_8, %c0_9] : memref<4x8x128xf32, #tpu.memory_space<vmem>>, vector<1x8x128xf32>
    %13 = vector.shape_cast %12 : vector<1x8x128xf32> to vector<8x128xf32>
    %14 = vector.shape_cast %10 : vector<8x128xf32> to vector<1x8x128xf32>
    tpu.vector_store %arg12[%11, %c0_8, %c0_9], %14 {strides = array<i32>} : memref<4x8x128xf32, #tpu.memory_space<vmem>>, vector<1x8x128xf32>,
    %c3_i32 = arith.constant 3 : i32
    %15 = arith.cmpi eq, %arg0, %c3_i32 : i32
    %16 = arith.extui %15 : i1 to i32
    %c0_i32_10 = arith.constant 0 : i32
    %17 = arith.cmpi ne, %16, %c0_i32_10 : i32
    scf.if %17 {
      %cst_11 = arith.constant 0.000000e+00 : f32
      %18 = vector.broadcast %cst_11 : f32 to vector<2x128xf32>
      %cst_12 = arith.constant 0.000000e+00 : f32
      %19 = vector.broadcast %cst_12 : f32 to vector<2x128xf32>
      %c0_13 = arith.constant 0 : index
      %c0_14 = arith.constant 0 : index
      %20 = vector.load %arg7[%c0_13, %c0_14] : memref<128x512xf32, #tpu.memory_space<vmem>>, vector<128x512xf32>
      %cst_15 = arith.constant dense<0.000000e+00> : vector<2x512xf32>
      %21 = tpu.matmul %18, %20, %cst_15 {dimension_numbers = #tpu.dot_dimension_numbers<[1], [0], [0], [1], [0, 0, 1, 1], [], []>} : vector<2x128xf32>, vector<128x512xf32>, vector<2x512xf32> -> vector<2x512xf32>
      %c0_16 = arith.constant 0 : index
      %c0_17 = arith.constant 0 : index
      %c0_18 = arith.constant 0 : index
      %22 = vector.load %arg12[%c0_16, %c0_17, %c0_18] : memref<4x8x128xf32, #tpu.memory_space<vmem>>, vector<1x2x128xf32>
      %23 = vector.shape_cast %22 : vector<1x2x128xf32> to vector<2x128xf32>
      %24 = vector.extract_strided_slice %21 {offsets = [0, 0], sizes = [2, 128], strides = [1, 1]} : vector<2x512xf32> to vector<2x128xf32>
      %25 = arith.addf %23, %24 : vector<2x128xf32>
      %26 = arith.negf %25 : vector<2x128xf32>
      %27 = math.exp %26 : vector<2x128xf32>
      %cst_19 = arith.constant 1.000000e+00 : f32
      %28 = vector.broadcast %cst_19 : f32 to vector<2x128xf32>
      %29 = arith.addf %28, %27 : vector<2x128xf32>
      %30 = arith.divf %28, %29 : vector<2x128xf32>
      %c1 = arith.constant 1 : index
      %c0_20 = arith.constant 0 : index
      %c0_21 = arith.constant 0 : index
      %31 = vector.load %arg12[%c1, %c0_20, %c0_21] : memref<4x8x128xf32, #tpu.memory_space<vmem>>, vector<1x2x128xf32>
      %32 = vector.shape_cast %31 : vector<1x2x128xf32> to vector<2x128xf32>
      %33 = vector.extract_strided_slice %21 {offsets = [0, 128], sizes = [2, 128], strides = [1, 1]} : vector<2x512xf32> to vector<2x128xf32>
      %34 = arith.addf %32, %33 : vector<2x128xf32>
      %35 = arith.negf %34 : vector<2x128xf32>
      %36 = math.exp %35 : vector<2x128xf32>
      %cst_22 = arith.constant 1.000000e+00 : f32
      %37 = vector.broadcast %cst_22 : f32 to vector<2x128xf32>
      %38 = arith.addf %37, %36 : vector<2x128xf32>
      %39 = arith.divf %37, %38 : vector<2x128xf32>
      %c2 = arith.constant 2 : index
      %c0_23 = arith.constant 0 : index
      %c0_24 = arith.constant 0 : index
      %40 = vector.load %arg12[%c2, %c0_23, %c0_24] : memref<4x8x128xf32, #tpu.memory_space<vmem>>, vector<1x2x128xf32>
      %41 = vector.shape_cast %40 : vector<1x2x128xf32> to vector<2x128xf32>
      %42 = vector.extract_strided_slice %21 {offsets = [0, 256], sizes = [2, 128], strides = [1, 1]} : vector<2x512xf32> to vector<2x128xf32>
      %43 = arith.addf %41, %42 : vector<2x128xf32>
      %44 = math.tanh %43 : vector<2x128xf32>
      %c3 = arith.constant 3 : index
      %c0_25 = arith.constant 0 : index
      %c0_26 = arith.constant 0 : index
      %45 = vector.load %arg12[%c3, %c0_25, %c0_26] : memref<4x8x128xf32, #tpu.memory_space<vmem>>, vector<1x2x128xf32>
      %46 = vector.shape_cast %45 : vector<1x2x128xf32> to vector<2x128xf32>
      %47 = vector.extract_strided_slice %21 {offsets = [0, 384], sizes = [2, 128], strides = [1, 1]} : vector<2x512xf32> to vector<2x128xf32>
      %48 = arith.addf %46, %47 : vector<2x128xf32>
      %49 = arith.negf %48 : vector<2x128xf32>
      %50 = math.exp %49 : vector<2x128xf32>
      %cst_27 = arith.constant 1.000000e+00 : f32
      %51 = vector.broadcast %cst_27 : f32 to vector<2x128xf32>
      %52 = arith.addf %51, %50 : vector<2x128xf32>
      %53 = arith.divf %51, %52 : vector<2x128xf32>
      %54 = arith.mulf %39, %19 : vector<2x128xf32>
      %55 = arith.mulf %30, %44 : vector<2x128xf32>
      %56 = arith.addf %54, %55 : vector<2x128xf32>
      %57 = math.tanh %56 : vector<2x128xf32>
      %58 = arith.mulf %53, %57 : vector<2x128xf32>
      %c0_28 = arith.constant 0 : index
      %c0_29 = arith.constant 0 : index
      %59 = vector.load %arg7[%c0_28, %c0_29] : memref<128x512xf32, #tpu.memory_space<vmem>>, vector<128x512xf32>
      %cst_30 = arith.constant dense<0.000000e+00> : vector<2x512xf32>
      %60 = tpu.matmul %58, %59, %cst_30 {dimension_numbers = #tpu.dot_dimension_numbers<[1], [0], [0], [1], [0, 0, 1, 1], [], []>} : vector<2x128xf32>, vector<128x512xf32>, vector<2x512xf32> -> vector<2x512xf32>
      %c0_31 = arith.constant 0 : index
      %c2_32 = arith.constant 2 : index
      %c0_33 = arith.constant 0 : index
      %61 = vector.load %arg12[%c0_31, %c2_32, %c0_33] : memref<4x8x128xf32, #tpu.memory_space<vmem>>, vector<1x2x128xf32>
      %62 = vector.shape_cast %61 : vector<1x2x128xf32> to vector<2x128xf32>
      %63 = vector.extract_strided_slice %60 {offsets = [0, 0], sizes = [2, 128], strides = [1, 1]} : vector<2x512xf32> to vector<2x128xf32>
      %64 = arith.addf %62, %63 : vector<2x128xf32>
      %65 = arith.negf %64 : vector<2x128xf32>
      %66 = math.exp %65 : vector<2x128xf32>
      %cst_34 = arith.constant 1.000000e+00 : f32
      %67 = vector.broadcast %cst_34 : f32 to vector<2x128xf32>
      %68 = arith.addf %67, %66 : vector<2x128xf32>
      %69 = arith.divf %67, %68 : vector<2x128xf32>
      %c1_35 = arith.constant 1 : index
      %c2_36 = arith.constant 2 : index
      %c0_37 = arith.constant 0 : index
      %70 = vector.load %arg12[%c1_35, %c2_36, %c0_37] : memref<4x8x128xf32, #tpu.memory_space<vmem>>, vector<1x2x128xf32>
      %71 = vector.shape_cast %70 : vector<1x2x128xf32> to vector<2x128xf32>
      %72 = vector.extract_strided_slice %60 {offsets = [0, 128], sizes = [2, 128], strides = [1, 1]} : vector<2x512xf32> to vector<2x128xf32>
      %73 = arith.addf %71, %72 : vector<2x128xf32>
      %74 = arith.negf %73 : vector<2x128xf32>
      %75 = math.exp %74 : vector<2x128xf32>
      %cst_38 = arith.constant 1.000000e+00 : f32
      %76 = vector.broadcast %cst_38 : f32 to vector<2x128xf32>
      %77 = arith.addf %76, %75 : vector<2x128xf32>
      %78 = arith.divf %76, %77 : vector<2x128xf32>
      %c2_39 = arith.constant 2 : index
      %c2_40 = arith.constant 2 : index
      %c0_41 = arith.constant 0 : index
      %79 = vector.load %arg12[%c2_39, %c2_40, %c0_41] : memref<4x8x128xf32, #tpu.memory_space<vmem>>, vector<1x2x128xf32>
      %80 = vector.shape_cast %79 : vector<1x2x128xf32> to vector<2x128xf32>
      %81 = vector.extract_strided_slice %60 {offsets = [0, 256], sizes = [2, 128], strides = [1, 1]} : vector<2x512xf32> to vector<2x128xf32>
      %82 = arith.addf %80, %81 : vector<2x128xf32>
      %83 = math.tanh %82 : vector<2x128xf32>
      %c3_42 = arith.constant 3 : index
      %c2_43 = arith.constant 2 : index
      %c0_44 = arith.constant 0 : index
      %84 = vector.load %arg12[%c3_42, %c2_43, %c0_44] : memref<4x8x128xf32, #tpu.memory_space<vmem>>, vector<1x2x128xf32>
      %85 = vector.shape_cast %84 : vector<1x2x128xf32> to vector<2x128xf32>
      %86 = vector.extract_strided_slice %60 {offsets = [0, 384], sizes = [2, 128], strides = [1, 1]} : vector<2x512xf32> to vector<2x128xf32>
      %87 = arith.addf %85, %86 : vector<2x128xf32>
      %88 = arith.negf %87 : vector<2x128xf32>
      %89 = math.exp %88 : vector<2x128xf32>
      %cst_45 = arith.constant 1.000000e+00 : f32
      %90 = vector.broadcast %cst_45 : f32 to vector<2x128xf32>
      %91 = arith.addf %90, %89 : vector<2x128xf32>
      %92 = arith.divf %90, %91 : vector<2x128xf32>
      %93 = arith.mulf %78, %56 : vector<2x128xf32>
      %94 = arith.mulf %69, %83 : vector<2x128xf32>
      %95 = arith.addf %93, %94 : vector<2x128xf32>
      %96 = math.tanh %95 : vector<2x128xf32>
      %97 = arith.mulf %92, %96 : vector<2x128xf32>
      %c0_46 = arith.constant 0 : index
      %c0_47 = arith.constant 0 : index
      %98 = vector.load %arg7[%c0_46, %c0_47] : memref<128x512xf32, #tpu.memory_space<vmem>>, vector<128x512xf32>
      %cst_48 = arith.constant dense<0.000000e+00> : vector<2x512xf32>
      %99 = tpu.matmul %97, %98, %cst_48 {dimension_numbers = #tpu.dot_dimension_numbers<[1], [0], [0], [1], [0, 0, 1, 1], [], []>} : vector<2x128xf32>, vector<128x512xf32>, vector<2x512xf32> -> vector<2x512xf32>
      %c0_49 = arith.constant 0 : index
      %c4 = arith.constant 4 : index
      %c0_50 = arith.constant 0 : index
      %100 = vector.load %arg12[%c0_49, %c4, %c0_50] : memref<4x8x128xf32, #tpu.memory_space<vmem>>, vector<1x2x128xf32>
      %101 = vector.shape_cast %100 : vector<1x2x128xf32> to vector<2x128xf32>
      %102 = vector.extract_strided_slice %99 {offsets = [0, 0], sizes = [2, 128], strides = [1, 1]} : vector<2x512xf32> to vector<2x128xf32>
      %103 = arith.addf %101, %102 : vector<2x128xf32>
      %104 = arith.negf %103 : vector<2x128xf32>
      %105 = math.exp %104 : vector<2x128xf32>
      %cst_51 = arith.constant 1.000000e+00 : f32
      %106 = vector.broadcast %cst_51 : f32 to vector<2x128xf32>
      %107 = arith.addf %106, %105 : vector<2x128xf32>
      %108 = arith.divf %106, %107 : vector<2x128xf32>
      %c1_52 = arith.constant 1 : index
      %c4_53 = arith.constant 4 : index
      %c0_54 = arith.constant 0 : index
      %109 = vector.load %arg12[%c1_52, %c4_53, %c0_54] : memref<4x8x128xf32, #tpu.memory_space<vmem>>, vector<1x2x128xf32>
      %110 = vector.shape_cast %109 : vector<1x2x128xf32> to vector<2x128xf32>
      %111 = vector.extract_strided_slice %99 {offsets = [0, 128], sizes = [2, 128], strides = [1, 1]} : vector<2x512xf32> to vector<2x128xf32>
      %112 = arith.addf %110, %111 : vector<2x128xf32>
      %113 = arith.negf %112 : vector<2x128xf32>
      %114 = math.exp %113 : vector<2x128xf32>
      %cst_55 = arith.constant 1.000000e+00 : f32
      %115 = vector.broadcast %cst_55 : f32 to vector<2x128xf32>
      %116 = arith.addf %115, %114 : vector<2x128xf32>
      %117 = arith.divf %115, %116 : vector<2x128xf32>
      %c2_56 = arith.constant 2 : index
      %c4_57 = arith.constant 4 : index
      %c0_58 = arith.constant 0 : index
      %118 = vector.load %arg12[%c2_56, %c4_57, %c0_58] : memref<4x8x128xf32, #tpu.memory_space<vmem>>, vector<1x2x128xf32>
      %119 = vector.shape_cast %118 : vector<1x2x128xf32> to vector<2x128xf32>
      %120 = vector.extract_strided_slice %99 {offsets = [0, 256], sizes = [2, 128], strides = [1, 1]} : vector<2x512xf32> to vector<2x128xf32>
      %121 = arith.addf %119, %120 : vector<2x128xf32>
      %122 = math.tanh %121 : vector<2x128xf32>
      %c3_59 = arith.constant 3 : index
      %c4_60 = arith.constant 4 : index
      %c0_61 = arith.constant 0 : index
      %123 = vector.load %arg12[%c3_59, %c4_60, %c0_61] : memref<4x8x128xf32, #tpu.memory_space<vmem>>, vector<1x2x128xf32>
      %124 = vector.shape_cast %123 : vector<1x2x128xf32> to vector<2x128xf32>
      %125 = vector.extract_strided_slice %99 {offsets = [0, 384], sizes = [2, 128], strides = [1, 1]} : vector<2x512xf32> to vector<2x128xf32>
      %126 = arith.addf %124, %125 : vector<2x128xf32>
      %127 = arith.negf %126 : vector<2x128xf32>
      %128 = math.exp %127 : vector<2x128xf32>
      %cst_62 = arith.constant 1.000000e+00 : f32
      %129 = vector.broadcast %cst_62 : f32 to vector<2x128xf32>
      %130 = arith.addf %129, %128 : vector<2x128xf32>
      %131 = arith.divf %129, %130 : vector<2x128xf32>
      %132 = arith.mulf %117, %95 : vector<2x128xf32>
      %133 = arith.mulf %108, %122 : vector<2x128xf32>
      %134 = arith.addf %132, %133 : vector<2x128xf32>
      %135 = math.tanh %134 : vector<2x128xf32>
      %136 = arith.mulf %131, %135 : vector<2x128xf32>
      %c0_63 = arith.constant 0 : index
      %c0_64 = arith.constant 0 : index
      %137 = vector.load %arg7[%c0_63, %c0_64] : memref<128x512xf32, #tpu.memory_space<vmem>>, vector<128x512xf32>
      %cst_65 = arith.constant dense<0.000000e+00> : vector<2x512xf32>
      %138 = tpu.matmul %136, %137, %cst_65 {dimension_numbers = #tpu.dot_dimension_numbers<[1], [0], [0], [1], [0, 0, 1, 1], [], []>} : vector<2x128xf32>, vector<128x512xf32>, vector<2x512xf32> -> vector<2x512xf32>
      %c0_66 = arith.constant 0 : index
      %c6 = arith.constant 6 : index
      %c0_67 = arith.constant 0 : index
      %139 = vector.load %arg12[%c0_66, %c6, %c0_67] : memref<4x8x128xf32, #tpu.memory_space<vmem>>, vector<1x2x128xf32>
      %140 = vector.shape_cast %139 : vector<1x2x128xf32> to vector<2x128xf32>
      %141 = vector.extract_strided_slice %138 {offsets = [0, 0], sizes = [2, 128], strides = [1, 1]} : vector<2x512xf32> to vector<2x128xf32>
      %142 = arith.addf %140, %141 : vector<2x128xf32>
      %143 = arith.negf %142 : vector<2x128xf32>
      %144 = math.exp %143 : vector<2x128xf32>
      %cst_68 = arith.constant 1.000000e+00 : f32
      %145 = vector.broadcast %cst_68 : f32 to vector<2x128xf32>
      %146 = arith.addf %145, %144 : vector<2x128xf32>
      %147 = arith.divf %145, %146 : vector<2x128xf32>
      %c1_69 = arith.constant 1 : index
      %c6_70 = arith.constant 6 : index
      %c0_71 = arith.constant 0 : index
      %148 = vector.load %arg12[%c1_69, %c6_70, %c0_71] : memref<4x8x128xf32, #tpu.memory_space<vmem>>, vector<1x2x128xf32>
      %149 = vector.shape_cast %148 : vector<1x2x128xf32> to vector<2x128xf32>
      %150 = vector.extract_strided_slice %138 {offsets = [0, 128], sizes = [2, 128], strides = [1, 1]} : vector<2x512xf32> to vector<2x128xf32>
      %151 = arith.addf %149, %150 : vector<2x128xf32>
      %152 = arith.negf %151 : vector<2x128xf32>
      %153 = math.exp %152 : vector<2x128xf32>
      %cst_72 = arith.constant 1.000000e+00 : f32
      %154 = vector.broadcast %cst_72 : f32 to vector<2x128xf32>
      %155 = arith.addf %154, %153 : vector<2x128xf32>
      %156 = arith.divf %154, %155 : vector<2x128xf32>
      %c2_73 = arith.constant 2 : index
      %c6_74 = arith.constant 6 : index
      %c0_75 = arith.constant 0 : index
      %157 = vector.load %arg12[%c2_73, %c6_74, %c0_75] : memref<4x8x128xf32, #tpu.memory_space<vmem>>, vector<1x2x128xf32>
      %158 = vector.shape_cast %157 : vector<1x2x128xf32> to vector<2x128xf32>
      %159 = vector.extract_strided_slice %138 {offsets = [0, 256], sizes = [2, 128], strides = [1, 1]} : vector<2x512xf32> to vector<2x128xf32>
      %160 = arith.addf %158, %159 : vector<2x128xf32>
      %161 = math.tanh %160 : vector<2x128xf32>
      %c3_76 = arith.constant 3 : index
      %c6_77 = arith.constant 6 : index
      %c0_78 = arith.constant 0 : index
      %162 = vector.load %arg12[%c3_76, %c6_77, %c0_78] : memref<4x8x128xf32, #tpu.memory_space<vmem>>, vector<1x2x128xf32>
      %163 = vector.shape_cast %162 : vector<1x2x128xf32> to vector<2x128xf32>
      %164 = vector.extract_strided_slice %138 {offsets = [0, 384], sizes = [2, 128], strides = [1, 1]} : vector<2x512xf32> to vector<2x128xf32>
      %165 = arith.addf %163, %164 : vector<2x128xf32>
      %166 = arith.negf %165 : vector<2x128xf32>
      %167 = math.exp %166 : vector<2x128xf32>
      %cst_79 = arith.constant 1.000000e+00 : f32
      %168 = vector.broadcast %cst_79 : f32 to vector<2x128xf32>
      %169 = arith.addf %168, %167 : vector<2x128xf32>
      %170 = arith.divf %168, %169 : vector<2x128xf32>
      %171 = arith.mulf %156, %134 : vector<2x128xf32>
      %172 = arith.mulf %147, %161 : vector<2x128xf32>
      %173 = arith.addf %171, %172 : vector<2x128xf32>
      %174 = math.tanh %173 : vector<2x128xf32>
      %175 = arith.mulf %170, %174 : vector<2x128xf32>
      %c0_80 = arith.constant 0 : index
      %c0_81 = arith.constant 0 : index
      %176 = vector.load %arg8[%c0_80, %c0_81] : memref<1x128xf32, #tpu.memory_space<vmem>>, vector<1x128xf32>
      %177 = vector.broadcast %176 : vector<1x128xf32> to vector<2x128xf32>
      %178 = arith.mulf %175, %177 : vector<2x128xf32>
      %cst_82 = arith.constant dense<0.000000e+00> : vector<2xf32>
      %179 = vector.multi_reduction <add>, %178, %cst_82 [1] : vector<2x128xf32> to vector<2xf32>
      %180 = vector.shape_cast %179 : vector<2xf32> to vector<2x1xf32>
      %c0_83 = arith.constant 0 : index
      %c0_84 = arith.constant 0 : index
      %181 = vector.load %arg9[%c0_83, %c0_84] : memref<1x1xf32, #tpu.memory_space<vmem>>, vector<1x1xf32>
      %182 = vector.broadcast %181 : vector<1x1xf32> to vector<2x1xf32>
      %183 = arith.addf %180, %182 : vector<2x1xf32>
      %c0_85 = arith.constant 0 : index
      %c0_86 = arith.constant 0 : index
      %184 = vector.load %arg10[%c0_85, %c0_86] : memref<2x1xf32, #tpu.memory_space<vmem>>, vector<2x1xf32>
      tpu.vector_store %arg10[%c0_85, %c0_86], %183 {strides = array<i32>} : memref<2x1xf32, #tpu.memory_space<vmem>>, vector<2x1xf32>,
    } else {
    }
    return
  }
  func.func @transform_0(%arg0: i32) -> (i32, i32, i32) {
    %c0_i32 = arith.constant 0 : i32
    %c0_i32_0 = arith.constant 0 : i32
    %c0_i32_1 = arith.constant 0 : i32
    %c0_i32_2 = arith.constant 0 : i32
    return %c0_i32, %c0_i32_0, %c0_i32_1 : i32, i32, i32
  }
  func.func @transform_1(%arg0: i32) -> (i32, i32, i32) {
    %c0_i32 = arith.constant 0 : i32
    %c0_i32_0 = arith.constant 0 : i32
    %c0_i32_1 = arith.constant 0 : i32
    %c0_i32_2 = arith.constant 0 : i32
    return %c0_i32, %c0_i32_0, %c0_i32_1 : i32, i32, i32
  }
  func.func @transform_2(%arg0: i32) -> i32 {
    %c0_i32 = arith.constant 0 : i32
    %c0_i32_0 = arith.constant 0 : i32
    return %c0_i32 : i32
  }
  func.func @transform_3(%arg0: i32) -> i32 {
    %c0_i32 = arith.constant 0 : i32
    %c0_i32_0 = arith.constant 0 : i32
    return %c0_i32 : i32
  }
  func.func @transform_4(%arg0: i32) -> (i32, i32, i32) {
    %c0_i32 = arith.constant 0 : i32
    %c0_i32_0 = arith.constant 0 : i32
    %c0_i32_1 = arith.constant 0 : i32
    return %arg0, %c0_i32, %c0_i32_0 : i32, i32, i32
  }
  func.func @transform_5(%arg0: i32) -> (i32, i32, i32) {
    %c0_i32 = arith.constant 0 : i32
    %c0_i32_0 = arith.constant 0 : i32
    %c0_i32_1 = arith.constant 0 : i32
    return %arg0, %c0_i32, %c0_i32_0 : i32, i32, i32
  }
  func.func @transform_6(%arg0: i32) -> (i32, i32) {
    %c0_i32 = arith.constant 0 : i32
    %c0_i32_0 = arith.constant 0 : i32
    %c0_i32_1 = arith.constant 0 : i32
    return %c0_i32, %c0_i32_0 : i32, i32
  }
  func.func @transform_7(%arg0: i32) -> (i32, i32) {
    %c0_i32 = arith.constant 0 : i32
    %c0_i32_0 = arith.constant 0 : i32
    %c0_i32_1 = arith.constant 0 : i32
    return %c0_i32, %c0_i32_0 : i32, i32
  }
  func.func @transform_8(%arg0: i32) -> (i32, i32) {
    %c0_i32 = arith.constant 0 : i32
    %c0_i32_0 = arith.constant 0 : i32
    %c0_i32_1 = arith.constant 0 : i32
    return %c0_i32, %c0_i32_0 : i32, i32
  }
  func.func @transform_9(%arg0: i32) -> (i32, i32) {
    %c0_i32 = arith.constant 0 : i32
    %c0_i32_0 = arith.constant 0 : i32
    %c0_i32_1 = arith.constant 0 : i32
    return %c0_i32, %c0_i32_0 : i32, i32
  }
}

</mosaic_0001>

<bundles_post_ra>
// kernel: cnn_lstm_forward.1
= control target key start
LH: loop header
LB: loop body
LE: loop exit
PB: predicated region body
PF: predicated region fallthrough
CT: control target
= control target key end

     0   :  { %s5778_s0 = inlined_call_operand.vmem [shape: f32[3,8,128], index: 0, kind: input, shape index: {}]   ;;  %s5779_s1 = inlined_call_operand.vmem [shape: f32[9,1,64], index: 1, kind: input, shape index: {}]   ;;  %s5780_s2 = inlined_call_operand.vmem [shape: f32[216], index: 2, kind: input, shape index: {}]   ;;  %s5781_s3 = inlined_call_operand.vmem [shape: f32[8], index: 3, kind: input, shape index: {}]   ;;  %s5782_s4 = inlined_call_operand.hbm [shape: f32[4,512,128], index: 4, kind: input, shape index: {}]   ;;  %s5783_s5 = inlined_call_operand.vmem [shape: f32[4,1,128], index: 5, kind: input, shape index: {}]   ;;  %s5784_s6 = inlined_call_operand.vmem [shape: f32[128,512], index: 6, kind: input, shape index: {}]   ;;  %s5785_s7 = inlined_call_operand.vmem [shape: f32[1,128], index: 7, kind: input, shape index: {}]   ;;  %s5786_s8 = inlined_call_operand.<no memory space> [shape: f32[1,1], index: 8, kind: input, shape index: {}]   ;;  %s5787_s9 = inlined_call_operand.vmem [shape: f32[2,1], index: 9, kind: output, shape index: {}]  }
   0x1   :  { %5849 = sst [smem:[#allocation34_spill]] %s5778_s0  ;;  %v14_v0 = vstv %s5786_s8 }
   0x2   :  { %5850 = sst [smem:[#allocation35_spill]] %s5779_s1  ;;  %15 = vst [vmem:[#allocation4] sm:$0x1] %v14_v0 }
   0x3   :  { %5851 = sst [smem:[#allocation36_spill]] %s5780_s2 }
   0x4   :  { %5852 = sst [smem:[#allocation37_spill]] %s5781_s3 }
   0x5   :  { %16 = vsyncpa [#allocation7], 0 }
   0x6   :  { %17 = vsyncpa [#allocation9], 0 }
   0x7   :  { %18 = vsyncpa [#allocation6], 0 }
   0x8   :  { %20 = vsyncpa [#allocation6 + $0x1], 0  ;;  %s3931_s11 = smov 0   ;;  %s3933_s12 = smov 0  }
   0x9   :  { %s3935_s13 = smov 0   ;;  %s3937_s14 = smov 0  }
   0xa LB: > { %s3950_s8 = sadd.s32 4294967295, %s3853_s14   ;;  %s3953_s15 = sadd.s32 1, %s3853_s14   ;;  %s3853_s14 = sphi %s3937_s14, %s5943_s14   ;;  %s3849_s13 = sphi %s3935_s13, %s5942_s13   ;;  %s3845_s12 = sphi %s3933_s12, %s5941_s12   ;;  %s3841_s11 = sphi %s3931_s11, %s5940_s11  }
   0xb   : > { %s114_s16 = ssub.s32 %s3853_s14, %s3953_s15  ;;  %s117_s17 = sadd.s32 1, %s3849_s13 }
   0xc   : > { %p115_p0 = scmp.eq.s32.totalorder %s114_s16, 0  ;;  %p124_p1 = scmp.ne.s32.totalorder %s3849_s13, %s3845_s12 }
   0xd   : > { %p125_p2 = scmp.eq.s32.totalorder %s3853_s14, 0  ;;  %p130_p3 = scmp.ne.s32.totalorder %s3845_s12, %s3841_s11 }
   0xe   : > { %s3963_s18 = scalar_select %p115_p0, %s3849_s13, %s117_s17  }
   0xf   : > { %p3965_p4 = por %p125_p2, %p124_p1  ;;  %p5788_p5 = scmp.eq.s32.totalorder %s3950_s8, 0 }
  0x10   : > { %p3266_p6 = scmp.ge.s32.totalorder %s3853_s14, 1  ;;  %p251_p7 = scmp.lt.s32.totalorder %s3853_s14, 5 }
  0x11   : > { %p3974_p8 = por %p5788_p5, %p130_p3  ;;  %s5856_s2 = sld [smem:[#allocation36_spill]] }
  0x12   : > { %p3979_p10 = pnand %p3266_p6, %p251_p7  ;;  %p3632_p12 = scmp.lt.s32.totalorder %s3853_s14, 4 }
  0x13   : > { %s5854_s20 = scalar_select %p3974_p8, 1, 0 }
  0x14   : > { %s5855_s21 = scalar_select %p3979_p10, 1, 0 }
  0x15   : > { %p3619_p11 = pneg %p3979_p10  ;;  %s5857_s3 = sld [smem:[#allocation37_spill]] }
  0x16   : > { %p4000_p0 = pnand %p3632_p12, %p3965_p4  ;;  %s301_s30 = sand.u32 1, %s3849_s13  }
  0x17   : > { %s270_s24 = sshll.u32 %s5856_s2, 4  ;;  %p3994_p13 = pnand %p3619_p11, %p5788_p5  ;;  %s271_s24 = int_to_ptr.vmem [resolvable:$true] %s270_s24 }
  0x18   : > { %s5859_s29 = scalar_select %p4000_p0, 1, 0 }
  0x19   : > { %s3753_s10 = scalar_lea.vmem %s271_s24, 32  ;;  %p3755_p2 = pneg %p3994_p13 }
  0x1a   : > { %p3754_p1 = scmp.ne.s32.totalorder %s271_s24, %s3753_s10  ;;  %p3761_p7 = scmp.lt.s32.totalorder %s271_s24, %s271_s24 }
  0x1b   : > { %s281_s27 = sshll.u32 %s5857_s3, 4  ;;  %p3762_p9 = scmp.lt.s32.totalorder %s3753_s10, %s3753_s10  ;;  %s282_s27 = int_to_ptr.vmem [resolvable:$true] %s281_s27 }
  0x1c   : > { %p3756_p3 = pnand %p3755_p2, %p3754_p1 }
  0x1d   : > { %p3763_p11 = por %p3762_p9, %p3761_p7 }
  0x1e   : > { %p3757_p6 = pneg %p3756_p3 }
  0x20   : > { %p3764_p5 = pnand %p3763_p11, %p3757_p6 }
  0x22   : > { %3767 = shalt.err (!%p3764_p5)
}
  0x23   : > { %s3855_s11 = smov [#allocation5]   ;;  %s3768_s16 = scalar_lea.vmem %s282_s27, 16 }
  0x24   : > { %3622 = dma.vmem_to_smem (!%p3994_p13), %s271_s24, 32, %s3855_s11, [#allocation7]  }
  0x25   : > { %p3769_p4 = scmp.ne.s32.totalorder %s282_s27, %s3768_s16  ;;  %p3776_p10 = scmp.lt.s32.totalorder %s282_s27, %s282_s27 }
  0x26   : > { %p3777_p0 = scmp.lt.s32.totalorder %s3768_s16, %s3768_s16 }
  0x27   : > { %p3771_p12 = pnand %p3769_p4, %p3755_p2 }
  0x28   : > { %p3778_p1 = por %p3777_p0, %p3776_p10 }
  0x29   : > { %p3772_p8 = pneg %p3771_p12 }
  0x2b   : > { %p3779_p3 = pnand %p3778_p1, %p3772_p8 }
  0x2d   : > { %3782 = shalt.err (!%p3779_p3)
}
  0x2e   : > { %s3856_s17 = smov [#allocation8]   ;;  %s3270_s19 = sshll.u32 %s301_s30, 9 }
  0x2f   : > { %3625 = dma.vmem_to_smem (!%p3994_p13), %s282_s27, 16, %s3856_s17, [#allocation9]  }
  0x30   : > { %s3538_s22 = sshll.u32 %s3853_s14, 13  ;;  %s305_s26 = scalar_lea.vmem [#allocation10], %s3270_s19 }
  0x31   : > { %s4017_s25 = scalar_lea.hbm %s5782_s4, %s3538_s22  ;;  %s312_s10 = sshll.u32 %s305_s26, 4  ;;  %s4019_s10 = int_to_ptr.vmem [resolvable:$true] %s312_s10 }
  0x32   : > { %s4023_s28 = scalar_lea.sflag [#allocation6], %s301_s30  ;;  %s3783_s11 = scalar_lea.hbm %s4017_s25, 8192 }
  0x33   : > { %p3784_p5 = scmp.ne.s32.totalorder %s4017_s25, %s3783_s11  ;;  %p5860_p8 = scmp.ne.s32.totalorder %s5859_s29, 0 }
  0x34   : > { %s3788_s16 = scalar_lea.hbm %s5782_s4, 32768  ;;  %p3789_p0 = scmp.lt.s32.totalorder %s4017_s25, %s5782_s4 }
  0x35   : > { %p3785_p9 = pneg %p5860_p8  ;;  %p3790_p2 = scmp.lt.s32.totalorder %s3788_s16, %s3783_s11 }
  0x37   : > { %p3786_p10 = pnand %p3785_p9, %p3784_p5  ;;  %p3791_p6 = por %p3790_p2, %p3789_p0 }
  0x39   : > { %p3787_p13 = pneg %p3786_p10 }
  0x3b   : > { %p3792_p7 = pnand %p3791_p6, %p3787_p13 }
  0x3d   : > { %3795 = shalt.err (!%p3792_p7)
}
  0x3e   : > { %s3796_s30 = scalar_lea.vmem %s4019_s10, 8192  ;;  %s3857_s19 = smov [#allocation10]  }
  0x3f   : > { %p3797_p11 = scmp.ne.s32.totalorder %s4019_s10, %s3796_s30  ;;  %s3801_s23 = sshll.u32 %s3857_s19, 4  ;;  %s3802_s23 = int_to_ptr.vmem [resolvable:$false] %s3801_s23 }
  0x40   : > { %s3803_s24 = scalar_lea.vmem %s3802_s23, 16384  ;;  %p3804_p1 = scmp.lt.s32.totalorder %s4019_s10, %s3802_s23 }
  0x41   : > { %p3799_p4 = pnand %p3797_p11, %p3785_p9  ;;  %p3805_p3 = scmp.lt.s32.totalorder %s3803_s24, %s3796_s30 }
  0x43   : > { %p3800_p12 = pneg %p3799_p4  ;;  %p3806_p5 = por %p3805_p3, %p3804_p1 }
  0x45   : > { %p3807_p10 = pnand %p3806_p5, %p3800_p12 }
  0x47   : > { %3810 = shalt.err (!%p3807_p10)
}
  0x48   : > { %s3858_s26 = smov 128   ;;  %s3859_s11 = smov 8  }
  0x49   : > { %3629 = dma.hbm_to_vmem [thread:$0]  (!%p5860_p8), %s4017_s25, 8192, %s4019_s10, %s4023_s28, %s3858_s26, %s3858_s26, %s3859_s11  }
  0x4a   : > { %p5861_p9 = scmp.ne.s32.totalorder %s5855_s21, 0 }
  0x4b   : > { %p5862_p13 = scmp.eq.s32.totalorder (!%p5861_p9), %s3950_s8, 0 }
  0x4c   : > { %330 = sbr.rel (%p5861_p9) target bundleno = 2226 (0x8b2), region = 56 }
  0x51   : > { %3828 = dma.done.wait (%p5862_p13), [#allocation7], 32   ;;  %p5863_p0 = pmov %p5862_p13 }
  0x53   : > { %3830 = vsyncadd (%p5863_p0), [#allocation7], 4294967264  ;;  %p5864_p2 = pmov %p5863_p0 }
  0x54   : > { %p5865_p6 = pmov %p5863_p0 }
  0x55   : > { %3832 = dma.done.wait (%p5864_p2), [#allocation9], 16  }
  0x56   : > { %3834 = vsyncadd (%p5865_p6), [#allocation9], 4294967280  ;;  %s340_s14 = sand.u32 1, %s3845_s12   ;;  %p5866_p8 = scmp.ne.s32.totalorder %s5854_s20, 0 }
  0x57   : > { %s3276_s29 = sshll.u32 %s340_s14, 9  ;;  %s341_s25 = scalar_lea.sflag [#allocation6], %s340_s14 }
  0x58   : > { %s4055_s10 = scalar_lea.vmem [#allocation10], %s3276_s29 }
  0x59   : > { %3836 = dma.done.wait (%p5866_p8), %s341_s25, 8192  }
  0x5a   : > { %3838 = vsyncadd (%p5866_p8), %s341_s25, 4294959104 }
  0x5b   : > { %349 = sfence }
  0x5c   : > { %p378_p7 = scmp.lt.s32.totalorder %s3950_s8, 3  ;;  %p5867_p11 = scmp.ne.s32.totalorder %s3950_s8, 0 }
  0x5d   : > { %s5868_s1 = sld [smem:[#allocation35_spill]] (!%p5867_p11)  ;;  %s3860_s20 = smov (!%p5867_p11), 1  }
  0x5e   : > { %s4063_s21 = scalar_select %p378_p7, %s3950_s8, 3 }
  0x5f   : > { %384 = sbr.rel (%p5867_p11) target bundleno = 816 (0x330), region = 72  ;;  %s3861_s26 = smov (!%p5867_p11), 8  }
  0x60   : > { %s3862_s29 = smov (!%p5867_p11), 2   ;;  %s3863_s25 = smov (!%p5867_p11), 9  }
  0x61   : > { %s3865_s30 = smov (!%p5867_p11), 16   ;;  %s3866_s11 = smov (!%p5867_p11), 17  }
  0x62   : > { %s3867_s14 = smov (!%p5867_p11), 18   ;;  %s3302_s28 = sld [smem:[#allocation5 + $0x2]] (!%p5867_p11) }
  0x63   : > { %s3301_s27 = sld [smem:[#allocation5 + $0x13]] (!%p5867_p11) }
  0x64   : > { %v3282_v1 = vld [vmem:[%s5868_s1 + $0x1] ss:$0 sm:$0xff]  ;;  %v3286_v2 = vld [vmem:[%s5868_s1 + $0x3] ss:$0 sm:$0xff]  ;;  %v3284_v3 = vld [vmem:[%s5868_s1 + $0x2] ss:$0 sm:$0xff] }
  0x65   : > { %407 = vrot.lane.b32.xlu0 %v3282_v1, %s3860_s20  ;;  %433 = vrot.lane.b32.xlu1 %v3286_v2, %s3861_s26  ;;  %v3288_v4 = vld [vmem:[%s5868_s1 + $0x4] ss:$0 sm:$0xff]  ;;  %v3290_v5 = vld [vmem:[%s5868_s1 + $0x5] ss:$0 sm:$0xff]  ;;  %s3864_s20 = smov 10   ;;  %s5869_s0 = sld [smem:[#allocation34_spill]] }
  0x66   : > { %v3292_v6 = vld [vmem:[%s5868_s1 + $0x6] ss:$0 sm:$0xff]  ;;  %v3294_v7 = vld [vmem:[%s5868_s1 + $0x7] ss:$0 sm:$0xff]  ;;  %v3296_v8 = vld [vmem:[%s5868_s1 + $0x8] ss:$0 sm:$0xff] }
  0x67   : > { %s4105_s19 = sld [smem:[#allocation5 + $0x14]]  ;;  %vm711_vm0 = vcmask 523264   ;;  %vm924_vm1 = vcmask 1048064  }
  0x68   : > { %s4112_s26 = sld [smem:[#allocation5 + $0xb]]  ;;  %v544_v21 = vstv %s3302_s28 }
  0x69   : > { %420 = vrot.lane.b32.xlu0 %v3284_v3, %s3862_s29  ;;  %446 = vrot.lane.b32.xlu1 %v3288_v4, %s3863_s25  ;;  %s3300_s29 = sld [smem:[#allocation5 + $0xa]]  ;;  %v536_v22 = vstv %s3301_s27  ;;  %s5802_s27 = smov 126  }
  0x6a   : > { %s3299_s25 = sld [smem:[#allocation5 + $0x1]] }
  0x6b   : > { %v4098_v9 = vld [vmem:[%s5869_s0] sm:$0xff]  ;;  %v4103_v10 = vld [vmem:[%s5869_s0 + $0x8] sm:$0xff]  ;;  %v4110_v12 = vld [vmem:[%s5869_s0 + $0x10] sm:$0xff]  ;;  %s4146_s28 = sld [smem:[#allocation5 + $0x15]]  ;;  %s5875_s0 = smov 126  }
  0x6c   : > { %s4160_s17 = sld [smem:[#allocation5 + $0x16]] }
  0x6d   : > { %459 = vrot.lane.b32.xlu0 %v3290_v5, %s3864_s20  ;;  %472 = vrot.lane.b32.xlu1 %v3292_v6, %s3865_s30  ;;  %v560_v29 = vstv %s4105_s19  ;;  %s4162_s22 = sld [smem:[#allocation5 + $0xd]]  ;;  %s5798_s19 = smov 120  }
  0x6e   : > { %v552_v30 = vstv %s4112_s26  ;;  %s4171_s20 = sld [smem:[#allocation5 + $0xe]]  ;;  %s5794_s26 = smov 119  }
  0x6f   : > { %v528_v13 = vstv %s3300_s29  ;;  %s3868_s29 = smov 127   ;;  %s4174_s30 = sld [smem:[#allocation5 + $0x5]] }
  0x70   : > { %v520_v14 = vstv %s3299_s25  ;;  %s4134_s25 = sld [smem:[#allocation5 + $0x4]] }
  0x71   : > { %485 = vrot.lane.b32.xlu0 %v3294_v7, %s3866_s11  ;;  %498 = vrot.lane.b32.xlu1 %v3296_v8, %s3867_s14  ;;  %s4120_s11 = sld [smem:[#allocation5 + $0xc]]  ;;  %v584_v43 = vstv %s4146_s28 }
  0x72   : > { %s4122_s14 = sld [smem:[#allocation5 + $0x3]]  ;;  %v608_v49 = vstv %s4160_s17  ;;  %s5796_s17 = smov 118  }
  0x73   : > { %s4183_s23 = sld [smem:[#allocation5 + $0x6]]  ;;  %v600_v50 = vstv %s4162_s22 }
  0x74   : > { %s4194_s24 = sld [smem:[#allocation5 + $0x17]]  ;;  %v624_v54 = vstv %s4171_s20 }
  0x75   : > { %v616_v55 = vstv %s4174_s30  ;;  %s4222_s28 = sld [smem:[#allocation5 + $0x7]]  ;;  %s5792_s30 = smov 112  }
  0x76   : > { %v592_v41 = vstv %s4134_s25  ;;  %s4219_s25 = sld [smem:[#allocation5 + $0x10]] }
  0x77   : > { %v576_v34 = vstv %s4120_s11  ;;  %s4208_s11 = sld [smem:[#allocation5 + $0x18]] }
  0x78   : > { %v568_v35 = vstv %s4122_s14  ;;  %s4210_s14 = sld [smem:[#allocation5 + $0xf]] }
  0x79   : > { %v640_v61 = vstv %s4183_s23  ;;  %s4231_s22 = sld [smem:[#allocation5 + $0x8]] }
  0x7a   : > { %v632_v63 = vstv %s4194_s24  ;;  %s3319_s20 = sld [smem:[#allocation5 + $0x19]] }
  0x7b   : > { %s3322_s23 = sld [smem:[#allocation5 + $0x1a]] }
  0x7c   : > { %s3321_s24 = sld [smem:[#allocation5 + $0x11]] }
  0x7d   : > { %v656_v5 = vstv %s4208_s11  ;;  %s3328_s11 = sld [smem:[#allocation5 + $0x25]] }
  0x7e   : > { %v648_v6 = vstv %s4210_s14  ;;  %s3327_s14 = sld [smem:[#allocation5 + $0x1c]] }
  0x7f   : > { %s3332_s16 = sld [smem:[#allocation5 + $0x2f]] }
  0x80   : > { %s4490_s2 = sld [smem:[#allocation5 + $0x67]] }
  0x81   : > { %s4984_s3 = sld [smem:[#allocation5 + $0x99]] }
  0xd7   : > { %v408_v11 = vpop.permute.xlu0 %407  ;;  %v434_v23 = vpop.permute.xlu1 %433 }
  0xd8   : > { %v4115_v15 = vmul.f32 %v408_v11, %v4098_v9  ;;  %v4118_v16 = vmul.f32 %v4103_v10, %v408_v11  ;;  %v4125_v17 = vmul.f32 %v4110_v12, %v408_v11  ;;  %v4151_v31 = vmul.f32 %v434_v23, %v4098_v9 }
  0xd9   : > { %v4154_v32 = vmul.f32 %v4103_v10, %v434_v23  ;;  %v4177_v42 = vmul.f32 %v4110_v12, %v434_v23  ;;  %v688_v23 = vstv %s4231_s22  ;;  %s3329_s22 = sld [smem:[#allocation5 + $0x2e]] }
  0xda   : > { %v529_v18 = vmul.f32 %v528_v13, %v4118_v16  ;;  %v521_v19 = vmul.f32 %v520_v14, %v4115_v15  ;;  %v537_v28 = vmul.f32 %v536_v22, %v4125_v17  ;;  %v569_v40 = vmul.f32 %v568_v35, %v4151_v31 }
  0xdb   : > { %v421_v20 = vpop.permute.xlu0 %420  ;;  %v447_v33 = vpop.permute.xlu1 %446  ;;  %v577_v39 = vmul.f32 %v576_v34, %v4154_v32  ;;  %v585_v48 = vmul.f32 %v584_v43, %v4177_v42  ;;  %v672_v13 = vstv %s4219_s25  ;;  %v664_v14 = vstv %s4222_s28  ;;  %s5800_s25 = smov 111   ;;  %s3330_s28 = sld [smem:[#allocation5 + $0x1d]] }
  0xdc   : > { %v4130_v24 = vmul.f32 %v421_v20, %v4098_v9  ;;  %531 = vrot.lane.b32.xlu1 %v529_v18, %s3868_s29  ;;  %523 = vrot.lane.b32.xlu0 %v521_v19, %s3868_s29  ;;  %v4137_v25 = vmul.f32 %v4103_v10, %v421_v20  ;;  %v4140_v26 = vmul.f32 %v4110_v12, %v421_v20  ;;  %v704_v35 = vstv %s3322_s23  ;;  %s3334_s23 = sld [smem:[#allocation5 + $0x27]] }
  0xdd   : > { %v4167_v38 = vmul.f32 %v447_v33, %v4098_v9  ;;  %v4186_v46 = vmul.f32 %v4103_v10, %v447_v33  ;;  %v4189_v47 = vmul.f32 %v4110_v12, %v447_v33 }
  0xde   : > { %v545_v27 = vmul.f32 %v544_v21, %v4130_v24  ;;  %v561_v36 = vmul.f32 %v560_v29, %v4140_v26  ;;  %v553_v37 = vmul.f32 %v552_v30, %v4137_v25 }
  0xdf   : > { %v593_v44 = vmul.f32 %v592_v41, %v4167_v38  ;;  %v460_v45 = vpop.permute.xlu0 %459  ;;  %v473_v53 = vpop.permute.xlu1 %472  ;;  %v609_v56 = vmul.f32 %v608_v49, %v4189_v47  ;;  %v601_v57 = vmul.f32 %v600_v50, %v4186_v46  ;;  %v729_v41 = vstv %s3327_s14  ;;  %s3335_s14 = sld [smem:[#allocation5 + $0x30]] }
  0xe0   : > { %547 = vrot.lane.b32.xlu1 %v545_v27, %s5802_s27  ;;  %539 = vrot.lane.b32.xlu0 %v537_v28, %s3868_s29  ;;  %v4199_v51 = vmul.f32 %v460_v45, %v4098_v9  ;;  %v4202_v52 = vmul.f32 %v4103_v10, %v460_v45  ;;  %v4215_v58 = vmul.f32 %v473_v53, %v4098_v9  ;;  %v680_v28 = vstv %s3319_s20  ;;  %s5804_s20 = smov 110  }
  0xe1   : > { %v4225_v62 = vmul.f32 %v4110_v12, %v460_v45  ;;  %v4234_v2 = vmul.f32 %v4103_v10, %v473_v53  ;;  %v4237_v3 = vmul.f32 %v4110_v12, %v473_v53  ;;  %v753_v45 = vstv %s3330_s28  ;;  %s3338_s28 = sld [smem:[#allocation5 + $0x31]] }
  0xe2   : > { %v625_v59 = vmul.f32 %v624_v54, %v4202_v52  ;;  %v617_v60 = vmul.f32 %v616_v55, %v4199_v51  ;;  %v641_v0 = vmul.f32 %v640_v61, %v4215_v58  ;;  %v754_v49 = vmul.f32 %v753_v45, %v4130_v24 }
  0xe3   : > { %v486_v1 = vpop.permute.xlu0 %485  ;;  %v633_v4 = vmul.f32 %v632_v63, %v4225_v62  ;;  %v499_v11 = vpop.permute.xlu1 %498  ;;  %v657_v18 = vmul.f32 %v656_v5, %v4237_v3  ;;  %v649_v19 = vmul.f32 %v648_v6, %v4234_v2  ;;  %v769_v53 = vstv %s3332_s16  ;;  %s3340_s16 = sld [smem:[#allocation5 + $0x29]] }
  0xe4   : > { %563 = vrot.lane.b32.xlu1 %v561_v36, %s5802_s27  ;;  %555 = vrot.lane.b32.xlu0 %v553_v37, %s5802_s27  ;;  %v4245_v7 = vmul.f32 %v486_v1, %v4098_v9  ;;  %v4248_v8 = vmul.f32 %v4103_v10, %v486_v1  ;;  %v4257_v20 = vmul.f32 %v499_v11, %v4098_v9  ;;  %v696_v36 = vstv %s3321_s24  ;;  %s3333_s24 = sld [smem:[#allocation5 + $0x1e]] }
  0xe5   : > { %v4263_v27 = vmul.f32 %v4110_v12, %v486_v1  ;;  %v4269_v30 = vmul.f32 %v4103_v10, %v499_v11  ;;  %v4272_v33 = vmul.f32 %v4110_v12, %v499_v11  ;;  %v770_v55 = vmul.f32 %v769_v53, %v4140_v26 }
  0xe6   : > { %v673_v21 = vmul.f32 %v672_v13, %v4248_v8  ;;  %v665_v22 = vmul.f32 %v664_v14, %v4245_v7  ;;  %v689_v29 = vmul.f32 %v688_v23, %v4257_v20 }
  0xe7   : > { %v681_v34 = vmul.f32 %v680_v28, %v4263_v27  ;;  %v705_v37 = vmul.f32 %v704_v35, %v4272_v33  ;;  %v817_v5 = vstv %s3338_s28  ;;  %s3346_s28 = sld [smem:[#allocation5 + $0x2b]] }
  0xe8   : > { %579 = vrot.lane.b32.xlu1 %v577_v39, %s5798_s19  ;;  %571 = vrot.lane.b32.xlu0 %v569_v40, %s5798_s19  ;;  %v697_v39 = vmul.f32 %v696_v36, %v4269_v30  ;;  %v737_v40 = vstv %s3328_s11  ;;  %s3336_s11 = sld [smem:[#allocation5 + $0x1f]]  ;;  %v818_v11 = vmul.f32 %v817_v5, %v4189_v47 }
  0xe9   : > { %v738_v43 = vmul.f32 %v737_v40, %v4118_v16  ;;  %v833_v14 = vstv %s3340_s16  ;;  %s3348_s16 = sld [smem:[#allocation5 + $0x23]] }
  0xec   : > { %595 = vrot.lane.b32.xlu1 %v593_v44, %s5794_s26  ;;  %587 = vrot.lane.b32.xlu0 %v585_v48, %s5798_s19  ;;  %v730_v44 = vmul.f32 %v729_v41, %v4115_v15  ;;  %v745_v48 = vstv %s3329_s22  ;;  %s3337_s22 = sld [smem:[#allocation5 + $0x28]] }
  0xed   : > { %v746_v50 = vmul.f32 %v745_v48, %v4125_v17 }
  0xee   : > { %v801_v63 = vstv %s3336_s11  ;;  %s3344_s11 = sld [smem:[#allocation5 + $0x33]] }
  0xef   : > { %v802_v1 = vmul.f32 %v801_v63, %v4167_v38 }
  0xf0   : > { %611 = vrot.lane.b32.xlu1 %v609_v56, %s5794_s26  ;;  %603 = vrot.lane.b32.xlu0 %v601_v57, %s5794_s26  ;;  %v785_v57 = vstv %s3334_s23  ;;  %s3342_s23 = sld [smem:[#allocation5 + $0x21]] }
  0xf2   : > { %v809_v6 = vstv %s3337_s22  ;;  %s3345_s22 = sld [smem:[#allocation5 + $0x22]] }
  0xf3   : > { %v810_v13 = vmul.f32 %v809_v6, %v4186_v46 }
  0xf4   : > { %627 = vrot.lane.b32.xlu1 %v625_v59, %s5796_s17  ;;  %619 = vrot.lane.b32.xlu0 %v617_v60, %s5796_s17  ;;  %v777_v59 = vstv %s3333_s24  ;;  %v786_v60 = vmul.f32 %v785_v57, %v4154_v32  ;;  %s3341_s24 = sld [smem:[#allocation5 + $0x32]] }
  0xf5   : > { %v778_v61 = vmul.f32 %v777_v59, %v4151_v31  ;;  %v3278_v59 = vld [vmem:[%s5868_s1] ss:$0 sm:$0xff]  ;;  %s4486_s1 = sld [smem:[#allocation5 + $0x5e]] }
  0xf8   : > { %643 = vrot.lane.b32.xlu1 %v641_v0, %s5792_s30  ;;  %635 = vrot.lane.b32.xlu0 %v633_v4, %s5796_s17  ;;  %v793_v0 = vstv %s3335_s14  ;;  %s3343_s14 = sld [smem:[#allocation5 + $0x2a]]  ;;  %v873_v40 = vstv %s3345_s22 }
  0xf9   : > { %v794_v4 = vmul.f32 %v793_v0, %v4177_v42  ;;  %s3358_s22 = sld [smem:[#allocation5 + $0x38]] }
  0xfa   : > { %v841_v23 = vstv %s3341_s24  ;;  %s3349_s24 = sld [smem:[#allocation5 + $0x2c]] }
  0xfc   : > { %659 = vrot.lane.b32.xlu1 %v657_v18, %s5792_s30  ;;  %651 = vrot.lane.b32.xlu0 %v649_v19, %s5792_s30  ;;  %s3331_s30 = sld [smem:[#allocation5 + $0x26]]  ;;  %v834_v19 = vmul.f32 %v833_v14, %v4202_v52 }
  0xfe   : > { %v857_v35 = vstv %s3343_s14  ;;  %s3356_s14 = sld [smem:[#allocation5 + $0x40]] }
  0xff   : > { %v966_v0 = vstv %s3358_s22  ;;  %s3364_s22 = sld [smem:[#allocation5 + $0x3a]] }
 0x100   : > { %675 = vrot.lane.b32.xlu1 %v673_v21, %s5800_s25  ;;  %667 = vrot.lane.b32.xlu0 %v665_v22, %s5800_s25  ;;  %v849_v22 = vstv %s3342_s23  ;;  %s3350_s23 = sld [smem:[#allocation5 + $0x35]]  ;;  %v905_v53 = vstv %s3349_s24  ;;  %v967_v6 = vmul.f32 %v966_v0, %v4130_v24 }
 0x101   : > { %v850_v28 = vmul.f32 %v849_v22, %v4215_v58  ;;  %s4388_s24 = sld [smem:[#allocation5 + $0x4d]] }
 0x102   : > { %v761_v54 = vstv %s3331_s30  ;;  %s3339_s30 = sld [smem:[#allocation5 + $0x20]] }
 0x103   : > { %v762_v56 = vmul.f32 %v761_v54, %v4137_v25 }
 0x104   : > { %691 = vrot.lane.b32.xlu1 %v689_v29, %s5804_s20  ;;  %683 = vrot.lane.b32.xlu0 %v681_v34, %s5800_s25  ;;  %v842_v29 = vmul.f32 %v841_v23, %v4225_v62  ;;  %v865_v34 = vstv %s3344_s11  ;;  %s3355_s11 = sld [smem:[#allocation5 + $0x37]]  ;;  %v950_v57 = vstv %s3356_s14 }
 0x105   : > { %v866_v36 = vmul.f32 %v865_v34, %v4237_v3  ;;  %s4344_s14 = sld [smem:[#allocation5 + $0x42]] }
 0x108   : > { %707 = vrot.lane.b32.xlu1 %v705_v37, %s5804_s20  ;;  %699 = vrot.lane.b32.xlu0 %v697_v39, %s5804_s20  ;;  %v825_v18 = vstv %s3339_s30  ;;  %s3347_s30 = sld [smem:[#allocation5 + $0x34]]  ;;  %v858_v37 = vmul.f32 %v857_v35, %v4234_v2  ;;  %v881_v39 = vstv %s3346_s28 }
 0x109   : > { %v826_v21 = vmul.f32 %v825_v18, %v4199_v51  ;;  %v882_v41 = vmul.f32 %v881_v39, %v4248_v8  ;;  %s3357_s28 = sld [smem:[#allocation5 + $0x49]] }
 0x10c   : > { %740 = vrot.lane.b32.xlu1 %v738_v43, %s3868_s29  ;;  %732 = vrot.lane.b32.xlu0 %v730_v44, %s3868_s29  ;;  %v874_v43 = vmul.f32 %v873_v40, %v4245_v7  ;;  %v897_v44 = vstv %s3348_s16  ;;  %s4325_s16 = sld [smem:[#allocation5 + $0x41]]  ;;  %v1014_v40 = vstv %s3364_s22 }
 0x10d   : > { %v898_v48 = vmul.f32 %v897_v44, %v4257_v20  ;;  %v1015_v44 = vmul.f32 %v1014_v40, %v4167_v38  ;;  %s4403_s22 = sld [smem:[#allocation5 + $0x3d]] }
 0x10e   : > { %v889_v45 = vstv %s3347_s30  ;;  %s4329_s30 = sld [smem:[#allocation5 + $0x4a]] }
 0x10f   : > { %v958_v63 = vstv %s3357_s28  ;;  %s4355_s28 = sld [smem:[#allocation5 + $0x4b]] }
 0x110   : > { %756 = vrot.lane.b32.xlu1 %v754_v49, %s5802_s27  ;;  %748 = vrot.lane.b32.xlu0 %v746_v50, %s3868_s29  ;;  %v890_v49 = vmul.f32 %v889_v45, %v4263_v27  ;;  %v913_v50 = vstv %s3350_s23  ;;  %s4335_s23 = sld [smem:[#allocation5 + $0x9]]  ;;  %v959_v5 = vmul.f32 %v958_v63, %v4125_v17 }
 0x111   : > { %v914_v54 = vmul.f32 %v913_v50, %v4272_v33 }
 0x113   : > { %v1086_v40 = vstv %s4403_s22  ;;  %s5874_s22 = smov 111  }
 0x114   : > { %772 = vrot.lane.b32.xlu1 %v770_v55, %s5802_s27  ;;  %764 = vrot.lane.b32.xlu0 %v762_v56, %s5802_s27  ;;  %v906_v55 = vmul.f32 %v905_v53, %v4269_v30  ;;  %v942_v56 = vstv %s3355_s11  ;;  %s4342_s11 = sld [smem:[#allocation5 + $0x39]] }
 0x115   : > { %v1006_v39 = vstv %s4355_s28  ;;  %s4397_s28 = sld [smem:[#allocation5 + $0x4e]] }
 0x118   : > { %788 = vrot.lane.b32.xlu1 %v786_v60, %s5798_s19  ;;  %780 = vrot.lane.b32.xlu0 %v778_v61, %s5798_s19  ;;  %v943_v60 = vmul.f32 %v942_v56, %v4115_v15  ;;  %v951_v61 = vmul.f32 %v950_v57, %v4118_v16 }
 0x11a   : > { %v990_v23 = vstv %s4342_s11  ;;  %s3370_s11 = sld [smem:[#allocation5 + $0x3c]] }
 0x11c   : > { %804 = vrot.lane.b32.xlu1 %v802_v1, %s5794_s26  ;;  %796 = vrot.lane.b32.xlu0 %v794_v4, %s5798_s19  ;;  %s4331_s19 = sld [smem:[#allocation8]]  ;;  %v4347_v1 = vmul.f32 %v3278_v59, %v4098_v9  ;;  %v4360_v9 = vmul.f32 %v4103_v10, %v3278_v59  ;;  %v4372_v10 = vmul.f32 %v4110_v12, %v3278_v59 }
 0x120   : > { %820 = vrot.lane.b32.xlu1 %v818_v11, %s5794_s26  ;;  %812 = vrot.lane.b32.xlu0 %v810_v13, %s5794_s26  ;;  %s5870_s26 = smov 112   ;;  %v974_v11 = vstv %s4325_s16  ;;  %v982_v13 = vstv %s4329_s30  ;;  %s3366_s16 = sld [smem:[#allocation5 + $0x4c]] }
 0x121   : > { %v983_v22 = vmul.f32 %v982_v13, %v4140_v26  ;;  %s3368_s30 = sld [smem:[#allocation5 + $0x44]] }
 0x122   : > { %v505_v18 = vstv %s4331_s19  ;;  %s4380_s19 = sld [smem:[#allocation5 + $0x3b]] }
 0x124   : > { %836 = vrot.lane.b32.xlu1 %v834_v19, %s5796_s17  ;;  %828 = vrot.lane.b32.xlu0 %v826_v21, %s5796_s17  ;;  %v512_v19 = vstv %s4335_s23  ;;  %v975_v21 = vmul.f32 %v974_v11, %v4137_v25  ;;  %s5871_s23 = smov 120   ;;  %v1062_v11 = vstv %s3370_s11  ;;  %s4426_s11 = sld [smem:[#allocation5 + $0x50]] }
 0x125   : > { %v513_v34 = vmul.f32 %v512_v19, %v4360_v9 }
 0x127   : > { %v1046_v59 = vstv %s3368_s30  ;;  %s4416_s30 = sld [smem:[#allocation5 + $0x3e]] }
 0x128   : > { %852 = vrot.lane.b32.xlu1 %v850_v28, %s5870_s26  ;;  %844 = vrot.lane.b32.xlu0 %v842_v29, %s5796_s17  ;;  %s507_s17 = sld [smem:[#allocation5]]  ;;  %v998_v28 = vstv %s4344_s14  ;;  %s5872_s14 = smov 119   ;;  %v1038_v57 = vstv %s4380_s19 }
 0x129   : > { %v1039_v0 = vmul.f32 %v1038_v57, %v4199_v51  ;;  %s4412_s19 = sld [smem:[#allocation5 + $0x4f]] }
 0x12c   : > { %868 = vrot.lane.b32.xlu1 %v866_v36, %s5870_s26  ;;  %860 = vrot.lane.b32.xlu0 %v858_v37, %s5870_s26  ;;  %v991_v36 = vmul.f32 %v990_v23, %v4151_v31  ;;  %v999_v37 = vmul.f32 %v998_v28, %v4154_v32  ;;  %v1078_v28 = vstv %s4397_s28  ;;  %s4436_s28 = sld [smem:[#allocation5 + $0x5b]] }
 0x12e   : > { %v508_v4 = vstv %s507_s17  ;;  %s3365_s17 = sld [smem:[#allocation5 + $0x43]] }
 0x12f   : > { %v509_v14 = vmul.f32 %v508_v4, %v4347_v1  ;;  %v1047_v4 = vmul.f32 %v1046_v59, %v4202_v52 }
 0x130   : > { %884 = vrot.lane.b32.xlu1 %v882_v41, %s5800_s25  ;;  %876 = vrot.lane.b32.xlu0 %v874_v43, %s5800_s25  ;;  %v1007_v43 = vmul.f32 %v1006_v39, %v4177_v42 }
 0x131   : > { %v510_v29 = vadd.f32 %v509_v14, %v505_v18 }
 0x133   : > { %v514_v41 = vadd.f32 %v513_v34, %v510_v29 }
 0x134   : > { %900 = vrot.lane.b32.xlu1 %v898_v48, %s5804_s20  ;;  %892 = vrot.lane.b32.xlu0 %v890_v49, %s5800_s25  ;;  %s4351_s25 = sld [smem:[#allocation5 + $0x12]]  ;;  %v1022_v48 = vstv %s3365_s17  ;;  %v1030_v49 = vstv %s3366_s16  ;;  %s5873_s16 = smov 118  }
 0x135   : > { %s4406_s17 = sld [smem:[#allocation5 + $0x46]] }
 0x138   : > { %916 = vrot.lane.b32.xlu1 %v914_v54, %s5804_s20  ;;  %908 = vrot.lane.b32.xlu0 %v906_v55, %s5804_s20  ;;  %v1023_v54 = vmul.f32 %v1022_v48, %v4186_v46  ;;  %v1031_v55 = vmul.f32 %v1030_v49, %v4189_v47 }
 0x13a   : > { %v516_v35 = vstv %s4351_s25  ;;  %s4394_s25 = sld [smem:[#allocation5 + $0x45]] }
 0x13b   : > { %v517_v12 = vmul.f32 %v516_v35, %v4372_v10 }
 0x13c   : > { %945 = vrot.lane.b32.xlu1 %v943_v60, %s3868_s29  ;;  %953 = vrot.lane.b32.xlu0 %v951_v61, %s3868_s29 }
 0x13d   : > { %v518_v45 = vadd.f32 %v517_v12, %v514_v41  ;;  %v1094_v41 = vstv %s4406_s17  ;;  %s4442_s17 = sld [smem:[#allocation5 + $0x64]] }
 0x13e   : > { %v1095_v48 = vmul.f32 %v1094_v41, %v4248_v8 }
 0x140   : > { %961 = vrot.lane.b32.xlu1 %v959_v5, %s3868_s29  ;;  %969 = vrot.lane.b32.xlu0 %v967_v6, %s5802_s27  ;;  %v1054_v6 = vstv %s4388_s24  ;;  %v1070_v23 = vstv %s4394_s25  ;;  %s4422_s24 = sld [smem:[#allocation5 + $0x47]] }
 0x141   : > { %v1055_v19 = vmul.f32 %v1054_v6, %v4225_v62  ;;  %s4432_s25 = sld [smem:[#allocation5 + $0x52]] }
 0x144   : > { %977 = vrot.lane.b32.xlu1 %v975_v21, %s5802_s27  ;;  %985 = vrot.lane.b32.xlu0 %v983_v22, %s5802_s27  ;;  %v1063_v21 = vmul.f32 %v1062_v11, %v4215_v58  ;;  %s4464_s27 = sld [smem:[#allocation5 + $0x5d]] }
 0x148   : > { %993 = vrot.lane.b32.xlu1 %v991_v36, %s5871_s23  ;;  %1001 = vrot.lane.b32.xlu0 %v999_v37, %s5871_s23  ;;  %v1071_v36 = vmul.f32 %v1070_v23, %v4234_v2  ;;  %v1079_v37 = vmul.f32 %v1078_v28, %v4237_v3 }
 0x14c   : > { %1009 = vrot.lane.b32.xlu1 %v1007_v43, %s5871_s23  ;;  %1017 = vrot.lane.b32.xlu0 %v1015_v44, %s5872_s14 }
 0x14e   : > { %v532_v50 = vpop.permute.xlu1 %531  ;;  %v524_v53 = vpop.permute.xlu0 %523 }
 0x14f   : > { %v526_v56 = vadd.f32 %v524_v53, %v518_v45  ;;  %v1087_v45 = vmul.f32 %v1086_v40, %v4245_v7  ;;  %v1110_v53 = vstv %s4416_s30  ;;  %s4452_s30 = sld [smem:[#allocation5 + $0x5c]] }
 0x150   : > { %1025 = vrot.lane.b32.xlu1 %v1023_v54, %s5872_s14  ;;  %1033 = vrot.lane.b32.xlu0 %v1031_v55, %s5872_s14  ;;  %v1111_v59 = vmul.f32 %v1110_v53, %v4257_v20 }
 0x151   : > { %v534_v60 = vadd.f32 %v532_v50, %v526_v56  ;;  %v1102_v50 = vstv %s4412_s19  ;;  %s4446_s19 = sld [smem:[#allocation5 + $0x53]] }
 0x152   : > { %v548_v61 = vpop.permute.xlu1 %547  ;;  %v540_v63 = vpop.permute.xlu0 %539  ;;  %v1103_v57 = vmul.f32 %v1102_v50, %v4263_v27 }
 0x153   : > { %v542_v5 = vadd.f32 %v540_v63, %v534_v60  ;;  %v1126_v63 = vstv %s4426_s11  ;;  %s4460_s11 = sld [smem:[#allocation5 + $0x54]] }
 0x154   : > { %1041 = vrot.lane.b32.xlu1 %v1039_v0, %s5873_s16  ;;  %1049 = vrot.lane.b32.xlu0 %v1047_v4, %s5873_s16  ;;  %v1127_v11 = vmul.f32 %v1126_v63, %v4272_v33 }
 0x155   : > { %v550_v13 = vadd.f32 %v548_v61, %v542_v5  ;;  %v1118_v61 = vstv %s4422_s24  ;;  %s4456_s24 = sld [smem:[#allocation5 + $0x65]] }
 0x156   : > { %v564_v14 = vpop.permute.xlu1 %563  ;;  %v556_v18 = vpop.permute.xlu0 %555  ;;  %v1119_v6 = vmul.f32 %v1118_v61, %v4269_v30 }
 0x157   : > { %v558_v22 = vadd.f32 %v556_v18, %v550_v13  ;;  %v1158_v18 = vstv %s4436_s28  ;;  %s4472_s28 = sld [smem:[#allocation5 + $0x66]] }
 0x158   : > { %1057 = vrot.lane.b32.xlu1 %v1055_v19, %s5873_s16  ;;  %1065 = vrot.lane.b32.xlu0 %v1063_v21, %s5870_s26  ;;  %v1159_v28 = vmul.f32 %v1158_v18, %v4118_v16 }
 0x159   : > { %v566_v29 = vadd.f32 %v564_v14, %v558_v22  ;;  %v1150_v14 = vstv %s4432_s25  ;;  %s4468_s25 = sld [smem:[#allocation5 + $0x1b]] }
 0x15a   : > { %v580_v34 = vpop.permute.xlu1 %579  ;;  %v572_v35 = vpop.permute.xlu0 %571  ;;  %v1151_v23 = vmul.f32 %v1150_v14, %v4115_v15 }
 0x15b   : > { %v574_v39 = vadd.f32 %v572_v35, %v566_v29  ;;  %v1174_v35 = vstv %s4446_s19  ;;  %s4482_s19 = sld [smem:[#allocation5 + $0x24]] }
 0x15c   : > { %1073 = vrot.lane.b32.xlu1 %v1071_v36, %s5870_s26  ;;  %1081 = vrot.lane.b32.xlu0 %v1079_v37, %s5870_s26  ;;  %v1175_v41 = vmul.f32 %v1174_v35, %v4130_v24 }
 0x15d   : > { %v582_v12 = vadd.f32 %v580_v34, %v574_v39  ;;  %v1166_v34 = vstv %s4442_s17  ;;  %s4478_s17 = sld [smem:[#allocation8 + $0x1]] }
 0x15e   : > { %v596_v43 = vpop.permute.xlu1 %595  ;;  %v588_v44 = vpop.permute.xlu0 %587  ;;  %v1167_v40 = vmul.f32 %v1166_v34, %v4125_v17 }
 0x15f   : > { %v590_v49 = vadd.f32 %v588_v44, %v582_v12  ;;  %v1190_v44 = vstv %s4456_s24  ;;  %s4503_s24 = sld [smem:[#allocation5 + $0x56]] }
 0x160   : > { %1089 = vrot.lane.b32.xlu1 %v1087_v45, %s5874_s22  ;;  %1097 = vrot.lane.b32.xlu0 %v1095_v48, %s5874_s22  ;;  %v1191_v53 = vmul.f32 %v1190_v44, %v4140_v26 }
 0x161   : > { %v598_v54 = vadd.f32 %v596_v43, %v590_v49  ;;  %v1182_v43 = vstv %s4452_s30  ;;  %s4495_s30 = sld [smem:[#allocation5 + $0x2d]]  ;;  %v721_v14 = vstv %s4482_s19 }
 0x162   : > { %v612_v55 = vpop.permute.xlu1 %611  ;;  %v604_v56 = vpop.permute.xlu0 %603  ;;  %v1183_v50 = vmul.f32 %v1182_v43, %v4137_v25  ;;  %s3404_s19 = sld [smem:[#allocation5 + $0x59]] }
 0x163   : > { %v606_v60 = vadd.f32 %v604_v56, %v598_v54  ;;  %v1206_v56 = vstv %s4464_s27  ;;  %s4508_s27 = sld [smem:[#allocation5 + $0x5f]] }
 0x164   : > { %1105 = vrot.lane.b32.xlu1 %v1103_v57, %s5874_s22  ;;  %1113 = vrot.lane.b32.xlu0 %v1111_v59, %s5804_s20  ;;  %v717_v57 = vstv %s4468_s25  ;;  %s4536_s25 = sld [smem:[#allocation5 + $0x58]] }
 0x165   : > { %v614_v0 = vadd.f32 %v612_v55, %v606_v60  ;;  %v1198_v55 = vstv %s4460_s11  ;;  %s4520_s11 = sld [smem:[#allocation5 + $0x57]] }
 0x166   : > { %v628_v4 = vpop.permute.xlu1 %627  ;;  %v620_v5 = vpop.permute.xlu0 %619  ;;  %v1199_v63 = vmul.f32 %v1198_v55, %v4151_v31 }
 0x167   : > { %v622_v13 = vadd.f32 %v620_v5, %v614_v0  ;;  %v1207_v0 = vmul.f32 %v1206_v56, %v4154_v32  ;;  %v718_v5 = vmul.f32 %v717_v57, %v4347_v1  ;;  %v725_v35 = vstv %s4495_s30  ;;  %s4553_s30 = sld [smem:[#allocation5 + $0x62]] }
 0x168   : > { %1121 = vrot.lane.b32.xlu1 %v1119_v6, %s5804_s20  ;;  %1129 = vrot.lane.b32.xlu0 %v1127_v11, %s5804_s20  ;;  %s4474_s20 = sld [smem:[#allocation5 + $0x55]]  ;;  %v726_v43 = vmul.f32 %v725_v35, %v4372_v10 }
 0x169   : > { %v630_v19 = vadd.f32 %v628_v4, %v622_v13  ;;  %v1214_v4 = vstv %s4472_s28  ;;  %v714_v13 = vstv %s4478_s17  ;;  %s3402_s28 = sld [smem:[#allocation5 + $0x61]] }
 0x16a   : > { %v644_v21 = vpop.permute.xlu1 %643  ;;  %v636_v22 = vpop.permute.xlu0 %635  ;;  %s4544_s17 = sld [smem:[#allocation5 + $0x6a]] }
 0x16b   : > { %v638_v29 = vadd.f32 %v636_v22, %v630_v19  ;;  %v1215_v22 = vmul.f32 %v1214_v4, %v4177_v42 }
 0x16c   : > { %1153 = vrot.lane.b32.xlu1 %v1151_v23, %s3868_s29  ;;  %1161 = vrot.lane.b32.xlu0 %v1159_v28, %s3868_s29  ;;  %v719_v28 = vadd.f32 %v718_v5, %v714_v13 }
 0x16d   : > { %v646_v36 = vadd.f32 %v644_v21, %v638_v29  ;;  %v722_v29 = vmul.f32 %v721_v14, %v4360_v9 }
 0x16e   : > { %v660_v37 = vpop.permute.xlu1 %659  ;;  %v652_v39 = vpop.permute.xlu0 %651  ;;  %v1222_v11 = vstv %s4474_s20  ;;  %s4515_s20 = sld [smem:[#allocation5 + $0x68]] }
 0x16f   : > { %v654_v12 = vadd.f32 %v652_v39, %v646_v36  ;;  %v1223_v23 = vmul.f32 %v1222_v11, %v4167_v38  ;;  %v1230_v36 = vstv %s4486_s1  ;;  %s4527_s1 = sld [smem:[#allocation5 + $0x60]] }
 0x170   : > { %1169 = vrot.lane.b32.xlu1 %v1167_v40, %s3868_s29  ;;  %1177 = vrot.lane.b32.xlu0 %v1175_v41, %s5875_s0  ;;  %v1231_v44 = vmul.f32 %v1230_v36, %v4186_v46  ;;  %v1310_v36 = vstv %s4544_s17  ;;  %s4597_s17 = sld [smem:[#allocation5 + $0x77]] }
 0x171   : > { %v662_v45 = vadd.f32 %v660_v37, %v654_v12  ;;  %v1238_v37 = vstv %s4490_s2  ;;  %v723_v12 = vadd.f32 %v722_v29, %v719_v28  ;;  %s3400_s2 = sld [smem:[#allocation5 + $0x69]] }
 0x172   : > { %v676_v48 = vpop.permute.xlu1 %675  ;;  %v668_v49 = vpop.permute.xlu0 %667 }
 0x173   : > { %v670_v54 = vadd.f32 %v668_v49, %v662_v45  ;;  %v1239_v45 = vmul.f32 %v1238_v37, %v4189_v47  ;;  %v1254_v49 = vstv %s4508_s27  ;;  %s4566_s27 = sld [smem:[#allocation5 + $0x76]]  ;;  %v1318_v37 = vstv %s3404_s19 }
 0x174   : > { %1185 = vrot.lane.b32.xlu1 %v1183_v50, %s5875_s0  ;;  %1193 = vrot.lane.b32.xlu0 %v1191_v53, %s5875_s0  ;;  %v727_v50 = vadd.f32 %v726_v43, %v723_v12  ;;  %v1255_v56 = vmul.f32 %v1254_v49, %v4202_v52  ;;  %v1262_v57 = vstv %s4515_s20  ;;  %s4569_s20 = sld [smem:[#allocation5 + $0x6d]]  ;;  %v1311_v12 = vmul.f32 %v1310_v36, %v4263_v27 }
 0x175   : > { %v678_v59 = vadd.f32 %v676_v48, %v670_v54  ;;  %v1246_v48 = vstv %s4503_s24  ;;  %v1278_v5 = vstv %s4527_s1  ;;  %s4556_s24 = sld [smem:[#allocation5 + $0x6b]]  ;;  %v1319_v43 = vmul.f32 %v1318_v37, %v4257_v20 }
 0x176   : > { %v692_v60 = vpop.permute.xlu1 %691  ;;  %v684_v61 = vpop.permute.xlu0 %683  ;;  %v1247_v55 = vmul.f32 %v1246_v48, %v4199_v51  ;;  %s4583_s1 = sld [smem:[#allocation5 + $0x7f]] }
 0x177   : > { %v686_v6 = vadd.f32 %v684_v61, %v678_v59  ;;  %v1270_v59 = vstv %s4520_s11  ;;  %s4579_s11 = sld [smem:[#allocation5 + $0x6e]] }
 0x178   : > { %1201 = vrot.lane.b32.xlu1 %v1199_v63, %s5871_s23  ;;  %1209 = vrot.lane.b32.xlu0 %v1207_v0, %s5871_s23  ;;  %v1263_v0 = vmul.f32 %v1262_v57, %v4225_v62  ;;  %v1271_v4 = vmul.f32 %v1270_v59, %v4215_v58  ;;  %s4601_s19 = sld [smem:[#allocation8 + $0x2]] }
 0x179   : > { %v694_v18 = vadd.f32 %v692_v60, %v686_v6  ;;  %v1286_v6 = vstv %s3400_s2  ;;  %s5876_s2 = smov 110  }
 0x17a   : > { %v708_v19 = vpop.permute.xlu1 %707  ;;  %v700_v21 = vpop.permute.xlu0 %699 }
 0x17b   : > { %v702_v34 = vadd.f32 %v700_v21, %v694_v18  ;;  %v1279_v18 = vmul.f32 %v1278_v5, %v4234_v2  ;;  %v1294_v21 = vstv %s4536_s25  ;;  %s4587_s25 = sld [smem:[#allocation5 + $0x36]] }
 0x17c   : > { %1217 = vrot.lane.b32.xlu1 %v1215_v22, %s5871_s23  ;;  %1225 = vrot.lane.b32.xlu0 %v1223_v23, %s5872_s14  ;;  %v1302_v22 = vstv %s3402_s28  ;;  %s4589_s28 = sld [smem:[#allocation5 + $0x80]]  ;;  %v1378_v5 = vstv %s4583_s1 }
 0x17d   : > { %v710_v39 = vadd.f32 %v708_v19, %v702_v34  ;;  %v1287_v19 = vmul.f32 %v1286_v6, %v4237_v3  ;;  %v1295_v34 = vmul.f32 %v1294_v21, %v4245_v7  ;;  %v1303_v35 = vmul.f32 %v1302_v22, %v4248_v8  ;;  %s4634_s1 = sld [smem:[#allocation5 + $0x81]] }
 0x17e   : > { %v741_v40 = vpop.permute.xlu1 %740  ;;  %v733_v41 = vpop.permute.xlu0 %732  ;;  %v1379_v21 = vmul.f32 %v1378_v5, %v4125_v17 }
 0x17f   : > { %712 = vst.msk [vmem:[#allocation2] sm:$0xff] %vm711_vm0, %v710_v39  ;;  %v735_v60 = vadd.f32 %v733_v41, %v727_v50 }
 0x180   : > { %1233 = vrot.lane.b32.xlu1 %v1231_v44, %s5872_s14  ;;  %1241 = vrot.lane.b32.xlu0 %v1239_v45, %s5872_s14  ;;  %v1326_v44 = vstv %s4553_s30  ;;  %v1334_v45 = vstv %s4556_s24  ;;  %s4605_s30 = sld [smem:[#allocation5 + $0x3f]] }
 0x181   : > { %v743_v11 = vadd.f32 %v741_v40, %v735_v60  ;;  %s4613_s24 = sld [smem:[#allocation5 + $0x78]] }
 0x182   : > { %v757_v53 = vpop.permute.xlu1 %756  ;;  %v749_v54 = vpop.permute.xlu0 %748  ;;  %v1402_v22 = vstv %s4589_s28  ;;  %s4653_s28 = sld [smem:[#allocation5 + $0x79]] }
 0x183   : > { %v751_v23 = vadd.f32 %v749_v54, %v743_v11  ;;  %v1335_v54 = vmul.f32 %v1334_v45, %v4272_v33 }
 0x184   : > { %1249 = vrot.lane.b32.xlu1 %v1247_v55, %s5873_s16  ;;  %1257 = vrot.lane.b32.xlu0 %v1255_v56, %s5873_s16  ;;  %v1370_v55 = vstv %s4566_s27  ;;  %v1362_v56 = vstv %s4569_s20  ;;  %s4617_s27 = sld [smem:[#allocation5 + $0x6f]] }
 0x185   : > { %v759_v39 = vadd.f32 %v757_v53, %v751_v23  ;;  %v1327_v53 = vmul.f32 %v1326_v44, %v4269_v30  ;;  %s4622_s20 = sld [smem:[#allocation5 + $0x48]]  ;;  %v1394_v23 = vstv %s4597_s17 }
 0x186   : > { %v773_v61 = vpop.permute.xlu1 %772  ;;  %v765_v63 = vpop.permute.xlu0 %764  ;;  %s4665_s17 = sld [smem:[#allocation5 + $0x7a]] }
 0x187   : > { %v767_v48 = vadd.f32 %v765_v63, %v759_v39  ;;  %v1371_v63 = vmul.f32 %v1370_v55, %v4118_v16  ;;  %v1418_v44 = vstv %s4613_s24  ;;  %s4685_s24 = sld [smem:[#allocation5 + $0x83]] }
 0x188   : > { %1265 = vrot.lane.b32.xlu1 %v1263_v0, %s5873_s16  ;;  %1273 = vrot.lane.b32.xlu0 %v1271_v4, %s5870_s26  ;;  %v1363_v0 = vmul.f32 %v1362_v56, %v4115_v15  ;;  %v1386_v4 = vstv %s4579_s11  ;;  %s4630_s11 = sld [smem:[#allocation5 + $0x70]] }
 0x189   : > { %v775_v57 = vadd.f32 %v773_v61, %v767_v48  ;;  %v930_v61 = vstv %s4587_s25  ;;  %s4648_s25 = sld [smem:[#allocation5 + $0x82]] }
 0x18a   : > { %v4549_v13 = vpop.permute.xlu1 %788  ;;  %v781_v14 = vpop.permute.xlu0 %780  ;;  %v1410_v45 = vstv %s4617_s27  ;;  %s4692_s27 = sld [smem:[#allocation5 + $0xbe]] }
 0x18b   : > { %v783_v6 = vadd.f32 %v781_v14, %v775_v57  ;;  %v927_v14 = vstv %s4601_s19  ;;  %v1419_v57 = vmul.f32 %v1418_v44, %v4154_v32  ;;  %s4670_s19 = sld [smem:[#allocation5 + $0x71]] }
 0x18c   : > { %1281 = vrot.lane.b32.xlu1 %v1279_v18, %s5870_s26  ;;  %1289 = vrot.lane.b32.xlu0 %v1287_v19, %s5870_s26  ;;  %v1387_v19 = vmul.f32 %v1386_v4, %v4130_v24  ;;  %v1426_v4 = vstv %s4634_s1  ;;  %s4707_s1 = sld [smem:[#allocation5 + $0x91]] }
 0x18d   : > { %v791_v36 = vadd.f32 %v4549_v13, %v783_v6  ;;  %v938_v13 = vstv %s4622_s20  ;;  %s4696_s20 = sld [smem:[#allocation5 + $0x88]] }
 0x18e   : > { %v4560_v28 = vpop.permute.xlu1 %804  ;;  %v4562_v29 = vpop.permute.xlu0 %796 }
 0x190   : > { %1297 = vrot.lane.b32.xlu1 %v1295_v34, %s5874_s22  ;;  %1305 = vrot.lane.b32.xlu0 %v1303_v35, %s5874_s22  ;;  %v931_v34 = vmul.f32 %v930_v61, %v4347_v1  ;;  %v934_v35 = vstv %s4605_s30  ;;  %v939_v61 = vmul.f32 %v938_v13, %v4372_v10  ;;  %s4681_s30 = sld [smem:[#allocation5 + $0x72]] }
 0x192   : > { %v4573_v40 = vpop.permute.xlu1 %820  ;;  %v4575_v41 = vpop.permute.xlu0 %812  ;;  %v932_v48 = vadd.f32 %v931_v34, %v927_v14  ;;  %v1450_v34 = vstv %s4648_s25  ;;  %v1442_v14 = vstv %s4653_s28  ;;  %s4714_s25 = sld [smem:[#allocation5 + $0xd0]] }
 0x193   : > { %s4718_s28 = sld [smem:[#allocation5 + $0x9a]] }
 0x194   : > { %1313 = vrot.lane.b32.xlu1 %v1311_v12, %s5874_s22  ;;  %1321 = vrot.lane.b32.xlu0 %v1319_v43, %s5876_s2  ;;  %v1403_v12 = vmul.f32 %v1402_v22, %v4140_v26  ;;  %v1395_v43 = vmul.f32 %v1394_v23, %v4137_v25  ;;  %v1427_v22 = vmul.f32 %v1426_v4, %v4177_v42 }
 0x196   : > { %v4591_v49 = vpop.permute.xlu1 %836  ;;  %v4593_v50 = vpop.permute.xlu0 %828  ;;  %v1482_v4 = vstv %s4681_s30  ;;  %s4736_s30 = sld [smem:[#allocation5 + $0xc8]] }
 0x198   : > { %1329 = vrot.lane.b32.xlu1 %v1327_v53, %s5876_s2  ;;  %1337 = vrot.lane.b32.xlu0 %v1335_v54, %s5876_s2  ;;  %v935_v53 = vmul.f32 %v934_v35, %v4360_v9  ;;  %v799_v54 = vadd.f32 %v4562_v29, %v791_v36 }
 0x19a   : > { %v4607_v59 = vpop.permute.xlu1 %852  ;;  %v4609_v60 = vpop.permute.xlu0 %844  ;;  %v936_v5 = vadd.f32 %v935_v53, %v932_v48  ;;  %v807_v29 = vadd.f32 %v4560_v28, %v799_v54  ;;  %v1458_v48 = vstv %s4670_s19  ;;  %s4729_s19 = sld [smem:[#allocation5 + $0x89]] }
 0x19c   : > { %1373 = vrot.lane.b32.xlu1 %v1371_v63, %s3868_s29  ;;  %1365 = vrot.lane.b32.xlu0 %v1363_v0, %s3868_s29  ;;  %v1411_v63 = vmul.f32 %v1410_v45, %v4151_v31  ;;  %v1434_v0 = vstv %s4630_s11  ;;  %v940_v23 = vadd.f32 %v939_v61, %v936_v5  ;;  %v815_v28 = vadd.f32 %v4575_v41, %v807_v29  ;;  %s4703_s11 = sld [smem:[#allocation5 + $0xc7]] }
 0x19d   : > { %v1466_v45 = vstv %s4665_s17  ;;  %v1474_v5 = vstv %s4685_s24  ;;  %s4725_s17 = sld [smem:[#allocation5 + $0xbf]] }
 0x19e   : > { %v4624_v11 = vpop.permute.xlu1 %868  ;;  %v4626_v18 = vpop.permute.xlu0 %860  ;;  %v823_v53 = vadd.f32 %v4573_v40, %v815_v28  ;;  %v1570_v28 = vstv %s4696_s20  ;;  %s4740_s24 = sld [smem:[#allocation5 + $0x92]] }
 0x19f   : > { %s4751_s20 = sld [smem:[#allocation5 + $0x9b]] }
 0x1a0   : > { %1389 = vrot.lane.b32.xlu1 %v1387_v19, %s5875_s0  ;;  %1381 = vrot.lane.b32.xlu0 %v1379_v21, %s3868_s29  ;;  %v1435_v21 = vmul.f32 %v1434_v0, %v4167_v38  ;;  %v831_v61 = vadd.f32 %v4593_v50, %v823_v53 }
 0x1a2   : > { %v4642_v37 = vpop.permute.xlu1 %884  ;;  %v4644_v39 = vpop.permute.xlu0 %876 }
 0x1a4   : > { %1405 = vrot.lane.b32.xlu1 %v1403_v12, %s5875_s0  ;;  %1397 = vrot.lane.b32.xlu0 %v1395_v43, %s5875_s0  ;;  %v1451_v12 = vmul.f32 %v1450_v34, %v4189_v47  ;;  %v1443_v43 = vmul.f32 %v1442_v14, %v4186_v46  ;;  %v1990_v14 = vstv %s4692_s27  ;;  %s4747_s27 = sld [smem:[#allocation5 + $0xd1]] }
 0x1a6   : > { %v4659_v55 = vpop.permute.xlu1 %900  ;;  %v4661_v56 = vpop.permute.xlu0 %892 }
 0x1a8   : > { %1421 = vrot.lane.b32.xlu1 %v1419_v57, %s5871_s23  ;;  %1413 = vrot.lane.b32.xlu0 %v1411_v63, %s5871_s23  ;;  %v1467_v57 = vmul.f32 %v1466_v45, %v4202_v52  ;;  %v1459_v63 = vmul.f32 %v1458_v48, %v4199_v51  ;;  %v1998_v48 = vstv %s4703_s11  ;;  %s4755_s11 = sld [smem:[#allocation5 + $0x51]] }
 0x1aa   : > { %v4675_v6 = vpop.permute.xlu1 %916  ;;  %v4677_v19 = vpop.permute.xlu0 %908 }
 0x1ac   : > { %1437 = vrot.lane.b32.xlu1 %v1435_v21, %s5872_s14  ;;  %1429 = vrot.lane.b32.xlu0 %v1427_v22, %s5871_s23  ;;  %v1483_v22 = vmul.f32 %v1482_v4, %v4215_v58  ;;  %v2006_v4 = vstv %s4714_s25  ;;  %s4762_s25 = sld [smem:[#allocation5 + $0x8a]] }
 0x1ae   : > { %v946_v35 = vpop.permute.xlu1 %945  ;;  %v954_v36 = vpop.permute.xlu0 %953 }
 0x1af   : > { %v948_v44 = vadd.f32 %v946_v35, %v940_v23  ;;  %v1475_v23 = vmul.f32 %v1474_v5, %v4225_v62  ;;  %v839_v35 = vadd.f32 %v4591_v49, %v831_v61  ;;  %v1586_v5 = vstv %s4718_s28  ;;  %s4766_s28 = sld [smem:[#allocation8 + $0x3]] }
 0x1b0   : > { %1453 = vrot.lane.b32.xlu1 %v1451_v12, %s5872_s14  ;;  %1445 = vrot.lane.b32.xlu0 %v1443_v43, %s5872_s14  ;;  %v1991_v43 = vmul.f32 %v1990_v14, %v4115_v15  ;;  %v1594_v14 = vstv %s4729_s19  ;;  %s4775_s19 = sld [smem:[#allocation5 + $0xc9]] }
 0x1b1   : > { %v956_v41 = vadd.f32 %v954_v36, %v948_v44  ;;  %v1571_v44 = vmul.f32 %v1570_v28, %v4115_v15  ;;  %v847_v53 = vadd.f32 %v4609_v60, %v839_v35 }
 0x1b2   : > { %v962_v13 = vpop.permute.xlu1 %961  ;;  %v970_v54 = vpop.permute.xlu0 %969 }
 0x1b3   : > { %v964_v0 = vadd.f32 %v962_v13, %v956_v41  ;;  %v1578_v41 = vstv %s4707_s1  ;;  %s4757_s1 = sld [smem:[#allocation5 + $0xc0]] }
 0x1b4   : > { %1469 = vrot.lane.b32.xlu1 %v1467_v57, %s5873_s16  ;;  %1461 = vrot.lane.b32.xlu0 %v1459_v63, %s5873_s16  ;;  %v1999_v57 = vmul.f32 %v1998_v48, %v4118_v16  ;;  %v1579_v63 = vmul.f32 %v1578_v41, %v4118_v16 }
 0x1b5   : > { %v972_v40 = vadd.f32 %v970_v54, %v964_v0 }
 0x1b6   : > { %v978_v29 = vpop.permute.xlu1 %977  ;;  %v986_v21 = vpop.permute.xlu0 %985 }
 0x1b7   : > { %v980_v34 = vadd.f32 %v978_v29, %v972_v40  ;;  %v855_v40 = vadd.f32 %v4607_v59, %v847_v53 }
 0x1b8   : > { %1485 = vrot.lane.b32.xlu1 %v1483_v22, %s5870_s26  ;;  %1477 = vrot.lane.b32.xlu0 %v1475_v23, %s5873_s16  ;;  %v1587_v22 = vmul.f32 %v1586_v5, %v4125_v17 }
 0x1b9   : > { %v988_v50 = vadd.f32 %v986_v21, %v980_v34  ;;  %v2007_v21 = vmul.f32 %v2006_v4, %v4125_v17  ;;  %v2014_v34 = vstv %s4725_s17  ;;  %v863_v28 = vadd.f32 %v4626_v18, %v855_v40  ;;  %s4770_s17 = sld [smem:[#allocation5 + $0x5a]] }
 0x1ba   : > { %v994_v36 = vpop.permute.xlu1 %993  ;;  %v1002_v12 = vpop.permute.xlu0 %1001 }
 0x1bb   : > { %v996_v45 = vadd.f32 %v994_v36, %v988_v50  ;;  %v2015_v36 = vmul.f32 %v2014_v34, %v4130_v24  ;;  %v871_v48 = vadd.f32 %v4624_v11, %v863_v28  ;;  %v1138_v11 = vstv %s4755_s11  ;;  %s4804_s11 = sld [smem:[#allocation5 + $0xc1]] }
 0x1bc   : > { %1993 = vrot.lane.b32.xlu1 %v1991_v43, %s3868_s29  ;;  %1573 = vrot.lane.b32.xlu0 %v1571_v44, %s3868_s29  ;;  %v2022_v44 = vstv %s4736_s30  ;;  %s4779_s30 = sld [smem:[#allocation5 + $0x93]] }
 0x1bd   : > { %v1004_v49 = vadd.f32 %v1002_v12, %v996_v45  ;;  %v1595_v12 = vmul.f32 %v1594_v14, %v4130_v24  ;;  %v1602_v45 = vstv %s4740_s24  ;;  %v2023_v53 = vmul.f32 %v2022_v44, %v4137_v25  ;;  %s4784_s24 = sld [smem:[#allocation5 + $0x63]] }
 0x1be   : > { %v1010_v13 = vpop.permute.xlu1 %1009  ;;  %v1018_v54 = vpop.permute.xlu0 %1017  ;;  %v879_v4 = vadd.f32 %v4644_v39, %v871_v48  ;;  %v1135_v39 = vstv %s4766_s28  ;;  %s3450_s28 = sld [smem:[#allocation5 + $0x9d]] }
 0x1bf   : > { %v1012_v0 = vadd.f32 %v1010_v13, %v1004_v49  ;;  %v1603_v13 = vmul.f32 %v1602_v45, %v4137_v25  ;;  %v1142_v34 = vstv %s4770_s17  ;;  %s3451_s17 = sld [smem:[#allocation5 + $0x8c]] }
 0x1c0   : > { %2001 = vrot.lane.b32.xlu1 %v1999_v57, %s3868_s29  ;;  %1581 = vrot.lane.b32.xlu0 %v1579_v63, %s3868_s29  ;;  %v2030_v57 = vstv %s4747_s27  ;;  %v1610_v63 = vstv %s4751_s20  ;;  %s4789_s27 = sld [smem:[#allocation5 + $0xd2]] }
 0x1c1   : > { %v1020_v60 = vadd.f32 %v1018_v54, %v1012_v0  ;;  %v2031_v40 = vmul.f32 %v2030_v57, %v4140_v26  ;;  %s4793_s20 = sld [smem:[#allocation5 + $0x9c]] }
 0x1c2   : > { %v1026_v61 = vpop.permute.xlu1 %1025  ;;  %v1034_v29 = vpop.permute.xlu0 %1033  ;;  %v1626_v44 = vstv %s4779_s30  ;;  %s3452_s30 = sld [smem:[#allocation5 + $0x95]] }
 0x1c3   : > { %v1028_v23 = vadd.f32 %v1026_v61, %v1020_v60  ;;  %v1611_v61 = vmul.f32 %v1610_v63, %v4140_v26 }
 0x1c4   : > { %2009 = vrot.lane.b32.xlu1 %v2007_v21, %s3868_s29  ;;  %1589 = vrot.lane.b32.xlu0 %v1587_v22, %s3868_s29  ;;  %v2038_v21 = vstv %s4757_s1  ;;  %v1618_v22 = vstv %s4762_s25  ;;  %s4808_s1 = sld [smem:[#allocation5 + $0x8b]] }
 0x1c5   : > { %v1036_v59 = vadd.f32 %v1034_v29, %v1028_v23  ;;  %v1139_v23 = vmul.f32 %v1138_v11, %v4347_v1  ;;  %s3449_s25 = sld [smem:[#allocation5 + $0x94]] }
 0x1c6   : > { %v1042_v50 = vpop.permute.xlu1 %1041  ;;  %v1050_v35 = vpop.permute.xlu0 %1049  ;;  %v2054_v57 = vstv %s4789_s27  ;;  %s3454_s27 = sld [smem:[#allocation5 + $0x8d]] }
 0x1c7   : > { %v1044_v43 = vadd.f32 %v1042_v50, %v1036_v59  ;;  %v887_v59 = vadd.f32 %v4642_v37, %v879_v4  ;;  %v1140_v45 = vadd.f32 %v1139_v23, %v1135_v39  ;;  %v1146_v37 = vstv %s4784_s24  ;;  %s3453_s24 = sld [smem:[#allocation5 + $0x9e]] }
 0x1c8   : > { %2017 = vrot.lane.b32.xlu1 %v2015_v36, %s5875_s0  ;;  %1597 = vrot.lane.b32.xlu0 %v1595_v12, %s5875_s0  ;;  %v1619_v36 = vmul.f32 %v1618_v22, %v4151_v31  ;;  %v2046_v12 = vstv %s4775_s19  ;;  %v1634_v11 = vstv %s4793_s20  ;;  %v1147_v4 = vmul.f32 %v1146_v37, %v4372_v10  ;;  %s5806_s19 = smov 64   ;;  %s3455_s20 = sld [smem:[#allocation5 + $0x96]] }
 0x1c9   : > { %v1052_v18 = vadd.f32 %v1050_v35, %v1044_v43  ;;  %v2039_v35 = vmul.f32 %v2038_v21, %v4151_v31  ;;  %v2062_v23 = vstv %s4804_s11  ;;  %s3408_s11 = sld [smem:[#allocation5 + $0x6c]] }
 0x1ca   : > { %v1058_v41 = vpop.permute.xlu1 %1057  ;;  %v1066_v49 = vpop.permute.xlu0 %1065  ;;  %v1642_v39 = vstv %s4808_s1  ;;  %s3456_s1 = sld [smem:[#allocation5 + $0x9f]] }
 0x1cb   : > { %v1060_v54 = vadd.f32 %v1058_v41, %v1052_v18  ;;  %v1143_v18 = vmul.f32 %v1142_v34, %v4360_v9  ;;  %v895_v41 = vadd.f32 %v4661_v56, %v887_v59 }
 0x1cc   : > { %2025 = vrot.lane.b32.xlu1 %v2023_v53, %s5875_s0  ;;  %1605 = vrot.lane.b32.xlu0 %v1603_v13, %s5875_s0  ;;  %v2047_v13 = vmul.f32 %v2046_v12, %v4154_v32 }
 0x1cd   : > { %v1068_v0 = vadd.f32 %v1066_v49, %v1060_v54  ;;  %v1627_v54 = vmul.f32 %v1626_v44, %v4154_v32  ;;  %v903_v56 = vadd.f32 %v4659_v55, %v895_v41 }
 0x1ce   : > { %v1074_v5 = vpop.permute.xlu1 %1073  ;;  %v1082_v60 = vpop.permute.xlu0 %1081 }
 0x1cf   : > { %v1076_v29 = vadd.f32 %v1074_v5, %v1068_v0  ;;  %v1144_v0 = vadd.f32 %v1143_v18, %v1140_v45  ;;  %v1650_v45 = vstv %s3449_s25  ;;  %s4845_s25 = sld [smem:[#allocation8 + $0x4]] }
 0x1d0   : > { %2033 = vrot.lane.b32.xlu1 %v2031_v40, %s5875_s0  ;;  %1613 = vrot.lane.b32.xlu0 %v1611_v61, %s5875_s0  ;;  %v2055_v61 = vmul.f32 %v2054_v57, %v4177_v42  ;;  %v1651_v41 = vmul.f32 %v1650_v45, %v4186_v46  ;;  %v1350_v45 = vstv %s3408_s11  ;;  %s3460_s11 = sld [smem:[#allocation5 + $0x8f]] }
 0x1d1   : > { %v1084_v14 = vadd.f32 %v1082_v60, %v1076_v29  ;;  %v1635_v29 = vmul.f32 %v1634_v11, %v4177_v42  ;;  %v1148_v22 = vadd.f32 %v1147_v4, %v1144_v0  ;;  %v1666_v11 = vstv %s3451_s17  ;;  %s3457_s17 = sld [smem:[#allocation5 + $0x8e]] }
 0x1d2   : > { %v1090_v28 = vpop.permute.xlu1 %1089  ;;  %v1098_v50 = vpop.permute.xlu0 %1097 }
 0x1d3   : > { %v1092_v43 = vadd.f32 %v1090_v28, %v1084_v14  ;;  %v911_v14 = vadd.f32 %v4677_v19, %v903_v56  ;;  %v2063_v28 = vmul.f32 %v2062_v23, %v4167_v38  ;;  %v1667_v56 = vmul.f32 %v1666_v11, %v4199_v51 }
 0x1d4   : > { %2041 = vrot.lane.b32.xlu1 %v2039_v35, %s5871_s23  ;;  %1621 = vrot.lane.b32.xlu0 %v1619_v36, %s5871_s23 }
 0x1d5   : > { %v1100_v48 = vadd.f32 %v1098_v50, %v1092_v43  ;;  %v1643_v50 = vmul.f32 %v1642_v39, %v4167_v38  ;;  %v919_v12 = vadd.f32 %v4675_v6, %v911_v14  ;;  %v1682_v39 = vstv %s3453_s24  ;;  %s3458_s24 = sld [smem:[#allocation5 + $0x97]] }
 0x1d6   : > { %v1106_v49 = vpop.permute.xlu1 %1105  ;;  %v1114_v53 = vpop.permute.xlu0 %1113 }
 0x1d7   : > { %v1108_v63 = vadd.f32 %v1106_v49, %v1100_v48 }
 0x1d8   : > { %2049 = vrot.lane.b32.xlu1 %v2047_v13, %s5871_s23  ;;  %1629 = vrot.lane.b32.xlu0 %v1627_v54, %s5871_s23 }
 0x1d9   : > { %v1116_v5 = vadd.f32 %v1114_v53, %v1108_v63  ;;  %v1658_v53 = vstv %s3450_s28  ;;  %s3409_s28 = sld [smem:[#allocation5 + $0x75]] }
 0x1da   : > { %v1122_v60 = vpop.permute.xlu1 %1121  ;;  %v1130_v40 = vpop.permute.xlu0 %1129  ;;  %v1659_v57 = vmul.f32 %v1658_v53, %v4189_v47  ;;  %v1706_v53 = vstv %s3456_s1  ;;  %s3506_s1 = sld [smem:[#allocation5 + $0xd3]] }
 0x1db   : > { %v1124_v21 = vadd.f32 %v1122_v60, %v1116_v5 }
 0x1dc   : > { %2057 = vrot.lane.b32.xlu1 %v2055_v61, %s5871_s23  ;;  %1637 = vrot.lane.b32.xlu0 %v1635_v29, %s5871_s23 }
 0x1dd   : > { %v1132_v34 = vadd.f32 %v1130_v40, %v1124_v21  ;;  %v1674_v40 = vstv %s3452_s30  ;;  %s4850_s30 = sld [smem:[#allocation5 + $0x7e]] }
 0x1de   : > { %v1154_v59 = vpop.permute.xlu1 %1153  ;;  %v1162_v55 = vpop.permute.xlu0 %1161 }
 0x1df   : > { %1133 = vst.msk [vmem:[#allocation2 + $0x8] sm:$0xff] %vm711_vm0, %v1132_v34  ;;  %v1156_v35 = vadd.f32 %v1154_v59, %v1148_v22  ;;  %v1675_v22 = vmul.f32 %v1674_v40, %v4202_v52 }
 0x1e0   : > { %2065 = vrot.lane.b32.xlu1 %v2063_v28, %s5872_s14  ;;  %1645 = vrot.lane.b32.xlu0 %v1643_v50, %s5872_s14  ;;  %v1690_v50 = vstv %s3454_s27  ;;  %s3459_s27 = sld [smem:[#allocation5 + $0xa0]] }
 0x1e1   : > { %v1164_v36 = vadd.f32 %v1162_v55, %v1156_v35  ;;  %v1683_v55 = vmul.f32 %v1682_v39, %v4225_v62  ;;  %v1722_v39 = vstv %s3458_s24  ;;  %s3467_s24 = sld [smem:[#allocation5 + $0xa3]] }
 0x1e2   : > { %v1170_v43 = vpop.permute.xlu1 %1169  ;;  %v1178_v44 = vpop.permute.xlu0 %1177 }
 0x1e3   : > { %v1172_v19 = vadd.f32 %v1170_v43, %v1164_v36  ;;  %v1691_v43 = vmul.f32 %v1690_v50, %v4215_v58  ;;  %v1358_v40 = vstv %s4850_s30  ;;  %v1723_v50 = vmul.f32 %v1722_v39, %v4248_v8  ;;  %s4872_s30 = sld [smem:[#allocation5 + $0xcb]] }
 0x1e4   : > { %921 = vrot.lane.b32.xlu0 %v919_v12, %s5806_s19 }
 0x1e5   : > { %v1180_v18 = vadd.f32 %v1178_v44, %v1172_v19  ;;  %v1698_v19 = vstv %s3455_s20  ;;  %s3505_s20 = sld [smem:[#allocation5 + $0xca]] }
 0x1e6   : > { %v1186_v37 = vpop.permute.xlu1 %1185  ;;  %v1194_v48 = vpop.permute.xlu0 %1193 }
 0x1e7   : > { %v1188_v49 = vadd.f32 %v1186_v37, %v1180_v18 }
 0x1e8   : > { %1653 = vrot.lane.b32.xlu0 %v1651_v41, %s5872_s14  ;;  %v1699_v41 = vmul.f32 %v1698_v19, %v4234_v2 }
 0x1e9   : > { %v1196_v13 = vadd.f32 %v1194_v48, %v1188_v49 }
 0x1ea   : > { %v1202_v6 = vpop.permute.xlu1 %1201  ;;  %v1210_v54 = vpop.permute.xlu0 %1209 }
 0x1eb   : > { %v1204_v63 = vadd.f32 %v1202_v6, %v1196_v13  ;;  %v1351_v13 = vmul.f32 %v1350_v45, %v4347_v1  ;;  %v1347_v6 = vstv %s4845_s25  ;;  %s3461_s25 = sld [smem:[#allocation5 + $0x98]] }
 0x1ec   : > { %1661 = vrot.lane.b32.xlu0 %v1659_v57, %s5872_s14 }
 0x1ed   : > { %v1212_v0 = vadd.f32 %v1210_v54, %v1204_v63  ;;  %v1354_v54 = vstv %s3409_s28  ;;  %s4866_s28 = sld [smem:[#allocation5 + $0xc2]] }
 0x1ee   : > { %v1218_v4 = vpop.permute.xlu1 %1217  ;;  %v1226_v5 = vpop.permute.xlu0 %1225 }
 0x1ef   : > { %v1220_v60 = vadd.f32 %v1218_v4, %v1212_v0  ;;  %v1707_v0 = vmul.f32 %v1706_v53, %v4237_v3 }
 0x1f0   : > { %1669 = vrot.lane.b32.xlu0 %v1667_v56, %s5873_s16  ;;  %v1352_v56 = vadd.f32 %v1351_v13, %v1347_v6 }
 0x1f1   : > { %v1228_v61 = vadd.f32 %v1226_v5, %v1220_v60  ;;  %v1714_v5 = vstv %s3457_s17  ;;  %v1355_v60 = vmul.f32 %v1354_v54, %v4360_v9  ;;  %s3462_s17 = sld [smem:[#allocation5 + $0xa1]]  ;;  %v2078_v54 = vstv %s3506_s1 }
 0x1f2   : > { %v1234_v29 = vpop.permute.xlu1 %1233  ;;  %v1242_v21 = vpop.permute.xlu0 %1241  ;;  %s3471_s1 = sld [smem:[#allocation5 + $0xad]] }
 0x1f3   : > { %v1236_v23 = vadd.f32 %v1234_v29, %v1228_v61 }
 0x1f4   : > { %1677 = vrot.lane.b32.xlu0 %v1675_v22, %s5873_s16  ;;  %v1715_v22 = vmul.f32 %v1714_v5, %v4245_v7 }
 0x1f5   : > { %v1244_v34 = vadd.f32 %v1242_v21, %v1236_v23 }
 0x1f6   : > { %v1250_v14 = vpop.permute.xlu1 %1249  ;;  %v1258_v59 = vpop.permute.xlu0 %1257 }
 0x1f7   : > { %v1252_v28 = vadd.f32 %v1250_v14, %v1244_v34  ;;  %v1356_v34 = vadd.f32 %v1355_v60, %v1352_v56  ;;  %v1359_v14 = vmul.f32 %v1358_v40, %v4372_v10  ;;  %v2086_v60 = vstv %s4866_s28  ;;  %s3473_s28 = sld [smem:[#allocation5 + $0xa5]] }
 0x1f8   : > { %1685 = vrot.lane.b32.xlu0 %v1683_v55, %s5873_s16 }
 0x1f9   : > { %v1260_v35 = vadd.f32 %v1258_v59, %v1252_v28 }
 0x1fa   : > { %v1266_v36 = vpop.permute.xlu1 %1265  ;;  %v1274_v12 = vpop.permute.xlu0 %1273 }
 0x1fb   : > { %v1268_v44 = vadd.f32 %v1266_v36, %v1260_v35  ;;  %v1360_v36 = vadd.f32 %v1359_v14, %v1356_v34  ;;  %v2094_v34 = vstv %s4872_s30  ;;  %s3475_s30 = sld [smem:[#allocation5 + $0xb7]] }
 0x1fc   : > { %1693 = vrot.lane.b32.xlu0 %v1691_v43, %s5870_s26 }
 0x1fd   : > { %v1276_v18 = vadd.f32 %v1274_v12, %v1268_v44  ;;  %v1730_v12 = vstv %s3459_s27  ;;  %s4879_s27 = sld [smem:[#allocation5 + $0xd4]] }
 0x1fe   : > { %v1282_v37 = vpop.permute.xlu1 %1281  ;;  %v1290_v48 = vpop.permute.xlu0 %1289  ;;  %v1731_v45 = vmul.f32 %v1730_v12, %v4263_v27 }
 0x1ff   : > { %v1284_v49 = vadd.f32 %v1282_v37, %v1276_v18  ;;  %v2070_v18 = vstv %s3505_s20  ;;  %s3469_s20 = sld [smem:[#allocation5 + $0xb5]] }
 0x200   : > { %1701 = vrot.lane.b32.xlu0 %v1699_v41, %s5870_s26 }
 0x201   : > { %v1292_v57 = vadd.f32 %v1290_v48, %v1284_v49  ;;  %v1738_v48 = vstv %s3460_s11  ;;  %v2071_v49 = vmul.f32 %v2070_v18, %v4186_v46  ;;  %s4886_s11 = sld [smem:[#allocation5 + $0xc3]] }
 0x202   : > { %v1298_v63 = vpop.permute.xlu1 %1297  ;;  %v1306_v11 = vpop.permute.xlu0 %1305  ;;  %v1739_v6 = vmul.f32 %v1738_v48, %v4257_v20 }
 0x203   : > { %v1300_v4 = vadd.f32 %v1298_v63, %v1292_v57  ;;  %v1746_v63 = vstv %s3461_s25  ;;  %v2102_v12 = vstv %s4879_s27  ;;  %s4893_s25 = sld [smem:[#allocation5 + $0xcc]] }
 0x204   : > { %1709 = vrot.lane.b32.xlu0 %v1707_v0, %s5870_s26  ;;  %v2079_v0 = vmul.f32 %v2078_v54, %v4189_v47  ;;  %v1747_v56 = vmul.f32 %v1746_v63, %v4269_v30  ;;  %s3477_s27 = sld [smem:[#allocation5 + $0xaf]] }
 0x205   : > { %v1308_v61 = vadd.f32 %v1306_v11, %v1300_v4 }
 0x206   : > { %v1314_v29 = vpop.permute.xlu1 %1313  ;;  %v1322_v21 = vpop.permute.xlu0 %1321 }
 0x207   : > { %v1316_v23 = vadd.f32 %v1314_v29, %v1308_v61  ;;  %v1754_v61 = vstv %s3462_s17  ;;  %s4900_s17 = sld [smem:[#allocation5 + $0xd5]] }
 0x208   : > { %1717 = vrot.lane.b32.xlu0 %v1715_v22, %s5874_s22  ;;  %v1755_v39 = vmul.f32 %v1754_v61, %v4272_v33 }
 0x209   : > { %v1324_v59 = vadd.f32 %v1322_v21, %v1316_v23  ;;  %v2087_v21 = vmul.f32 %v2086_v60, %v4199_v51  ;;  %v2118_v63 = vstv %s4893_s25  ;;  %s3481_s25 = sld [smem:[#allocation5 + $0xb9]] }
 0x20a   : > { %v1330_v55 = vpop.permute.xlu1 %1329  ;;  %v1338_v28 = vpop.permute.xlu0 %1337 }
 0x20b   : > { %v1332_v35 = vadd.f32 %v1330_v55, %v1324_v59  ;;  %v1782_v59 = vstv %s3467_s24  ;;  %s3513_s24 = sld [smem:[#allocation5 + $0xc4]] }
 0x20c   : > { %1725 = vrot.lane.b32.xlu0 %v1723_v50, %s5874_s22 }
 0x20d   : > { %v1340_v43 = vadd.f32 %v1338_v28, %v1332_v35  ;;  %v2095_v28 = vmul.f32 %v2094_v34, %v4202_v52  ;;  %v2126_v60 = vstv %s4900_s17  ;;  %s3427_s17 = sld [smem:[#allocation5 + $0x7b]] }
 0x20e   : > { %v1374_v44 = vpop.permute.xlu1 %1373  ;;  %v1366_v19 = vpop.permute.xlu0 %1365 }
 0x20f   : > { %v1368_v37 = vadd.f32 %v1366_v19, %v1360_v36  ;;  %1342 = vrot.lane.b32.xlu1 %v1340_v43, %s5806_s19  ;;  %v1783_v36 = vmul.f32 %v1782_v59, %v4115_v15  ;;  %s4969_s19 = sld [smem:[#allocation5 + $0x90]] }
 0x210   : > { %1733 = vrot.lane.b32.xlu0 %v1731_v45, %s5874_s22  ;;  %v2103_v45 = vmul.f32 %v2102_v12, %v4225_v62  ;;  %v1894_v12 = vstv %s3481_s25  ;;  %s3470_s25 = sld [smem:[#allocation5 + $0xa4]] }
 0x211   : > { %v1376_v41 = vadd.f32 %v1374_v44, %v1368_v37  ;;  %v1798_v44 = vstv %s3469_s20  ;;  %s3514_s20 = sld [smem:[#allocation5 + $0xcd]] }
 0x212   : > { %v1390_v53 = vpop.permute.xlu1 %1389  ;;  %v1382_v13 = vpop.permute.xlu0 %1381  ;;  %v1799_v48 = vmul.f32 %v1798_v44, %v4125_v17  ;;  %v1895_v44 = vmul.f32 %v1894_v12, %v4225_v62 }
 0x213   : > { %v1384_v57 = vadd.f32 %v1382_v13, %v1376_v41  ;;  %2073 = vrot.lane.b32.xlu1 %v2071_v49, %s5872_s14  ;;  %v2110_v41 = vstv %s4886_s11  ;;  %v1814_v49 = vstv %s3471_s1  ;;  %s3479_s11 = sld [smem:[#allocation5 + $0xa7]] }
 0x214   : > { %1741 = vrot.lane.b32.xlu0 %v1739_v6, %s5876_s2  ;;  %v2111_v13 = vmul.f32 %v2110_v41, %v4215_v58  ;;  %s3515_s1 = sld [smem:[#allocation5 + $0xd6]] }
 0x215   : > { %v1392_v11 = vadd.f32 %v1390_v53, %v1384_v57  ;;  %v1815_v57 = vmul.f32 %v1814_v49, %v4137_v25  ;;  %v1846_v25 = vstv %s3475_s30  ;;  %s3517_s30 = sld [smem:[#allocation5 + $0xce]] }
 0x216   : > { %v1406_v4 = vpop.permute.xlu1 %1405  ;;  %v1398_v5 = vpop.permute.xlu0 %1397 }
 0x217   : > { %v1400_v40 = vadd.f32 %v1398_v5, %v1392_v11  ;;  %2081 = vrot.lane.b32.xlu1 %v2079_v0, %s5872_s14  ;;  %v1830_v11 = vstv %s3473_s28  ;;  %s3516_s28 = sld [smem:[#allocation5 + $0xc5]] }
 0x218   : > { %1749 = vrot.lane.b32.xlu0 %v1747_v56, %s5876_s2  ;;  %v1831_v56 = vmul.f32 %v1830_v11, %v4151_v31  ;;  %v1862_v31 = vstv %s3477_s27  ;;  %s3518_s27 = sld [smem:[#allocation5 + $0xd7]] }
 0x219   : > { %v1408_v29 = vadd.f32 %v1406_v4, %v1400_v40  ;;  %v2119_v4 = vmul.f32 %v2118_v63, %v4234_v2  ;;  %v1863_v59 = vmul.f32 %v1862_v31, %v4186_v46 }
 0x21a   : > { %v1422_v22 = vpop.permute.xlu1 %1421  ;;  %v1414_v23 = vpop.permute.xlu0 %1413 }
 0x21b   : > { %v1416_v14 = vadd.f32 %v1414_v23, %v1408_v29  ;;  %2089 = vrot.lane.b32.xlu1 %v2087_v21, %s5873_s16  ;;  %v2127_v29 = vmul.f32 %v2126_v60, %v4237_v3  ;;  %v1847_v23 = vmul.f32 %v1846_v25, %v4177_v42 }
 0x21c   : > { %1757 = vrot.lane.b32.xlu0 %v1755_v39, %s5876_s2  ;;  %v2134_v39 = vstv %s3513_s24  ;;  %s3428_s24 = sld [smem:[#allocation5 + $0x84]] }
 0x21d   : > { %v1424_v55 = vadd.f32 %v1422_v22, %v1416_v14  ;;  %v2135_v34 = vmul.f32 %v2134_v39, %v4245_v7 }
 0x21e   : > { %v1438_v50 = vpop.permute.xlu1 %1437  ;;  %v1430_v35 = vpop.permute.xlu0 %1429 }
 0x21f   : > { %v1432_v43 = vadd.f32 %v1430_v35, %v1424_v55  ;;  %2097 = vrot.lane.b32.xlu1 %v2095_v28, %s5873_s16  ;;  %v2142_v55 = vstv %s3514_s20  ;;  %v1878_v28 = vstv %s3479_s11  ;;  %s3429_s20 = sld [smem:[#allocation5 + $0x73]] }
 0x220   : > { %1785 = vrot.lane.b32.xlu0 %v1783_v36, %s3868_s29  ;;  %v2143_v42 = vmul.f32 %v2142_v55, %v4248_v8  ;;  %v1879_v35 = vmul.f32 %v1878_v28, %v4199_v51  ;;  %v2150_v36 = vstv %s3515_s1  ;;  %s3468_s11 = sld [smem:[#allocation5 + $0xac]] }
 0x221   : > { %v1440_v19 = vadd.f32 %v1438_v50, %v1432_v43  ;;  %v2151_v46 = vmul.f32 %v2150_v36, %v4263_v27  ;;  %s3430_s1 = sld [smem:[#allocation5 + $0x7c]] }
 0x222   : > { %v1454_v18 = vpop.permute.xlu1 %1453  ;;  %v1446_v37 = vpop.permute.xlu0 %1445  ;;  %v1498_v41 = vstv %s3428_s24  ;;  %s3432_s24 = sld [smem:[#allocation5 + $0x74]] }
 0x223   : > { %v1448_v15 = vadd.f32 %v1446_v37, %v1440_v19  ;;  %2105 = vrot.lane.b32.xlu1 %v2103_v45, %s5873_s16  ;;  %v2158_v19 = vstv %s3516_s28  ;;  %v1490_v45 = vstv %s3427_s17  ;;  %v1499_v49 = vmul.f32 %v1498_v41, %v4237_v3  ;;  %s3431_s28 = sld [smem:[#allocation5 + $0x85]] }
 0x224   : > { %1801 = vrot.lane.b32.xlu0 %v1799_v48, %s3868_s29  ;;  %v2159_v51 = vmul.f32 %v2158_v19, %v4257_v20  ;;  %v1491_v37 = vmul.f32 %v1490_v45, %v4234_v2  ;;  %v2166_v48 = vstv %s3517_s30  ;;  %s4953_s17 = sld [smem:[#allocation5 + $0xb6]] }
 0x225   : > { %v1456_v53 = vadd.f32 %v1454_v18, %v1448_v15  ;;  %v2167_v62 = vmul.f32 %v2166_v48, %v4269_v30  ;;  %s4955_s30 = sld [smem:[#allocation5 + $0x87]] }
 0x226   : > { %v1470_v6 = vpop.permute.xlu1 %1469  ;;  %v1462_v54 = vpop.permute.xlu0 %1461  ;;  %v1790_v63 = vstv %s3468_s11  ;;  %s4975_s11 = sld [smem:[#allocation5 + $0x7d]] }
 0x227   : > { %v1464_v17 = vadd.f32 %v1462_v54, %v1456_v53  ;;  %2113 = vrot.lane.b32.xlu1 %v2111_v13, %s5870_s26  ;;  %v2174_v53 = vstv %s3518_s27  ;;  %v1506_v13 = vstv %s3429_s20  ;;  %v1514_v11 = vstv %s3430_s1  ;;  %s4964_s27 = sld [smem:[#allocation5 + $0xae]] }
 0x228   : > { %1817 = vrot.lane.b32.xlu0 %v1815_v57, %s5875_s0  ;;  %v1507_v57 = vmul.f32 %v1506_v13, %v4245_v7  ;;  %s4966_s20 = sld [smem:[#allocation8 + $0x5]]  ;;  %v1530_v39 = vstv %s3432_s24 }
 0x229   : > { %v1472_v0 = vadd.f32 %v1470_v6, %v1464_v17  ;;  %v2175_v6 = vmul.f32 %v2174_v53, %v4272_v33  ;;  %v1522_v60 = vstv %s3431_s28  ;;  %s4981_s1 = sld [smem:[#allocation5 + $0xa6]]  ;;  %v1531_v28 = vmul.f32 %v1530_v39, %v4257_v20 }
 0x22a   : > { %v1478_v5 = vpop.permute.xlu0 %1477  ;;  %v1486_v61 = vpop.permute.xlu1 %1485  ;;  %s3487_s28 = sld [smem:[#allocation5 + $0xbb]] }
 0x22b   : > { %v1480_v40 = vadd.f32 %v1478_v5, %v1472_v0  ;;  %2121 = vrot.lane.b32.xlu1 %v2119_v4, %s5870_s26  ;;  %v1791_v0 = vmul.f32 %v1790_v63, %v4118_v16  ;;  %v1515_v5 = vmul.f32 %v1514_v11, %v4248_v8  ;;  %v1558_v25 = vstv %s4955_s30  ;;  %s3488_s30 = sld [smem:[#allocation5 + $0xaa]] }
 0x22c   : > { %1833 = vrot.lane.b32.xlu0 %v1831_v56, %s5871_s23  ;;  %v1806_v56 = vstv %s3470_s25  ;;  %s3478_s25 = sld [smem:[#allocation5 + $0xb8]]  ;;  %v1538_v36 = vstv %s4975_s11 }
 0x22d   : > { %v4915_v21 = vadd.f32 %v1486_v61, %v1480_v40  ;;  %v1807_v16 = vmul.f32 %v1806_v56, %v4130_v24  ;;  %v1559_v24 = vmul.f32 %v1558_v25, %v4347_v1  ;;  %v1539_v45 = vmul.f32 %v1538_v36, %v4269_v30  ;;  %s3491_s24 = sld [smem:[#allocation8 + $0x7]] }
 0x22e   : > { %v4917_v22 = vpop.permute.xlu0 %1573  ;;  %v4960_v17 = vpop.permute.xlu1 %1993  ;;  %s3490_s11 = sld [smem:[#allocation5 + $0xbc]] }
 0x22f   : > { %2129 = vrot.lane.b32.xlu1 %v2127_v29, %s5870_s26  ;;  %v1523_v29 = vmul.f32 %v1522_v60, %v4263_v27 }
 0x230   : > { %1849 = vrot.lane.b32.xlu0 %v1847_v23, %s5871_s23  ;;  %v1822_v23 = vstv %s4953_s17  ;;  %s3492_s17 = sld [smem:[#allocation5 + $0xbd]] }
 0x231   : > { %v1823_v31 = vmul.f32 %v1822_v23, %v4140_v26 }
 0x232   : > { %v4923_v14 = vpop.permute.xlu0 %1581  ;;  %v4978_v40 = vpop.permute.xlu1 %2001  ;;  %v1870_v13 = vstv %s3478_s25  ;;  %s3466_s25 = sld [smem:[#allocation5 + $0xb4]] }
 0x233   : > { %2137 = vrot.lane.b32.xlu1 %v2135_v34, %s5874_s22  ;;  %v1555_v34 = vstv %s4966_s20  ;;  %s3494_s20 = sld [smem:[#allocation5 + $0xcf]] }
 0x234   : > { %1865 = vrot.lane.b32.xlu0 %v1863_v59, %s5872_s14  ;;  %v1562_v59 = vstv %s4969_s19  ;;  %v1560_v12 = vadd.f32 %v1559_v24, %v1555_v34  ;;  %s3480_s19 = sld [smem:[#allocation5 + $0xb0]] }
 0x235   : > { %v1563_v26 = vmul.f32 %v1562_v59, %v4360_v9 }
 0x236   : > { %v4929_v50 = vpop.permute.xlu0 %1589 }
 0x237   : > { %2145 = vrot.lane.b32.xlu1 %v2143_v42, %s5874_s22  ;;  %v1838_v42 = vstv %s4964_s27  ;;  %v1564_v48 = vadd.f32 %v1563_v26, %v1560_v12  ;;  %s3493_s27 = sld [smem:[#allocation5 + $0xc6]] }
 0x238   : > { %1881 = vrot.lane.b32.xlu0 %v1879_v35, %s5873_s16  ;;  %v5002_v35 = vpop.permute.xlu1 %2009 }
 0x23a   : > { %v4935_v43 = vpop.permute.xlu0 %1597  ;;  %v1886_v11 = vstv %s3480_s19 }
 0x23b   : > { %2153 = vrot.lane.b32.xlu1 %v2151_v46, %s5874_s22  ;;  %v1839_v46 = vmul.f32 %v1838_v42, %v4154_v32 }
 0x23c   : > { %1897 = vrot.lane.b32.xlu0 %v1895_v44, %s5873_s16  ;;  %v1566_v44 = vstv %s4984_s3  ;;  %s3483_s3 = sld [smem:[#allocation5 + $0xb1]] }
 0x23d   : > { %v1567_v41 = vmul.f32 %v1566_v44, %v4372_v10 }
 0x23e   : > { %v4941_v18 = vpop.permute.xlu0 %1605 }
 0x23f   : > { %2161 = vrot.lane.b32.xlu1 %v2159_v51, %s5876_s2  ;;  %v1854_v51 = vstv %s4981_s1  ;;  %s3463_s1 = sld [smem:[#allocation8 + $0x6]] }
 0x240   : > { %1493 = vrot.lane.b32.xlu0 %v1491_v37, %s5870_s26  ;;  %v1855_v32 = vmul.f32 %v1854_v51, %v4167_v38  ;;  %v1950_v51 = vstv %s3488_s30 }
 0x242   : > { %v4947_v15 = vpop.permute.xlu0 %1613  ;;  %v1910_v39 = vstv %s3483_s3 }
 0x243   : > { %2169 = vrot.lane.b32.xlu1 %v2167_v62, %s5876_s2  ;;  %v5017_v62 = vpop.permute.xlu1 %2017  ;;  %v1911_v24 = vmul.f32 %v1910_v39, %v4234_v2 }
 0x244   : > { %1501 = vrot.lane.b32.xlu0 %v1499_v49, %s5870_s26 }
 0x246   : > { %v4957_v54 = vpop.permute.xlu0 %1621 }
 0x247   : > { %2177 = vrot.lane.b32.xlu1 %v2175_v6, %s5876_s2  ;;  %v1568_v6 = vadd.f32 %v1567_v41, %v1564_v48  ;;  %v1975_v48 = vstv %s3491_s24  ;;  %v1982_v41 = vstv %s3493_s27 }
 0x248   : > { %1509 = vrot.lane.b32.xlu0 %v1507_v57, %s5874_s22  ;;  %v1871_v57 = vmul.f32 %v1870_v13, %v4189_v47 }
 0x249   : > { %v1576_v38 = vadd.f32 %v4917_v22, %v1568_v6 }
 0x24a   : > { %v4971_v4 = vpop.permute.xlu0 %1629 }
 0x24b   : > { %1793 = vrot.lane.b32.xlu1 %v1791_v0, %s3868_s29  ;;  %s4991_s29 = sld [smem:[#allocation5 + $0x86]]  ;;  %v5024_v0 = vpop.permute.xlu1 %2025 }
 0x24c   : > { %1517 = vrot.lane.b32.xlu0 %v1515_v5, %s5874_s22  ;;  %v1887_v5 = vmul.f32 %v1886_v11, %v4202_v52  ;;  %v1986_v11 = vstv %s3494_s20 }
 0x24e   : > { %v4986_v61 = vpop.permute.xlu0 %1637 }
 0x24f   : > { %1809 = vrot.lane.b32.xlu1 %v1807_v16, %s5875_s0  ;;  %v1584_v16 = vadd.f32 %v4923_v14, %v1576_v38  ;;  %v5032_v25 = vpop.permute.xlu1 %2033 }
 0x250   : > { %1525 = vrot.lane.b32.xlu0 %v1523_v29, %s5874_s22 }
 0x251   : > { %v1546_v37 = vstv %s4991_s29  ;;  %v1592_v47 = vadd.f32 %v4929_v50, %v1584_v16  ;;  %v1966_v16 = vstv %s3490_s11  ;;  %s3465_s29 = sld [smem:[#allocation5 + $0xab]] }
 0x252   : > { %v4998_v55 = vpop.permute.xlu0 %1645  ;;  %v1547_v53 = vmul.f32 %v1546_v37, %v4272_v33 }
 0x253   : > { %1825 = vrot.lane.b32.xlu1 %v1823_v31, %s5875_s0  ;;  %s3482_s0 = sld [smem:[#allocation5 + $0xa8]]  ;;  %v1600_v22 = vadd.f32 %v4935_v43, %v1592_v47  ;;  %v5040_v34 = vpop.permute.xlu1 %2041 }
 0x254   : > { %1533 = vrot.lane.b32.xlu0 %v1531_v28, %s5876_s2 }
 0x255   : > { %v1608_v52 = vadd.f32 %v4941_v18, %v1600_v22  ;;  %v1967_v22 = vmul.f32 %v1966_v16, %v4272_v33 }
 0x256   : > { %v922_v19 = vpop.permute.xlu0 %921 }
 0x257   : > { %925 = vst.msk [vmem:[#allocation2] sm:$0xff] %vm924_vm1, %v922_v19  ;;  %1841 = vrot.lane.b32.xlu1 %v1839_v46, %s5871_s23  ;;  %s3484_s23 = sld [smem:[#allocation5 + $0xba]]  ;;  %v1616_v50 = vadd.f32 %v4947_v15, %v1608_v52  ;;  %v5047_v2 = vpop.permute.xlu1 %2049  ;;  %v1942_v46 = vstv %s3487_s28 }
 0x258   : > { %1541 = vrot.lane.b32.xlu0 %v1539_v45, %s5876_s2 }
 0x259   : > { %v1902_v60 = vstv %s3482_s0 }
 0x25a   : > { %v1654_v49 = vpop.permute.xlu0 %1653  ;;  %v1903_v29 = vmul.f32 %v1902_v60, %v4215_v58  ;;  %v1624_v58 = vadd.f32 %v4957_v54, %v1616_v50 }
 0x25b   : > { %1857 = vrot.lane.b32.xlu1 %v1855_v32, %s5872_s14  ;;  %v5054_v44 = vpop.permute.xlu1 %2057 }
 0x25c   : > { %1549 = vrot.lane.b32.xlu0 %v1547_v53, %s5876_s2  ;;  %v1632_v18 = vadd.f32 %v4971_v4, %v1624_v58  ;;  %v1951_v53 = vmul.f32 %v1950_v51, %v4257_v20 }
 0x25d   : > { %v1918_v31 = vstv %s3484_s23 }
 0x25e   : > { %v1662_v63 = vpop.permute.xlu0 %1661  ;;  %v1919_v59 = vmul.f32 %v1918_v31, %v4237_v3  ;;  %v1640_v15 = vadd.f32 %v4986_v61, %v1632_v18 }
 0x25f   : > { %1873 = vrot.lane.b32.xlu1 %v1871_v57, %s5872_s14  ;;  %s3485_s14 = sld [smem:[#allocation5 + $0xa9]]  ;;  %v2066_v32 = vpop.permute.xlu1 %2065 }
 0x260   : > { %v1648_v54 = vadd.f32 %v4998_v55, %v1640_v15  ;;  %v1943_v55 = vmul.f32 %v1942_v46, %v4263_v27 }
 0x262   : > { %v1670_v56 = vpop.permute.xlu0 %1669  ;;  %v1656_v3 = vadd.f32 %v1654_v49, %v1648_v54 }
 0x263   : > { %1889 = vrot.lane.b32.xlu1 %v1887_v5, %s5873_s16  ;;  %s3486_s16 = sld [smem:[#allocation5 + $0xb2]] }
 0x264   : > { %v1664_v61 = vadd.f32 %v1662_v63, %v1656_v3  ;;  %v1983_v63 = vmul.f32 %v1982_v41, %v4360_v9 }
 0x265   : > { %v1926_v28 = vstv %s3485_s14 }
 0x266   : > { %v1678_v23 = vpop.permute.xlu0 %1677  ;;  %v1927_v42 = vmul.f32 %v1926_v28, %v4245_v7  ;;  %v1978_v7 = vstv %s3492_s17  ;;  %v1672_v19 = vadd.f32 %v1670_v56, %v1664_v61 }
 0x267   : > { %1905 = vrot.lane.b32.xlu1 %v1903_v29, %s5870_s26  ;;  %v1987_v29 = vmul.f32 %v1986_v11, %v4372_v10 }
 0x268   : > { %v1680_v37 = vadd.f32 %v1678_v23, %v1672_v19 }
 0x269   : > { %v1934_v12 = vstv %s3486_s16 }
 0x26a   : > { %v1686_v14 = vpop.permute.xlu0 %1685  ;;  %v1935_v4 = vmul.f32 %v1934_v12, %v4248_v8  ;;  %v1979_v8 = vmul.f32 %v1978_v7, %v4347_v1 }
 0x26b   : > { %1913 = vrot.lane.b32.xlu1 %v1911_v24, %s5870_s26  ;;  %v1688_v49 = vadd.f32 %v1686_v14, %v1680_v37 }
 0x26c   : > { %v1980_v27 = vadd.f32 %v1979_v8, %v1975_v48 }
 0x26e   : > { %v1694_v43 = vpop.permute.xlu0 %1693  ;;  %v1984_v20 = vadd.f32 %v1983_v63, %v1980_v27 }
 0x26f   : > { %1921 = vrot.lane.b32.xlu1 %v1919_v59, %s5870_s26  ;;  %s3489_s26 = sld [smem:[#allocation5 + $0xb3]]  ;;  %v1696_v57 = vadd.f32 %v1694_v43, %v1688_v49 }
 0x270   : > { %v1988_v14 = vadd.f32 %v1987_v29, %v1984_v20 }
 0x272   : > { %v1702_v36 = vpop.permute.xlu0 %1701  ;;  %v1996_v59 = vadd.f32 %v4960_v17, %v1988_v14 }
 0x273   : > { %1929 = vrot.lane.b32.xlu1 %v1927_v42, %s5874_s22  ;;  %v1704_v38 = vadd.f32 %v1702_v36, %v1696_v57  ;;  %v1774_v57 = vstv %s3465_s29 }
 0x274   : > { %v2004_v18 = vadd.f32 %v4978_v40, %v1996_v59 }
 0x275   : > { %v1958_v6 = vstv %s3489_s26 }
 0x276   : > { %v1710_v26 = vpop.permute.xlu0 %1709  ;;  %v1959_v56 = vmul.f32 %v1958_v6, %v4269_v30  ;;  %v2012_v36 = vadd.f32 %v5002_v35, %v2004_v18  ;;  %v1767_v6 = vstv %s3463_s1 }
 0x277   : > { %1937 = vrot.lane.b32.xlu1 %v1935_v4, %s5874_s22  ;;  %v1712_v47 = vadd.f32 %v1710_v26, %v1704_v38 }
 0x278   : > { %v2020_v12 = vadd.f32 %v5017_v62, %v2012_v36 }
 0x27a   : > { %v1718_v45 = vpop.permute.xlu0 %1717  ;;  %v2028_v3 = vadd.f32 %v5024_v0, %v2020_v12 }
 0x27b   : > { %1945 = vrot.lane.b32.xlu1 %v1943_v55, %s5874_s22  ;;  %v1720_v23 = vadd.f32 %v1718_v45, %v1712_v47  ;;  %s5877_s22 = smov 64  }
 0x27c   : > { %v2036_v26 = vadd.f32 %v5032_v25, %v2028_v3 }
 0x27e   : > { %v1726_v13 = vpop.permute.xlu0 %1725  ;;  %v2044_v46 = vadd.f32 %v5040_v34, %v2036_v26 }
 0x27f   : > { %1953 = vrot.lane.b32.xlu1 %v1951_v53, %s5876_s2  ;;  %v1728_v24 = vadd.f32 %v1726_v13, %v1720_v23 }
 0x280   : > { %v2052_v40 = vadd.f32 %v5047_v2, %v2044_v46 }
 0x281   : > { %v1343_v5 = vpop.permute.xlu1 %1342 }
 0x282   : > { %1345 = vst.msk [vmem:[#allocation2 + $0x8] sm:$0xff] %vm924_vm1, %v1343_v5  ;;  %v1734_v60 = vpop.permute.xlu0 %1733  ;;  %v2060_v35 = vadd.f32 %v5054_v44, %v2052_v40  ;;  %v1775_v5 = vmul.f32 %v1774_v57, %v4360_v9 }
 0x283   : > { %1961 = vrot.lane.b32.xlu1 %v1959_v56, %s5876_s2  ;;  %v1736_v30 = vadd.f32 %v1734_v60, %v1728_v24  ;;  %v1778_v60 = vstv %s3466_s25 }
 0x284   : > { %v2068_v55 = vadd.f32 %v2066_v32, %v2060_v35  ;;  %v1779_v23 = vmul.f32 %v1778_v60, %v4372_v10 }
 0x285   : > { %v2074_v39 = vpop.permute.xlu1 %2073 }
 0x286   : > { %v1742_v52 = vpop.permute.xlu0 %1741  ;;  %v2076_v51 = vadd.f32 %v2074_v39, %v2068_v55 }
 0x287   : > { %1969 = vrot.lane.b32.xlu1 %v1967_v22, %s5876_s2  ;;  %v1744_v58 = vadd.f32 %v1742_v52, %v1736_v30  ;;  %s3464_s2 = sld [smem:[#allocation5 + $0xa2]] }
 0x289   : > { %v2082_v31 = vpop.permute.xlu1 %2081 }
 0x28a   : > { %v1750_v50 = vpop.permute.xlu0 %1749  ;;  %v2084_v37 = vadd.f32 %v2082_v31, %v2076_v51 }
 0x28b   : > { %v1752_v43 = vadd.f32 %v1750_v50, %v1744_v58 }
 0x28d   : > { %v2090_v28 = vpop.permute.xlu1 %2089  ;;  %v1770_v41 = vstv %s3464_s2 }
 0x28e   : > { %v1758_v15 = vpop.permute.xlu0 %1757  ;;  %v2092_v8 = vadd.f32 %v2090_v28, %v2084_v37  ;;  %v1771_v53 = vmul.f32 %v1770_v41, %v4347_v1 }
 0x28f   : > { %v1760_v42 = vadd.f32 %v1758_v15, %v1752_v43 }
 0x290   : > { %v1772_v38 = vadd.f32 %v1771_v53, %v1767_v6 }
 0x291   : > { %v2098_v33 = vpop.permute.xlu1 %2097  ;;  %1762 = vrot.lane.b32.xlu0 %v1760_v42, %s5877_s22 }
 0x292   : > { %v1786_v54 = vpop.permute.xlu0 %1785  ;;  %v2100_v34 = vadd.f32 %v2098_v33, %v2092_v8  ;;  %v1776_v29 = vadd.f32 %v1775_v5, %v1772_v38 }
 0x294   : > { %v1780_v24 = vadd.f32 %v1779_v23, %v1776_v29 }
 0x295   : > { %v2106_v4 = vpop.permute.xlu1 %2105 }
 0x296   : > { %v1802_v17 = vpop.permute.xlu0 %1801  ;;  %v2108_v2 = vadd.f32 %v2106_v4, %v2100_v34  ;;  %v1788_v58 = vadd.f32 %v1786_v54, %v1780_v24 }
 0x299   : > { %v2114_v61 = vpop.permute.xlu1 %2113 }
 0x29a   : > { %v1818_v7 = vpop.permute.xlu0 %1817  ;;  %v2116_v49 = vadd.f32 %v2114_v61, %v2108_v2 }
 0x29d   : > { %v2122_v19 = vpop.permute.xlu1 %2121 }
 0x29e   : > { %v1834_v45 = vpop.permute.xlu0 %1833  ;;  %v2124_v13 = vadd.f32 %v2122_v19, %v2116_v49 }
 0x2a1   : > { %v2130_v62 = vpop.permute.xlu1 %2129 }
 0x2a2   : > { %v5079_v0 = vpop.permute.xlu0 %1849  ;;  %v2132_v63 = vadd.f32 %v2130_v62, %v2124_v13 }
 0x2a5   : > { %v2138_v25 = vpop.permute.xlu1 %2137 }
 0x2a6   : > { %v5081_v48 = vpop.permute.xlu0 %1865  ;;  %v2140_v56 = vadd.f32 %v2138_v25, %v2132_v63 }
 0x2a9   : > { %v2146_v44 = vpop.permute.xlu1 %2145 }
 0x2aa   : > { %v1882_v32 = vpop.permute.xlu0 %1881  ;;  %v2148_v47 = vadd.f32 %v2146_v44, %v2140_v56 }
 0x2ad   : > { %v2154_v27 = vpop.permute.xlu1 %2153 }
 0x2ae   : > { %v1898_v11 = vpop.permute.xlu0 %1897  ;;  %v2156_v39 = vadd.f32 %v2154_v27, %v2148_v47 }
 0x2b1   : > { %v2162_v16 = vpop.permute.xlu1 %2161 }
 0x2b2   : > { %v1494_v20 = vpop.permute.xlu0 %1493  ;;  %v2164_v1 = vadd.f32 %v2162_v16, %v2156_v39 }
 0x2b3   : > { %v1496_v18 = vadd.f32 %v1494_v20, %v4915_v21 }
 0x2b5   : > { %v2170_v22 = vpop.permute.xlu1 %2169 }
 0x2b6   : > { %v1502_v52 = vpop.permute.xlu0 %1501  ;;  %v2172_v14 = vadd.f32 %v2170_v22, %v2164_v1 }
 0x2b7   : > { %v1504_v36 = vadd.f32 %v1502_v52, %v1496_v18 }
 0x2b9   : > { %v2178_v30 = vpop.permute.xlu1 %2177 }
 0x2ba   : > { %v2180_v31 = vadd.f32 %v2178_v30, %v2172_v14  ;;  %v1510_v50 = vpop.permute.xlu0 %1509 }
 0x2bb   : > { %v1512_v12 = vadd.f32 %v1510_v50, %v1504_v36 }
 0x2bc   : > { %2182 = vrot.lane.b32.xlu1 %v2180_v31, %s5877_s22 }
 0x2bd   : > { %v1794_v9 = vpop.permute.xlu1 %1793 }
 0x2be   : > { %v1796_v59 = vadd.f32 %v1794_v9, %v1788_v58  ;;  %v1518_v43 = vpop.permute.xlu0 %1517 }
 0x2bf   : > { %v1520_v46 = vadd.f32 %v1518_v43, %v1512_v12 }
 0x2c0   : > { %v1804_v28 = vadd.f32 %v1802_v17, %v1796_v59 }
 0x2c1   : > { %v1810_v15 = vpop.permute.xlu1 %1809 }
 0x2c2   : > { %v1812_v10 = vadd.f32 %v1810_v15, %v1804_v28  ;;  %v1526_v42 = vpop.permute.xlu0 %1525 }
 0x2c3   : > { %v1528_v54 = vadd.f32 %v1526_v42, %v1520_v46 }
 0x2c4   : > { %v1820_v33 = vadd.f32 %v1818_v7, %v1812_v10 }
 0x2c5   : > { %v1826_v3 = vpop.permute.xlu1 %1825 }
 0x2c6   : > { %v1828_v4 = vadd.f32 %v1826_v3, %v1820_v33  ;;  %v1534_v26 = vpop.permute.xlu0 %1533 }
 0x2c7   : > { %v1536_v55 = vadd.f32 %v1534_v26, %v1528_v54 }
 0x2c8   : > { %v1836_v61 = vadd.f32 %v1834_v45, %v1828_v4 }
 0x2c9   : > { %v1842_v40 = vpop.permute.xlu1 %1841 }
 0x2ca   : > { %v1844_v35 = vadd.f32 %v1842_v40, %v1836_v61  ;;  %v1542_v19 = vpop.permute.xlu0 %1541 }
 0x2cb   : > { %v1544_v51 = vadd.f32 %v1542_v19, %v1536_v55 }
 0x2cc   : > { %v1852_v21 = vadd.f32 %v5079_v0, %v1844_v35 }
 0x2cd   : > { %v1858_v17 = vpop.permute.xlu1 %1857 }
 0x2ce   : > { %v1550_v62 = vpop.permute.xlu0 %1549  ;;  %v1860_v8 = vadd.f32 %v1858_v17, %v1852_v21 }
 0x2cf   : > { %v1552_v37 = vadd.f32 %v1550_v62, %v1544_v51 }
 0x2d0   : > { %v1868_v34 = vadd.f32 %v5081_v48, %v1860_v8 }
 0x2d1   : > { %1553 = vst.msk [vmem:[#allocation2 + $0x10] sm:$0xff] %vm711_vm0, %v1552_v37  ;;  %v1874_v7 = vpop.permute.xlu1 %1873 }
 0x2d2   : > { %v1876_v45 = vadd.f32 %v1874_v7, %v1868_v34 }
 0x2d4   : > { %v1884_v44 = vadd.f32 %v1882_v32, %v1876_v45 }
 0x2d5   : > { %v1890_v25 = vpop.permute.xlu1 %1889 }
 0x2d6   : > { %v1892_v53 = vadd.f32 %v1890_v25, %v1884_v44 }
 0x2d8   : > { %v1900_v6 = vadd.f32 %v1898_v11, %v1892_v53 }
 0x2d9   : > { %v1906_v2 = vpop.permute.xlu1 %1905 }
 0x2da   : > { %v1908_v27 = vadd.f32 %v1906_v2, %v1900_v6 }
 0x2dd   : > { %v1914_v41 = vpop.permute.xlu1 %1913 }
 0x2de   : > { %v1916_v0 = vadd.f32 %v1914_v41, %v1908_v27 }
 0x2e1   : > { %v1922_v49 = vpop.permute.xlu1 %1921 }
 0x2e2   : > { %v1924_v38 = vadd.f32 %v1922_v49, %v1916_v0 }
 0x2e5   : > { %v1930_v13 = vpop.permute.xlu1 %1929 }
 0x2e6   : > { %v1932_v5 = vadd.f32 %v1930_v13, %v1924_v38 }
 0x2e9   : > { %v1938_v57 = vpop.permute.xlu1 %1937 }
 0x2ea   : > { %v1940_v60 = vadd.f32 %v1938_v57, %v1932_v5 }
 0x2ed   : > { %v1946_v63 = vpop.permute.xlu1 %1945 }
 0x2ee   : > { %v1948_v16 = vadd.f32 %v1946_v63, %v1940_v60 }
 0x2f1   : > { %v1954_v56 = vpop.permute.xlu1 %1953 }
 0x2f2   : > { %v1956_v20 = vadd.f32 %v1954_v56, %v1948_v16 }
 0x2f5   : > { %v1962_v47 = vpop.permute.xlu1 %1961 }
 0x2f6   : > { %v1964_v48 = vadd.f32 %v1962_v47, %v1956_v20 }
 0x2f9   : > { %v1970_v29 = vpop.permute.xlu1 %1969 }
 0x2fa   : > { %v1972_v23 = vadd.f32 %v1970_v29, %v1964_v48 }
 0x2fc   : > { %1973 = vst.msk [vmem:[#allocation2 + $0x18] sm:$0xff] %vm711_vm0, %v1972_v23 }
 0x303   : > { %v1763_v32 = vpop.permute.xlu0 %1762 }
 0x304   : > { %1765 = vst.msk [vmem:[#allocation2 + $0x10] sm:$0xff] %vm924_vm1, %v1763_v32 }
 0x32e   : > { %v2183_v11 = vpop.permute.xlu1 %2182 }
 0x32f   : > { %2185 = vst.msk [vmem:[#allocation2 + $0x18] sm:$0xff] %vm924_vm1, %v2183_v11 }
 0x330 PF: > { %v2221_v39 = vld [vmem:[%s4055_s10 + $0xf8] sm:$0xff]  ;;  %v2220_v24 = vld [vmem:[%s4055_s10 + $0xf0] sm:$0xff]  ;;  %v2219_v50 = vld [vmem:[%s4055_s10 + $0xe8] sm:$0xff]  ;;  %s5878_s3 = scalar_lea.vmem %s5783_s5, %s4063_s21  ;;  %p3521_p4 = scmp.ne.s32.totalorder %s3950_s8, 3 }
 0x331   : > { %v2253_v22 = vld [vmem:[%s4055_s10 + $0x1f8] sm:$0xff]  ;;  %3539 = vmatprep.subr.mxu0 %v2221_v39  ;;  %v2252_v14 = vld [vmem:[%s4055_s10 + $0x1f0] sm:$0xff]  ;;  %v2251_v58 = vld [vmem:[%s4055_s10 + $0x1e8] sm:$0xff] }
 0x332   : > { %v2205_v1 = vld [vmem:[%s4055_s10 + $0x78] sm:$0xff]  ;;  %3574 = vmatprep.subr.mxu1 %v2253_v22  ;;  %v2204_v30 = vld [vmem:[%s4055_s10 + $0x70] sm:$0xff]  ;;  %v2203_v9 = vld [vmem:[%s4055_s10 + $0x68] sm:$0xff] }
 0x333   : > { %v2237_v52 = vld [vmem:[%s4055_s10 + $0x178] sm:$0xff]  ;;  %3540 = vmatpush3.msra.mxu0 %v2205_v1  ;;  %v2236_v31 = vld [vmem:[%s4055_s10 + $0x170] sm:$0xff]  ;;  %v2235_v59 = vld [vmem:[%s4055_s10 + $0x168] sm:$0xff] }
 0x334   : > { %3575 = vmatpush3.msra.mxu1 %v2237_v52  ;;  %3541 = vmatprep.subr.mxu0 %v2220_v24  ;;  %v2218_v43 = vld [vmem:[%s4055_s10 + $0xe0] sm:$0xff]  ;;  %v2217_v10 = vld [vmem:[%s4055_s10 + $0xd8] sm:$0xff]  ;;  %v2216_v12 = vld [vmem:[%s4055_s10 + $0xd0] sm:$0xff] }
 0x335   : > { %3576 = vmatprep.subr.mxu1 %v2252_v14  ;;  %3542 = vmatpush3.msra.mxu0 %v2204_v30  ;;  %v2250_v28 = vld [vmem:[%s4055_s10 + $0x1e0] sm:$0xff]  ;;  %v2249_v42 = vld [vmem:[%s4055_s10 + $0x1d8] sm:$0xff]  ;;  %v2248_v3 = vld [vmem:[%s4055_s10 + $0x1d0] sm:$0xff] }
 0x336   : > { %3577 = vmatpush3.msra.mxu1 %v2236_v31  ;;  %3543 = vmatprep.subr.mxu0 %v2219_v50  ;;  %v2202_v18 = vld [vmem:[%s4055_s10 + $0x60] sm:$0xff]  ;;  %v2201_v36 = vld [vmem:[%s4055_s10 + $0x58] sm:$0xff]  ;;  %v2200_v4 = vld [vmem:[%s4055_s10 + $0x50] sm:$0xff] }
 0x337   : > { %3578 = vmatprep.subr.mxu1 %v2251_v58  ;;  %v2234_v15 = vld [vmem:[%s4055_s10 + $0x160] sm:$0xff]  ;;  %3544 = vmatpush3.msra.mxu0 %v2203_v9  ;;  %v2233_v33 = vld [vmem:[%s4055_s10 + $0x158] sm:$0xff]  ;;  %v2232_v26 = vld [vmem:[%s4055_s10 + $0x150] sm:$0xff] }
 0x338   : > { %3579 = vmatpush3.msra.mxu1 %v2235_v59  ;;  %3545 = vmatprep.subr.mxu0 %v2218_v43  ;;  %v2215_v46 = vld [vmem:[%s4055_s10 + $0xc8] sm:$0xff]  ;;  %v2214_v35 = vld [vmem:[%s4055_s10 + $0xc0] sm:$0xff]  ;;  %v2213_v17 = vld [vmem:[%s4055_s10 + $0xb8] sm:$0xff] }
 0x339   : > { %3580 = vmatprep.subr.mxu1 %v2250_v28  ;;  %3546 = vmatpush3.msra.mxu0 %v2202_v18  ;;  %v2247_v61 = vld [vmem:[%s4055_s10 + $0x1c8] sm:$0xff]  ;;  %v2246_v19 = vld [vmem:[%s4055_s10 + $0x1c0] sm:$0xff]  ;;  %v2245_v21 = vld [vmem:[%s4055_s10 + $0x1b8] sm:$0xff] }
 0x33a   : > { %3581 = vmatpush3.msra.mxu1 %v2234_v15  ;;  %3547 = vmatprep.subr.mxu0 %v2217_v10  ;;  %v2199_v54 = vld [vmem:[%s4055_s10 + $0x48] sm:$0xff]  ;;  %v2198_v55 = vld [vmem:[%s4055_s10 + $0x40] sm:$0xff]  ;;  %v2197_v62 = vld [vmem:[%s4055_s10 + $0x38] sm:$0xff] }
 0x33b   : > { %3582 = vmatprep.subr.mxu1 %v2249_v42  ;;  %3548 = vmatpush3.msra.mxu0 %v2201_v36  ;;  %v2231_v40 = vld [vmem:[%s4055_s10 + $0x148] sm:$0xff]  ;;  %v2230_v51 = vld [vmem:[%s4055_s10 + $0x140] sm:$0xff]  ;;  %v2229_v37 = vld [vmem:[%s4055_s10 + $0x138] sm:$0xff] }
 0x33c   : > { %3583 = vmatpush3.msra.mxu1 %v2233_v33  ;;  %3549 = vmatprep.subr.mxu0 %v2216_v12  ;;  %v2212_v7 = vld [vmem:[%s4055_s10 + $0xb0] sm:$0xff]  ;;  %v2211_v2 = vld [vmem:[%s4055_s10 + $0xa8] sm:$0xff]  ;;  %v2210_v49 = vld [vmem:[%s4055_s10 + $0xa0] sm:$0xff] }
 0x33d   : > { %3584 = vmatprep.subr.mxu1 %v2248_v3  ;;  %3550 = vmatpush3.msra.mxu0 %v2200_v4  ;;  %v2244_v8 = vld [vmem:[%s4055_s10 + $0x1b0] sm:$0xff]  ;;  %v2243_v45 = vld [vmem:[%s4055_s10 + $0x1a8] sm:$0xff]  ;;  %v2242_v53 = vld [vmem:[%s4055_s10 + $0x1a0] sm:$0xff] }
 0x33e   : > { %3585 = vmatpush3.msra.mxu1 %v2232_v26  ;;  %3551 = vmatprep.subr.mxu0 %v2215_v46  ;;  %v2196_v25 = vld [vmem:[%s4055_s10 + $0x30] sm:$0xff]  ;;  %v2195_v41 = vld [vmem:[%s4055_s10 + $0x28] sm:$0xff]  ;;  %v2194_v13 = vld [vmem:[%s4055_s10 + $0x20] sm:$0xff] }
 0x33f   : > { %3586 = vmatprep.subr.mxu1 %v2247_v61  ;;  %3552 = vmatpush3.msra.mxu0 %v2199_v54  ;;  %v2228_v34 = vld [vmem:[%s4055_s10 + $0x130] sm:$0xff]  ;;  %v2227_v44 = vld [vmem:[%s4055_s10 + $0x128] sm:$0xff]  ;;  %v2226_v6 = vld [vmem:[%s4055_s10 + $0x120] sm:$0xff] }
 0x340   : > { %3587 = vmatpush3.msra.mxu1 %v2231_v40  ;;  %3553 = vmatprep.subr.mxu0 %v2214_v35  ;;  %v2209_v57 = vld [vmem:[%s4055_s10 + $0x98] sm:$0xff]  ;;  %v2208_v38 = vld [vmem:[%s4055_s10 + $0x90] sm:$0xff]  ;;  %v2207_v16 = vld [vmem:[%s4055_s10 + $0x88] sm:$0xff] }
 0x341   : > { %3588 = vmatprep.subr.mxu1 %v2246_v19  ;;  %3554 = vmatpush3.msra.mxu0 %v2198_v55  ;;  %v2241_v27 = vld [vmem:[%s4055_s10 + $0x198] sm:$0xff]  ;;  %v2240_v5 = vld [vmem:[%s4055_s10 + $0x190] sm:$0xff]  ;;  %v2239_v47 = vld [vmem:[%s4055_s10 + $0x188] sm:$0xff] }
 0x342   : > { %3589 = vmatpush3.msra.mxu1 %v2230_v51  ;;  %3555 = vmatprep.subr.mxu0 %v2213_v17  ;;  %v2193_v0 = vld [vmem:[%s4055_s10 + $0x18] sm:$0xff]  ;;  %v2192_v56 = vld [vmem:[%s4055_s10 + $0x10] sm:$0xff]  ;;  %v2191_v20 = vld [vmem:[%s4055_s10 + $0x8] sm:$0xff] }
 0x343   : > { %3590 = vmatprep.subr.mxu1 %v2245_v21  ;;  %3556 = vmatpush3.msra.mxu0 %v2197_v62  ;;  %v2225_v63 = vld [vmem:[%s4055_s10 + $0x118] sm:$0xff]  ;;  %v2224_v60 = vld [vmem:[%s4055_s10 + $0x110] sm:$0xff]  ;;  %v2223_v48 = vld [vmem:[%s4055_s10 + $0x108] sm:$0xff] }
 0x344   : > { %3591 = vmatpush3.msra.mxu1 %v2229_v37  ;;  %3557 = vmatprep.subr.mxu0 %v2212_v7  ;;  %v2206_v29 = vld [vmem:[%s4055_s10 + $0x80] sm:$0xff]  ;;  %v2189_v22 = vld [vmem:[#allocation2 + $0x18] sm:$0xff]  ;;  %v2188_v52 = vld [vmem:[#allocation2 + $0x10] sm:$0xff] }
 0x345   : > { %3592 = vmatprep.subr.mxu1 %v2244_v8  ;;  %3558 = vmatpush3.msra.mxu0 %v2196_v25  ;;  %v2238_v23 = vld [vmem:[%s4055_s10 + $0x180] sm:$0xff]  ;;  %v3519_v30 = vld [vmem:[%s5878_s3] ss:$0 sm:$0xff] }
 0x346   : > { %3593 = vmatpush3.msra.mxu1 %v2228_v34  ;;  %3559 = vmatprep.subr.mxu0 %v2211_v2  ;;  %v2190_v32 = vld [vmem:[%s4055_s10] sm:$0xff] }
 0x347   : > { %3594 = vmatprep.subr.mxu1 %v2243_v45  ;;  %3560 = vmatpush3.msra.mxu0 %v2195_v41  ;;  %v2187_v11 = vld [vmem:[#allocation2 + $0x8] sm:$0xff]  ;;  %v2186_v1 = vld [vmem:[#allocation2] sm:$0xff] }
 0x348   : > { %3595 = vmatpush3.msra.mxu1 %v2227_v44  ;;  %3561 = vmatprep.subr.mxu0 %v2210_v49  ;;  %v2222_v39 = vld [vmem:[%s4055_s10 + $0x100] sm:$0xff]  ;;  %s3520_s10 = sshll.u32 %s3950_s8, 3 }
 0x349   : > { %3596 = vmatprep.subr.mxu1 %v2242_v53  ;;  %3562 = vmatpush3.msra.mxu0 %v2194_v13  ;;  %s2402_s23 = scalar_lea.vmem [#allocation3], %s3520_s10 }
 0x34a   : > { %3597 = vmatpush3.msra.mxu1 %v2226_v6  ;;  %3563 = vmatprep.subr.mxu0 %v2209_v57 }
 0x34b   : > { %3598 = vmatprep.subr.mxu1 %v2241_v27  ;;  %3564 = vmatpush3.msra.mxu0 %v2193_v0 }
 0x34c   : > { %3599 = vmatpush3.msra.mxu1 %v2225_v63  ;;  %3565 = vmatprep.subr.mxu0 %v2208_v38 }
 0x34d   : > { %3600 = vmatprep.subr.mxu1 %v2240_v5  ;;  %3566 = vmatpush3.msra.mxu0 %v2192_v56 }
 0x34e   : > { %3601 = vmatpush3.msra.mxu1 %v2224_v60  ;;  %3567 = vmatprep.subr.mxu0 %v2207_v16 }
 0x34f   : > { %3602 = vmatprep.subr.mxu1 %v2239_v47  ;;  %3568 = vmatpush3.msra.mxu0 %v2191_v20 }
 0x350   : > { %3603 = vmatpush3.msra.mxu1 %v2223_v48  ;;  %3569 = vmatprep.subr.mxu0 %v2206_v29 }
 0x351   : > { %3604 = vmatprep.subr.mxu1 %v2238_v23  ;;  %3570 = vmatpush3.msra.mxu0 %v2190_v32 }
 0x352   : > { %2325 = vmatprep.mubr.f32.mxu0 %v2187_v11  ;;  %3605 = vmatpush3.msra.mxu1 %v2222_v39 }
 0x353   : > { %2395 = vmatprep.mubr.f32.mxu1 %v2189_v22  ;;  %2326 = vmatmul.mubr.f32.vlgmr.msra.gmra.mxu0 %v2186_v1 }
 0x354   : > { %2396 = vmatmul.mubr.f32.vlgmr.msra.gmra.mxu1 %v2188_v52 }
 0x413   : > { %v3571_v24 = vpop.f32.mrf.mxu0 }
 0x414   : > { %v3606_v14 = vpop.f32.mrf.mxu1 }
 0x415   : > { %v3572_v31 = vpop.f32.mrf.mxu0 }
 0x416   : > { %v3607_v50 = vpop.f32.mrf.mxu1  ;;  %v3573_v58 = vadd.f32 %v3572_v31, %v3571_v24 }
 0x417   : > { %v3608_v59 = vadd.f32 %v3607_v50, %v3606_v14 }
 0x418   : > { %v2328_v9 = vadd.f32 %v3573_v58, %v3519_v30  ;;  %2407 = sbr.rel (%p3521_p4) target bundleno = 2226 (0x8b2), region = 76 }
 0x41a   : > { %v2398_v43 = vadd.f32 %v3608_v59, %v2328_v9 }
 0x41c   : > { %2403 = vst [vmem:[%s2402_s23] sm:$0xff] %v2398_v43 }
 0x41d   : > { %v5168_v28 = vld [vmem:[%s5784_s6 + $0x1e8] sm:$0xff]  ;;  %v5173_v18 = vld [vmem:[%s5784_s6 + $0x1e0] sm:$0xff]  ;;  %v5810_v42 = vmov 0.0   ;;  %v5215_v4 = vld [vmem:[%s5784_s6 + $0x1f8] sm:$0xff]  ;;  %vm3179_vm2 = vcmask 1041408   ;;  %vm3191_vm3 = vcmask 1024  }
 0x41e   : > { %5879 = vst [vmem:[#allocation14_spill] sm:$0xff] %v5168_v28  ;;  %v5178_v15 = vld [vmem:[%s5784_s6 + $0x1c8] sm:$0xff]  ;;  %2472 = vmatprep.subr.mxu0 %v5168_v28  ;;  %v5184_v10 = vld [vmem:[%s5784_s6 + $0x1c0] sm:$0xff]  ;;  %2536 = vmatprep.mubr.f32.mxu0 %v5810_v42  ;;  %5880 = vst [vmem:[#allocation15_spill] sm:$0xff] %v5215_v4 }
 0x41f   : > { %2473 = vmatpush1.msra.mxu0 %v5173_v18  ;;  %v5191_v36 = vld [vmem:[%s5784_s6 + $0x1a8] sm:$0xff]  ;;  %2607 = vmatprep.mubr.f32.mxu1 %v5810_v42  ;;  %v5198_v33 = vld [vmem:[%s5784_s6 + $0x1a0] sm:$0xff]  ;;  %v5227_v46 = vld [vmem:[%s5784_s6 + $0x1f0] sm:$0xff] }
 0x420   : > { %2474 = vmatprep.subr.mxu0 %v5178_v15  ;;  %v5204_v12 = vld [vmem:[%s5784_s6 + $0x188] sm:$0xff]  ;;  %v5210_v3 = vld [vmem:[%s5784_s6 + $0x180] sm:$0xff]  ;;  %2543 = vmatprep.subr.mxu1 %v5215_v4  ;;  %v5239_v54 = vld [vmem:[%s5784_s6 + $0x1d8] sm:$0xff] }
 0x421   : > { %2475 = vmatpush1.msra.mxu0 %v5184_v10  ;;  %v5221_v26 = vld [vmem:[%s5784_s6 + $0x168] sm:$0xff]  ;;  %v5233_v61 = vld [vmem:[%s5784_s6 + $0x160] sm:$0xff]  ;;  %2544 = vmatpush1.msra.mxu1 %v5227_v46  ;;  %v5244_v40 = vld [vmem:[%s5784_s6 + $0x1d0] sm:$0xff] }
 0x422   : > { %2476 = vmatprep.subr.mxu0 %v5191_v36  ;;  %v5250_v35 = vld [vmem:[%s5784_s6 + $0x148] sm:$0xff]  ;;  %2545 = vmatprep.subr.mxu1 %v5239_v54  ;;  %v5256_v19 = vld [vmem:[%s5784_s6 + $0x1b8] sm:$0xff]  ;;  %v5262_v55 = vld [vmem:[%s5784_s6 + $0x140] sm:$0xff] }
 0x423   : > { %2477 = vmatpush1.msra.mxu0 %v5198_v33  ;;  %2546 = vmatpush1.msra.mxu1 %v5244_v40  ;;  %v5268_v51 = vld [vmem:[%s5784_s6 + $0x1b0] sm:$0xff]  ;;  %v5273_v17 = vld [vmem:[%s5784_s6 + $0x198] sm:$0xff]  ;;  %v5279_v21 = vld [vmem:[%s5784_s6 + $0x128] sm:$0xff] }
 0x424   : > { %2478 = vmatprep.subr.mxu0 %v5204_v12  ;;  %2547 = vmatprep.subr.mxu1 %v5256_v19  ;;  %v5285_v62 = vld [vmem:[%s5784_s6 + $0x190] sm:$0xff]  ;;  %v5291_v37 = vld [vmem:[%s5784_s6 + $0x120] sm:$0xff]  ;;  %v5297_v7 = vld [vmem:[%s5784_s6 + $0x178] sm:$0xff] }
 0x425   : > { %2479 = vmatpush1.msra.mxu0 %v5210_v3  ;;  %2548 = vmatpush1.msra.mxu1 %v5268_v51  ;;  %v5303_v8 = vld [vmem:[%s5784_s6 + $0x108] sm:$0xff]  ;;  %v5309_v25 = vld [vmem:[%s5784_s6 + $0x170] sm:$0xff]  ;;  %v5315_v34 = vld [vmem:[%s5784_s6 + $0x100] sm:$0xff] }
 0x426   : > { %2480 = vmatprep.subr.mxu0 %v5221_v26  ;;  %2549 = vmatprep.subr.mxu1 %v5273_v17  ;;  %v5321_v2 = vld [vmem:[%s5784_s6 + $0x158] sm:$0xff]  ;;  %v5327_v45 = vld [vmem:[%s5784_s6 + $0xe8] sm:$0xff]  ;;  %v5333_v41 = vld [vmem:[%s5784_s6 + $0x150] sm:$0xff] }
 0x427   : > { %2481 = vmatpush1.msra.mxu0 %v5233_v61  ;;  %2550 = vmatpush1.msra.mxu1 %v5285_v62  ;;  %v5339_v44 = vld [vmem:[%s5784_s6 + $0xe0] sm:$0xff]  ;;  %v5345_v49 = vld [vmem:[%s5784_s6 + $0x138] sm:$0xff]  ;;  %v5351_v53 = vld [vmem:[%s5784_s6 + $0xc8] sm:$0xff] }
 0x428   : > { %2482 = vmatprep.subr.mxu0 %v5250_v35  ;;  %2551 = vmatprep.subr.mxu1 %v5297_v7  ;;  %v5357_v13 = vld [vmem:[%s5784_s6 + $0x130] sm:$0xff]  ;;  %v5363_v6 = vld [vmem:[%s5784_s6 + $0xc0] sm:$0xff]  ;;  %v5369_v57 = vld [vmem:[%s5784_s6 + $0x118] sm:$0xff] }
 0x429   : > { %2483 = vmatpush1.msra.mxu0 %v5262_v55  ;;  %2552 = vmatpush1.msra.mxu1 %v5309_v25  ;;  %v5375_v27 = vld [vmem:[%s5784_s6 + $0xa8] sm:$0xff]  ;;  %v5381_v0 = vld [vmem:[%s5784_s6 + $0x110] sm:$0xff]  ;;  %v5387_v63 = vld [vmem:[%s5784_s6 + $0xa0] sm:$0xff] }
 0x42a   : > { %2484 = vmatprep.subr.mxu0 %v5279_v21  ;;  %2553 = vmatprep.subr.mxu1 %v5321_v2  ;;  %v5393_v38 = vld [vmem:[%s5784_s6 + $0xf8] sm:$0xff]  ;;  %v5399_v5 = vld [vmem:[%s5784_s6 + $0x88] sm:$0xff]  ;;  %v5405_v56 = vld [vmem:[%s5784_s6 + $0xf0] sm:$0xff] }
 0x42b   : > { %2485 = vmatpush1.msra.mxu0 %v5291_v37  ;;  %2554 = vmatpush1.msra.mxu1 %v5333_v41  ;;  %v5411_v60 = vld [vmem:[%s5784_s6 + $0x80] sm:$0xff]  ;;  %v5417_v16 = vld [vmem:[%s5784_s6 + $0xd8] sm:$0xff]  ;;  %v5423_v47 = vld [vmem:[%s5784_s6 + $0x68] sm:$0xff] }
 0x42c   : > { %2486 = vmatprep.subr.mxu0 %v5303_v8  ;;  %2555 = vmatprep.subr.mxu1 %v5345_v49  ;;  %5881 = vst [vmem:[#allocation16_spill] sm:$0xff] %v5411_v60  ;;  %5882 = vst [vmem:[#allocation17_spill] sm:$0xff] %v5423_v47  ;;  %v5429_v20 = vld [vmem:[%s5784_s6 + $0xd0] sm:$0xff]  ;;  %v5435_v48 = vld [vmem:[%s5784_s6 + $0x60] sm:$0xff] }
 0x42d   : > { %2487 = vmatpush1.msra.mxu0 %v5315_v34  ;;  %2556 = vmatpush1.msra.mxu1 %v5357_v13  ;;  %5883 = vst [vmem:[#allocation18_spill] sm:$0xff] %v5435_v48  ;;  %v5441_v29 = vld [vmem:[%s5784_s6 + $0xb8] sm:$0xff]  ;;  %v5447_v23 = vld [vmem:[%s5784_s6 + $0x48] sm:$0xff]  ;;  %v5453_v32 = vld [vmem:[%s5784_s6 + $0xb0] sm:$0xff] }
 0x42e   : > { %2488 = vmatprep.subr.mxu0 %v5327_v45  ;;  %2557 = vmatprep.subr.mxu1 %v5369_v57  ;;  %5884 = vst [vmem:[#allocation19_spill] sm:$0xff] %v5447_v23  ;;  %v5459_v11 = vld [vmem:[%s5784_s6 + $0x40] sm:$0xff]  ;;  %v5465_v39 = vld [vmem:[%s5784_s6 + $0x98] sm:$0xff]  ;;  %v5471_v22 = vld [vmem:[%s5784_s6 + $0x28] sm:$0xff] }
 0x42f   : > { %2489 = vmatpush1.msra.mxu0 %v5339_v44  ;;  %2558 = vmatpush1.msra.mxu1 %v5381_v0  ;;  %5885 = vst [vmem:[#allocation20_spill] sm:$0xff] %v5459_v11  ;;  %5886 = vst [vmem:[#allocation21_spill] sm:$0xff] %v5471_v22  ;;  %v5477_v1 = vld [vmem:[%s5784_s6 + $0x90] sm:$0xff]  ;;  %v5483_v52 = vld [vmem:[%s5784_s6 + $0x20] sm:$0xff] }
 0x430   : > { %2490 = vmatprep.subr.mxu0 %v5351_v53  ;;  %2559 = vmatprep.subr.mxu1 %v5393_v38  ;;  %5887 = vst [vmem:[#allocation22_spill] sm:$0xff] %v5477_v1  ;;  %5888 = vst [vmem:[#allocation23_spill] sm:$0xff] %v5483_v52  ;;  %v5489_v24 = vld [vmem:[%s5784_s6 + $0x78] sm:$0xff]  ;;  %v5495_v14 = vld [vmem:[%s5784_s6 + $0x8] sm:$0xff] }
 0x431   : > { %2491 = vmatpush1.msra.mxu0 %v5363_v6  ;;  %2560 = vmatpush1.msra.mxu1 %v5405_v56  ;;  %5889 = vst [vmem:[#allocation24_spill] sm:$0xff] %v5489_v24  ;;  %5890 = vst [vmem:[#allocation25_spill] sm:$0xff] %v5495_v14  ;;  %v5501_v30 = vld [vmem:[%s5784_s6 + $0x70] sm:$0xff]  ;;  %v5507_v31 = vld [vmem:[%s5784_s6] sm:$0xff] }
 0x432   : > { %2492 = vmatprep.subr.mxu0 %v5375_v27  ;;  %2561 = vmatprep.subr.mxu1 %v5417_v16  ;;  %5891 = vst [vmem:[#allocation26_spill] sm:$0xff] %v5501_v30  ;;  %5892 = vst [vmem:[#allocation27_spill] sm:$0xff] %v5507_v31  ;;  %v5513_v50 = vld [vmem:[%s5784_s6 + $0x58] sm:$0xff]  ;;  %v5520_v58 = vld [vmem:[%s5784_s6 + $0x50] sm:$0xff] }
 0x433   : > { %2493 = vmatpush1.msra.mxu0 %v5387_v63  ;;  %2562 = vmatpush1.msra.mxu1 %v5429_v20  ;;  %5893 = vst [vmem:[#allocation28_spill] sm:$0xff] %v5513_v50  ;;  %5894 = vst [vmem:[#allocation29_spill] sm:$0xff] %v5520_v58  ;;  %v5527_v9 = vld [vmem:[%s5784_s6 + $0x38] sm:$0xff]  ;;  %v5534_v59 = vld [vmem:[%s5784_s6 + $0x30] sm:$0xff] }
 0x434   : > { %2494 = vmatprep.subr.mxu0 %v5399_v5  ;;  %2563 = vmatprep.subr.mxu1 %v5441_v29  ;;  %5895 = vst [vmem:[#allocation30_spill] sm:$0xff] %v5527_v9  ;;  %5896 = vst [vmem:[#allocation31_spill] sm:$0xff] %v5534_v59  ;;  %v5541_v43 = vld [vmem:[%s5784_s6 + $0x18] sm:$0xff] }
 0x435   : > { %2495 = vmatpush1.msra.mxu0 %v5411_v60  ;;  %2564 = vmatpush1.msra.mxu1 %v5453_v32  ;;  %5897 = vst [vmem:[#allocation32_spill] sm:$0xff] %v5541_v43 }
 0x436   : > { %2496 = vmatprep.subr.mxu0 %v5423_v47  ;;  %2565 = vmatprep.subr.mxu1 %v5465_v39 }
 0x437   : > { %2497 = vmatpush1.msra.mxu0 %v5435_v48  ;;  %2566 = vmatpush1.msra.mxu1 %v5477_v1 }
 0x438   : > { %2498 = vmatprep.subr.mxu0 %v5447_v23  ;;  %2567 = vmatprep.subr.mxu1 %v5489_v24 }
 0x439   : > { %2499 = vmatpush1.msra.mxu0 %v5459_v11  ;;  %2568 = vmatpush1.msra.mxu1 %v5501_v30 }
 0x43a   : > { %2500 = vmatprep.subr.mxu0 %v5471_v22  ;;  %2569 = vmatprep.subr.mxu1 %v5513_v50 }
 0x43b   : > { %2501 = vmatpush1.msra.mxu0 %v5483_v52  ;;  %2570 = vmatpush1.msra.mxu1 %v5520_v58 }
 0x43c   : > { %2502 = vmatprep.subr.mxu0 %v5495_v14  ;;  %2571 = vmatprep.subr.mxu1 %v5527_v9 }
 0x43d   : > { %2503 = vmatpush1.msra.mxu0 %v5507_v31  ;;  %v5547_v31 = vld [vmem:[%s5784_s6 + $0x10] sm:$0xff]  ;;  %2572 = vmatpush1.msra.mxu1 %v5534_v59 }
 0x43e   : > { %2537 = vmatmul.mubr.f32.vlgmr.msra.gmra.mxu0 %v5810_v42  ;;  %5898 = vst [vmem:[#allocation33_spill] sm:$0xff] %v5547_v31  ;;  %2649 = vmatprep.subr.mxu0 %v5168_v28 }
 0x43f   : > { %2650 = vmatpush1.msra.mxu0 %v5173_v18  ;;  %2573 = vmatprep.subr.mxu1 %v5541_v43 }
 0x440   : > { %2651 = vmatprep.subr.mxu0 %v5178_v15  ;;  %2574 = vmatpush1.msra.mxu1 %v5547_v31 }
 0x441   : > { %2652 = vmatpush1.msra.mxu0 %v5184_v10  ;;  %2608 = vmatmul.mubr.f32.vlgmr.msra.gmra.mxu1 %v5810_v42  ;;  %v5899_v42 = vld [vmem:[#allocation27_spill] sm:$0xff] }
 0x442   : > { %2720 = vmatprep.subr.mxu1 %v5215_v4  ;;  %2653 = vmatprep.subr.mxu0 %v5191_v36 }
 0x443   : > { %2721 = vmatpush1.msra.mxu1 %v5227_v46  ;;  %2654 = vmatpush1.msra.mxu0 %v5198_v33 }
 0x444   : > { %2722 = vmatprep.subr.mxu1 %v5239_v54  ;;  %2655 = vmatprep.subr.mxu0 %v5204_v12 }
 0x445   : > { %2723 = vmatpush1.msra.mxu1 %v5244_v40  ;;  %2656 = vmatpush1.msra.mxu0 %v5210_v3 }
 0x446   : > { %2724 = vmatprep.subr.mxu1 %v5256_v19  ;;  %2657 = vmatprep.subr.mxu0 %v5221_v26 }
 0x447   : > { %2725 = vmatpush1.msra.mxu1 %v5268_v51  ;;  %2658 = vmatpush1.msra.mxu0 %v5233_v61 }
 0x448   : > { %2726 = vmatprep.subr.mxu1 %v5273_v17  ;;  %2659 = vmatprep.subr.mxu0 %v5250_v35 }
 0x449   : > { %2727 = vmatpush1.msra.mxu1 %v5285_v62  ;;  %2660 = vmatpush1.msra.mxu0 %v5262_v55 }
 0x44a   : > { %2728 = vmatprep.subr.mxu1 %v5297_v7  ;;  %2661 = vmatprep.subr.mxu0 %v5279_v21 }
 0x44b   : > { %2729 = vmatpush1.msra.mxu1 %v5309_v25  ;;  %2662 = vmatpush1.msra.mxu0 %v5291_v37 }
 0x44c   : > { %2730 = vmatprep.subr.mxu1 %v5321_v2  ;;  %2663 = vmatprep.subr.mxu0 %v5303_v8 }
 0x44d   : > { %2731 = vmatpush1.msra.mxu1 %v5333_v41  ;;  %2664 = vmatpush1.msra.mxu0 %v5315_v34 }
 0x44e   : > { %2732 = vmatprep.subr.mxu1 %v5345_v49  ;;  %2665 = vmatprep.subr.mxu0 %v5327_v45 }
 0x44f   : > { %2733 = vmatpush1.msra.mxu1 %v5357_v13  ;;  %2666 = vmatpush1.msra.mxu0 %v5339_v44 }
 0x450   : > { %2734 = vmatprep.subr.mxu1 %v5369_v57  ;;  %2667 = vmatprep.subr.mxu0 %v5351_v53 }
 0x451   : > { %2735 = vmatpush1.msra.mxu1 %v5381_v0  ;;  %2668 = vmatpush1.msra.mxu0 %v5363_v6 }
 0x452   : > { %2736 = vmatprep.subr.mxu1 %v5393_v38  ;;  %2669 = vmatprep.subr.mxu0 %v5375_v27 }
 0x453   : > { %2737 = vmatpush1.msra.mxu1 %v5405_v56  ;;  %2670 = vmatpush1.msra.mxu0 %v5387_v63 }
 0x454   : > { %2738 = vmatprep.subr.mxu1 %v5417_v16  ;;  %2671 = vmatprep.subr.mxu0 %v5399_v5 }
 0x455   : > { %2739 = vmatpush1.msra.mxu1 %v5429_v20  ;;  %2672 = vmatpush1.msra.mxu0 %v5411_v60 }
 0x456   : > { %2740 = vmatprep.subr.mxu1 %v5441_v29  ;;  %2673 = vmatprep.subr.mxu0 %v5423_v47 }
 0x457   : > { %2741 = vmatpush1.msra.mxu1 %v5453_v32  ;;  %2674 = vmatpush1.msra.mxu0 %v5435_v48 }
 0x458   : > { %2742 = vmatprep.subr.mxu1 %v5465_v39  ;;  %2675 = vmatprep.subr.mxu0 %v5447_v23  ;;  %v5900_v23 = vmov 0.0  }
 0x459   : > { %2743 = vmatpush1.msra.mxu1 %v5477_v1  ;;  %2676 = vmatpush1.msra.mxu0 %v5459_v11 }
 0x45a   : > { %2744 = vmatprep.subr.mxu1 %v5489_v24  ;;  %2677 = vmatprep.subr.mxu0 %v5471_v22  ;;  %v2623_v22 = vld [vmem:[#allocation3 + $0x8] sm:$0x3] }
 0x45b   : > { %2745 = vmatpush1.msra.mxu1 %v5501_v30  ;;  %2678 = vmatpush1.msra.mxu0 %v5483_v52  ;;  %v2614_v52 = vld [vmem:[#allocation3] sm:$0x3]  ;;  %v2636_v30 = vld [vmem:[#allocation3 + $0x18] sm:$0x3] }
 0x45c   : > { %2746 = vmatprep.subr.mxu1 %v5513_v50  ;;  %2679 = vmatprep.subr.mxu0 %v5495_v14 }
 0x45d   : > { %2747 = vmatpush1.msra.mxu1 %v5520_v58  ;;  %2680 = vmatpush1.msra.mxu0 %v5899_v42 }
 0x45e   : > { %2748 = vmatprep.subr.mxu1 %v5527_v9  ;;  %2713 = vmatprep.mubr.f32.mxu0 %v5900_v23 }
 0x45f   : > { %2749 = vmatpush1.msra.mxu1 %v5534_v59  ;;  %2784 = vmatprep.mubr.f32.mxu1 %v5900_v23  ;;  %v2632_v23 = vld [vmem:[#allocation3 + $0x10] sm:$0x3] }
 0x460   : > { %2750 = vmatprep.subr.mxu1 %v5541_v43  ;;  %2823 = vmatprep.subr.mxu0 %v5168_v28 }
 0x461   : > { %2751 = vmatpush1.msra.mxu1 %v5547_v31 }
 0x462   : > { %2894 = vmatprep.subr.mxu1 %v5215_v4 }
 0x4fe   : > { %v2538_v14 = vpop.f32.mrf.mxu0 }
 0x4ff   : > { %v2615_v9 = vadd.f32 %v2614_v52, %v2538_v14 }
 0x500   : > { %v2540_v58 = vpop.f32.mrf.mxu0 }
 0x501   : > { %v3522_v42 = vmul.f32 -1.442695, %v2615_v9  ;;  %v2624_v11 = vadd.f32 %v2623_v22, %v2540_v58  ;;  %v2609_v50 = vpop.f32.mrf.mxu1 }
 0x502   : > { %v2633_v31 = vadd.f32 %v2632_v23, %v2609_v50  ;;  %v5906_v50 = vld [vmem:[#allocation19_spill] sm:$0xff] }
 0x503   : > { %3689 = vpow2.f32 %v3522_v42  ;;  %v3523_v59 = vmul.f32 -1.442695, %v2624_v11  ;;  %v2611_v43 = vpop.f32.mrf.mxu1 }
 0x504   : > { %v2637_v48 = vadd.f32 %v2636_v30, %v2611_v43  ;;  %v5904_v30 = vld [vmem:[#allocation18_spill] sm:$0xff]  ;;  %v5907_v43 = vld [vmem:[#allocation28_spill] sm:$0xff] }
 0x505   : > { %3691 = vpow2.f32 %v3523_v59 }
 0x506   : > { %v3524_v24 = vmul.f32 -1.442695, %v2637_v48  ;;  %3693 = vtanh.f32 %v2633_v31  ;;  %v5905_v31 = vld [vmem:[#allocation26_spill] sm:$0xff] }
 0x508   : > { %3695 = vpow2.f32 %v3524_v24  ;;  %v5903_v24 = vld [vmem:[#allocation24_spill] sm:$0xff] }
 0x510   : > { %v3690_v28 = vpop.eup %3689 }
 0x511   : > { %v2619_v47 = vadd.f32 1.0, %v3690_v28 }
 0x512   : > { %v3692_v4 = vpop.eup %3691 }
 0x513   : > { %3697 = vrcp.f32 %v2619_v47  ;;  %v2628_v52 = vadd.f32 1.0, %v3692_v4  ;;  %v3694_v14 = vpop.eup %3693  ;;  %v5901_v4 = vld [vmem:[#allocation22_spill] sm:$0xff]  ;;  %v5902_v47 = vld [vmem:[#allocation17_spill] sm:$0xff] }
 0x515   : > { %3699 = vrcp.f32 %v2628_v52  ;;  %v3696_v22 = vpop.eup %3695  ;;  %v5908_v52 = vld [vmem:[#allocation20_spill] sm:$0xff] }
 0x516   : > { %v2641_v58 = vadd.f32 1.0, %v3696_v22  ;;  %v5910_v22 = vld [vmem:[#allocation21_spill] sm:$0xff] }
 0x518   : > { %3701 = vrcp.f32 %v2641_v58  ;;  %v5913_v58 = vld [vmem:[#allocation31_spill] sm:$0xff] }
 0x520   : > { %v3698_v42 = vpop.eup %3697 }
 0x521   : > { %v2645_v59 = vmul.f32 %v3698_v42, %v3694_v14  ;;  %v5909_v14 = vld [vmem:[#allocation29_spill] sm:$0xff]  ;;  %v5911_v42 = vld [vmem:[#allocation30_spill] sm:$0xff] }
 0x522   : > { %v3700_v11 = vpop.eup %3699 }
 0x523   : > { %v2644_v9 = vmul.f32 0.0, %v3700_v11  ;;  %v5912_v11 = vld [vmem:[#allocation23_spill] sm:$0xff] }
 0x525   : > { %v5621_v1 = vadd.f32 %v2645_v59, %v2644_v9  ;;  %v3702_v48 = vpop.eup %3701  ;;  %v5914_v9 = vld [vmem:[#allocation25_spill] sm:$0xff]  ;;  %v5915_v59 = vld [vmem:[#allocation32_spill] sm:$0xff] }
 0x527   : > { %3703 = vtanh.f32 %v5621_v1 }
 0x534   : > { %v3704_v28 = vpop.eup %3703 }
 0x535   : > { %v2648_v23 = vmul.f32 %v3704_v28, %v3702_v48  ;;  %v5916_v48 = vld [vmem:[#allocation27_spill] sm:$0xff]  ;;  %v5917_v28 = vmov 0.0  }
 0x537   : > { %2714 = vmatmul.mubr.f32.vlgmr.msra.gmra.mxu0 %v2648_v23  ;;  %2785 = vmatmul.mubr.f32.vlgmr.msra.gmra.mxu1 %v2648_v23  ;;  %v5918_v23 = vld [vmem:[#allocation33_spill] sm:$0xff] }
 0x538   : > { %2824 = vmatpush1.msra.mxu0 %v5173_v18  ;;  %2895 = vmatpush1.msra.mxu1 %v5227_v46 }
 0x539   : > { %2825 = vmatprep.subr.mxu0 %v5178_v15  ;;  %2896 = vmatprep.subr.mxu1 %v5239_v54 }
 0x53a   : > { %2826 = vmatpush1.msra.mxu0 %v5184_v10  ;;  %2897 = vmatpush1.msra.mxu1 %v5244_v40 }
 0x53b   : > { %2827 = vmatprep.subr.mxu0 %v5191_v36  ;;  %2898 = vmatprep.subr.mxu1 %v5256_v19 }
 0x53c   : > { %2828 = vmatpush1.msra.mxu0 %v5198_v33  ;;  %2899 = vmatpush1.msra.mxu1 %v5268_v51 }
 0x53d   : > { %2829 = vmatprep.subr.mxu0 %v5204_v12  ;;  %2900 = vmatprep.subr.mxu1 %v5273_v17 }
 0x53e   : > { %2830 = vmatpush1.msra.mxu0 %v5210_v3  ;;  %2901 = vmatpush1.msra.mxu1 %v5285_v62 }
 0x53f   : > { %2831 = vmatprep.subr.mxu0 %v5221_v26  ;;  %2902 = vmatprep.subr.mxu1 %v5297_v7 }
 0x540   : > { %2832 = vmatpush1.msra.mxu0 %v5233_v61  ;;  %2903 = vmatpush1.msra.mxu1 %v5309_v25 }
 0x541   : > { %2833 = vmatprep.subr.mxu0 %v5250_v35  ;;  %2904 = vmatprep.subr.mxu1 %v5321_v2 }
 0x542   : > { %2834 = vmatpush1.msra.mxu0 %v5262_v55  ;;  %2905 = vmatpush1.msra.mxu1 %v5333_v41 }
 0x543   : > { %2835 = vmatprep.subr.mxu0 %v5279_v21  ;;  %2906 = vmatprep.subr.mxu1 %v5345_v49 }
 0x544   : > { %2836 = vmatpush1.msra.mxu0 %v5291_v37  ;;  %2907 = vmatpush1.msra.mxu1 %v5357_v13 }
 0x545   : > { %2837 = vmatprep.subr.mxu0 %v5303_v8  ;;  %2908 = vmatprep.subr.mxu1 %v5369_v57 }
 0x546   : > { %2838 = vmatpush1.msra.mxu0 %v5315_v34  ;;  %2909 = vmatpush1.msra.mxu1 %v5381_v0 }
 0x547   : > { %2839 = vmatprep.subr.mxu0 %v5327_v45  ;;  %2910 = vmatprep.subr.mxu1 %v5393_v38 }
 0x548   : > { %2840 = vmatpush1.msra.mxu0 %v5339_v44  ;;  %2911 = vmatpush1.msra.mxu1 %v5405_v56 }
 0x549   : > { %2841 = vmatprep.subr.mxu0 %v5351_v53  ;;  %2912 = vmatprep.subr.mxu1 %v5417_v16 }
 0x54a   : > { %2842 = vmatpush1.msra.mxu0 %v5363_v6  ;;  %2913 = vmatpush1.msra.mxu1 %v5429_v20 }
 0x54b   : > { %2843 = vmatprep.subr.mxu0 %v5375_v27  ;;  %2914 = vmatprep.subr.mxu1 %v5441_v29 }
 0x54c   : > { %2844 = vmatpush1.msra.mxu0 %v5387_v63  ;;  %2915 = vmatpush1.msra.mxu1 %v5453_v32 }
 0x54d   : > { %2845 = vmatprep.subr.mxu0 %v5399_v5  ;;  %2916 = vmatprep.subr.mxu1 %v5465_v39 }
 0x54e   : > { %2846 = vmatpush1.msra.mxu0 %v5411_v60  ;;  %2917 = vmatpush1.msra.mxu1 %v5901_v4 }
 0x54f   : > { %2847 = vmatprep.subr.mxu0 %v5902_v47  ;;  %2918 = vmatprep.subr.mxu1 %v5903_v24  ;;  %v2807_v24 = vld [vmem:[#allocation3 + $0x12] sm:$0x3] }
 0x550   : > { %2848 = vmatpush1.msra.mxu0 %v5904_v30  ;;  %2919 = vmatpush1.msra.mxu1 %v5905_v31  ;;  %v2810_v30 = vld [vmem:[#allocation3 + $0x1a] sm:$0x3] }
 0x551   : > { %2849 = vmatprep.subr.mxu0 %v5906_v50  ;;  %2920 = vmatprep.subr.mxu1 %v5907_v43 }
 0x552   : > { %2850 = vmatpush1.msra.mxu0 %v5908_v52  ;;  %2921 = vmatpush1.msra.mxu1 %v5909_v14  ;;  %v5919_v14 = vld [vmem:[#allocation14_spill] sm:$0xff]  ;;  %v2799_v52 = vld [vmem:[#allocation3 + $0xa] sm:$0x3] }
 0x553   : > { %2851 = vmatprep.subr.mxu0 %v5910_v22  ;;  %2922 = vmatprep.subr.mxu1 %v5911_v42  ;;  %v5920_v22 = vld [vmem:[#allocation15_spill] sm:$0xff]  ;;  %v2791_v42 = vld [vmem:[#allocation3 + $0x2] sm:$0x3] }
 0x554   : > { %2852 = vmatpush1.msra.mxu0 %v5912_v11  ;;  %2923 = vmatpush1.msra.mxu1 %v5913_v58 }
 0x555   : > { %2853 = vmatprep.subr.mxu0 %v5914_v9  ;;  %2924 = vmatprep.subr.mxu1 %v5915_v59 }
 0x556   : > { %2854 = vmatpush1.msra.mxu0 %v5916_v48  ;;  %2887 = vmatprep.mubr.f32.mxu0 %v5917_v28 }
 0x557   : > { %2925 = vmatpush1.msra.mxu1 %v5918_v23  ;;  %2958 = vmatprep.mubr.f32.mxu1 %v5917_v28 }
 0x558   : > { %2997 = vmatprep.subr.mxu0 %v5919_v14  ;;  %3068 = vmatprep.subr.mxu1 %v5920_v22 }
 0x5f7   : > { %v2715_v11 = vpop.f32.mrf.mxu0  ;;  %v2786_v59 = vpop.f32.mrf.mxu1 }
 0x5f8   : > { %v2792_v58 = vadd.f32 %v2791_v42, %v2715_v11  ;;  %v2808_v14 = vadd.f32 %v2807_v24, %v2786_v59 }
 0x5f9   : > { %v2717_v43 = vpop.f32.mrf.mxu0  ;;  %v2788_v31 = vpop.f32.mrf.mxu1 }
 0x5fa   : > { %v3525_v9 = vmul.f32 -1.442695, %v2792_v58  ;;  %v2800_v50 = vadd.f32 %v2799_v52, %v2717_v43  ;;  %v2811_v23 = vadd.f32 %v2810_v30, %v2788_v31 }
 0x5fc   : > { %3705 = vpow2.f32 %v3525_v9  ;;  %v3526_v48 = vmul.f32 -1.442695, %v2800_v50  ;;  %v3527_v28 = vmul.f32 -1.442695, %v2811_v23 }
 0x5fe   : > { %3707 = vpow2.f32 %v3526_v48 }
 0x5ff   : > { %3709 = vpow2.f32 %v3527_v28  ;;  %v3139_v28 = vld [vmem:[#allocation3 + $0x6] sm:$0x3] }
 0x609   : > { %v3706_v47 = vpop.eup %3705 }
 0x60a   : > { %v2796_v4 = vadd.f32 1.0, %v3706_v47 }
 0x60b   : > { %v3708_v22 = vpop.eup %3707 }
 0x60c   : > { %3711 = vrcp.f32 %v2796_v4  ;;  %v2804_v60 = vadd.f32 1.0, %v3708_v22  ;;  %v3710_v42 = vpop.eup %3709 }
 0x60d   : > { %3713 = vtanh.f32 %v2808_v14  ;;  %v2815_v50 = vadd.f32 1.0, %v3710_v42  ;;  %v3147_v14 = vld [vmem:[#allocation3 + $0xe] sm:$0x3] }
 0x60e   : > { %3715 = vrcp.f32 %v2804_v60 }
 0x60f   : > { %3717 = vrcp.f32 %v2815_v50 }
 0x619   : > { %v3712_v43 = vpop.eup %3711 }
 0x61a   : > { %v3714_v52 = vpop.eup %3713 }
 0x61b   : > { %v3716_v11 = vpop.eup %3715  ;;  %v2819_v58 = vmul.f32 %v3714_v52, %v3712_v43 }
 0x61c   : > { %v2818_v9 = vmul.f32 %v3716_v11, %v5621_v1  ;;  %v3718_v47 = vpop.eup %3717 }
 0x61e   : > { %v5691_v30 = vadd.f32 %v2819_v58, %v2818_v9  ;;  %v3158_v9 = vld [vmem:[#allocation3 + $0x1e] sm:$0x3] }
 0x620   : > { %3719 = vtanh.f32 %v5691_v30 }
 0x62d   : > { %v3720_v24 = vpop.eup %3719 }
 0x62e   : > { %v2822_v31 = vmul.f32 %v3720_v24, %v3718_v47  ;;  %v3155_v47 = vld [vmem:[#allocation3 + $0x16] sm:$0x3] }
 0x630   : > { %2888 = vmatmul.mubr.f32.vlgmr.msra.gmra.mxu0 %v2822_v31  ;;  %2959 = vmatmul.mubr.f32.vlgmr.msra.gmra.mxu1 %v2822_v31 }
 0x631   : > { %2998 = vmatpush1.msra.mxu0 %v5173_v18  ;;  %3069 = vmatpush1.msra.mxu1 %v5227_v46  ;;  %v5921_v18 = vld [vmem:[#allocation16_spill] sm:$0xff] }
 0x632   : > { %2999 = vmatprep.subr.mxu0 %v5178_v15  ;;  %3070 = vmatprep.subr.mxu1 %v5239_v54  ;;  %v5922_v15 = vld [vmem:[#allocation22_spill] sm:$0xff]  ;;  %v5929_v46 = vld [vmem:[#allocation20_spill] sm:$0xff]  ;;  %v5931_v54 = vld [vmem:[#allocation21_spill] sm:$0xff] }
 0x633   : > { %3000 = vmatpush1.msra.mxu0 %v5184_v10  ;;  %3071 = vmatpush1.msra.mxu1 %v5244_v40  ;;  %v5923_v10 = vld [vmem:[#allocation17_spill] sm:$0xff]  ;;  %v5932_v40 = vld [vmem:[#allocation30_spill] sm:$0xff] }
 0x634   : > { %3001 = vmatprep.subr.mxu0 %v5191_v36  ;;  %3072 = vmatprep.subr.mxu1 %v5256_v19  ;;  %v5924_v36 = vld [vmem:[#allocation24_spill] sm:$0xff]  ;;  %v5934_v19 = vld [vmem:[#allocation31_spill] sm:$0xff] }
 0x635   : > { %3002 = vmatpush1.msra.mxu0 %v5198_v33  ;;  %3073 = vmatpush1.msra.mxu1 %v5268_v51  ;;  %v5925_v33 = vld [vmem:[#allocation18_spill] sm:$0xff]  ;;  %v5936_v51 = vld [vmem:[#allocation32_spill] sm:$0xff] }
 0x636   : > { %3003 = vmatprep.subr.mxu0 %v5204_v12  ;;  %3074 = vmatprep.subr.mxu1 %v5273_v17  ;;  %v5926_v12 = vld [vmem:[#allocation26_spill] sm:$0xff]  ;;  %v5937_v17 = vld [vmem:[#allocation27_spill] sm:$0xff] }
 0x637   : > { %3004 = vmatpush1.msra.mxu0 %v5210_v3  ;;  %3075 = vmatpush1.msra.mxu1 %v5285_v62  ;;  %v5927_v3 = vld [vmem:[#allocation19_spill] sm:$0xff]  ;;  %v5939_v62 = vld [vmem:[#allocation33_spill] sm:$0xff] }
 0x638   : > { %3005 = vmatprep.subr.mxu0 %v5221_v26  ;;  %3076 = vmatprep.subr.mxu1 %v5297_v7  ;;  %v5928_v26 = vld [vmem:[#allocation28_spill] sm:$0xff] }
 0x639   : > { %3006 = vmatpush1.msra.mxu0 %v5233_v61  ;;  %3077 = vmatpush1.msra.mxu1 %v5309_v25  ;;  %v5930_v61 = vld [vmem:[#allocation29_spill] sm:$0xff] }
 0x63a   : > { %3007 = vmatprep.subr.mxu0 %v5250_v35  ;;  %3078 = vmatprep.subr.mxu1 %v5321_v2  ;;  %v5933_v35 = vld [vmem:[#allocation23_spill] sm:$0xff] }
 0x63b   : > { %3008 = vmatpush1.msra.mxu0 %v5262_v55  ;;  %3079 = vmatpush1.msra.mxu1 %v5333_v41  ;;  %v5935_v55 = vld [vmem:[#allocation25_spill] sm:$0xff] }
 0x63c   : > { %3009 = vmatprep.subr.mxu0 %v5279_v21  ;;  %3080 = vmatprep.subr.mxu1 %v5345_v49  ;;  %v5938_v21 = vmov 0.0  }
 0x63d   : > { %3010 = vmatpush1.msra.mxu0 %v5291_v37  ;;  %3081 = vmatpush1.msra.mxu1 %v5357_v13  ;;  %v2965_v37 = vld [vmem:[#allocation3 + $0x4] sm:$0x3] }
 0x63e   : > { %3011 = vmatprep.subr.mxu0 %v5303_v8  ;;  %3082 = vmatprep.subr.mxu1 %v5369_v57  ;;  %v2973_v8 = vld [vmem:[#allocation3 + $0xc] sm:$0x3] }
 0x63f   : > { %3012 = vmatpush1.msra.mxu0 %v5315_v34  ;;  %3083 = vmatpush1.msra.mxu1 %v5381_v0 }
 0x640   : > { %3013 = vmatprep.subr.mxu0 %v5327_v45  ;;  %3084 = vmatprep.subr.mxu1 %v5393_v38 }
 0x641   : > { %3014 = vmatpush1.msra.mxu0 %v5339_v44  ;;  %3085 = vmatpush1.msra.mxu1 %v5405_v56 }
 0x642   : > { %3015 = vmatprep.subr.mxu0 %v5351_v53  ;;  %3086 = vmatprep.subr.mxu1 %v5417_v16  ;;  %v2984_v53 = vld [vmem:[#allocation3 + $0x1c] sm:$0x3] }
 0x643   : > { %3016 = vmatpush1.msra.mxu0 %v5363_v6  ;;  %3087 = vmatpush1.msra.mxu1 %v5429_v20  ;;  %v2981_v6 = vld [vmem:[#allocation3 + $0x14] sm:$0x3] }
 0x644   : > { %3017 = vmatprep.subr.mxu0 %v5375_v27  ;;  %3088 = vmatprep.subr.mxu1 %v5441_v29 }
 0x645   : > { %3018 = vmatpush1.msra.mxu0 %v5387_v63  ;;  %3089 = vmatpush1.msra.mxu1 %v5453_v32 }
 0x646   : > { %3019 = vmatprep.subr.mxu0 %v5399_v5  ;;  %3090 = vmatprep.subr.mxu1 %v5465_v39 }
 0x647   : > { %3020 = vmatpush1.msra.mxu0 %v5921_v18  ;;  %3091 = vmatpush1.msra.mxu1 %v5922_v15 }
 0x648   : > { %3021 = vmatprep.subr.mxu0 %v5923_v10  ;;  %3092 = vmatprep.subr.mxu1 %v5924_v36 }
 0x649   : > { %3022 = vmatpush1.msra.mxu0 %v5925_v33  ;;  %3093 = vmatpush1.msra.mxu1 %v5926_v12 }
 0x64a   : > { %3023 = vmatprep.subr.mxu0 %v5927_v3  ;;  %3094 = vmatprep.subr.mxu1 %v5928_v26 }
 0x64b   : > { %3024 = vmatpush1.msra.mxu0 %v5929_v46  ;;  %3095 = vmatpush1.msra.mxu1 %v5930_v61 }
 0x64c   : > { %3025 = vmatprep.subr.mxu0 %v5931_v54  ;;  %3096 = vmatprep.subr.mxu1 %v5932_v40 }
 0x64d   : > { %3026 = vmatpush1.msra.mxu0 %v5933_v35  ;;  %3097 = vmatpush1.msra.mxu1 %v5934_v19 }
 0x64e   : > { %3027 = vmatprep.subr.mxu0 %v5935_v55  ;;  %3098 = vmatprep.subr.mxu1 %v5936_v51  ;;  %v3534_v55 = vld [vmem:[%s5785_s7] ss:$0 sm:$0xff] }
 0x64f   : > { %3028 = vmatpush1.msra.mxu0 %v5937_v17  ;;  %3061 = vmatprep.mubr.f32.mxu0 %v5938_v21 }
 0x650   : > { %3099 = vmatpush1.msra.mxu1 %v5939_v62  ;;  %3132 = vmatprep.mubr.f32.mxu1 %v5938_v21  ;;  %v3535_v62 = vld [vmem:[#allocation4] ss:$0 sm:$0xff] }
 0x6f0   : > { %v2889_v7 = vpop.f32.mrf.mxu0  ;;  %v2960_v41 = vpop.f32.mrf.mxu1 }
 0x6f1   : > { %v2966_v25 = vadd.f32 %v2965_v37, %v2889_v7  ;;  %v2982_v0 = vadd.f32 %v2981_v6, %v2960_v41 }
 0x6f2   : > { %v2891_v34 = vpop.f32.mrf.mxu0  ;;  %v2962_v49 = vpop.f32.mrf.mxu1 }
 0x6f3   : > { %v3528_v2 = vmul.f32 -1.442695, %v2966_v25  ;;  %v2974_v45 = vadd.f32 %v2973_v8, %v2891_v34  ;;  %v2985_v13 = vadd.f32 %v2984_v53, %v2962_v49 }
 0x6f5   : > { %3721 = vpow2.f32 %v3528_v2  ;;  %v3529_v44 = vmul.f32 -1.442695, %v2974_v45  ;;  %v3530_v57 = vmul.f32 -1.442695, %v2985_v13 }
 0x6f7   : > { %3723 = vpow2.f32 %v3529_v44 }
 0x6f8   : > { %3725 = vpow2.f32 %v3530_v57 }
 0x702   : > { %v3722_v27 = vpop.eup %3721 }
 0x703   : > { %v2970_v63 = vadd.f32 1.0, %v3722_v27 }
 0x704   : > { %v3724_v38 = vpop.eup %3723 }
 0x705   : > { %3727 = vrcp.f32 %v2970_v63  ;;  %v2978_v5 = vadd.f32 1.0, %v3724_v38  ;;  %v3726_v56 = vpop.eup %3725 }
 0x706   : > { %3729 = vtanh.f32 %v2982_v0  ;;  %v2989_v29 = vadd.f32 1.0, %v3726_v56 }
 0x707   : > { %3731 = vrcp.f32 %v2978_v5 }
 0x708   : > { %3733 = vrcp.f32 %v2989_v29 }
 0x712   : > { %v3728_v60 = vpop.eup %3727 }
 0x713   : > { %v3730_v16 = vpop.eup %3729 }
 0x714   : > { %v3732_v20 = vpop.eup %3731  ;;  %v2993_v32 = vmul.f32 %v3730_v16, %v3728_v60 }
 0x715   : > { %v2992_v39 = vmul.f32 %v3732_v20, %v5691_v30  ;;  %v3734_v4 = vpop.eup %3733 }
 0x717   : > { %v2994_v1 = vadd.f32 %v2993_v32, %v2992_v39 }
 0x719   : > { %3735 = vtanh.f32 %v2994_v1 }
 0x726   : > { %v3736_v59 = vpop.eup %3735 }
 0x727   : > { %v2996_v48 = vmul.f32 %v3736_v59, %v3734_v4 }
 0x729   : > { %3062 = vmatmul.mubr.f32.vlgmr.msra.gmra.mxu0 %v2996_v48  ;;  %3133 = vmatmul.mubr.f32.vlgmr.msra.gmra.mxu1 %v2996_v48 }
 0x7e9   : > { %v3063_v23 = vpop.f32.mrf.mxu0  ;;  %v3134_v11 = vpop.f32.mrf.mxu1 }
 0x7ea   : > { %v3140_v22 = vadd.f32 %v3139_v28, %v3063_v23  ;;  %v3156_v18 = vadd.f32 %v3155_v47, %v3134_v11 }
 0x7eb   : > { %v3065_v42 = vpop.f32.mrf.mxu0  ;;  %v3136_v58 = vpop.f32.mrf.mxu1 }
 0x7ec   : > { %v3531_v43 = vmul.f32 -1.442695, %v3140_v22  ;;  %v3148_v52 = vadd.f32 %v3147_v14, %v3065_v42  ;;  %v3159_v30 = vadd.f32 %v3158_v9, %v3136_v58 }
 0x7ee   : > { %3737 = vpow2.f32 %v3531_v43  ;;  %v3532_v50 = vmul.f32 -1.442695, %v3148_v52  ;;  %v3533_v24 = vmul.f32 -1.442695, %v3159_v30 }
 0x7f0   : > { %3739 = vpow2.f32 %v3532_v50 }
 0x7f1   : > { %3741 = vpow2.f32 %v3533_v24 }
 0x7fb   : > { %v3738_v31 = vpop.eup %3737 }
 0x7fc   : > { %v3144_v15 = vadd.f32 1.0, %v3738_v31 }
 0x7fd   : > { %v3740_v10 = vpop.eup %3739 }
 0x7fe   : > { %3743 = vrcp.f32 %v3144_v15  ;;  %v3152_v36 = vadd.f32 1.0, %v3740_v10  ;;  %v3742_v33 = vpop.eup %3741 }
 0x7ff   : > { %3745 = vtanh.f32 %v3156_v18  ;;  %v3163_v46 = vadd.f32 1.0, %v3742_v33 }
 0x800   : > { %3747 = vrcp.f32 %v3152_v36 }
 0x801   : > { %3749 = vrcp.f32 %v3163_v46 }
 0x80b   : > { %v3744_v12 = vpop.eup %3743 }
 0x80c   : > { %v3746_v3 = vpop.eup %3745 }
 0x80d   : > { %v3748_v26 = vpop.eup %3747  ;;  %v3167_v61 = vmul.f32 %v3746_v3, %v3744_v12 }
 0x80e   : > { %v3166_v54 = vmul.f32 %v3748_v26, %v2994_v1  ;;  %v3750_v35 = vpop.eup %3749 }
 0x810   : > { %v3168_v40 = vadd.f32 %v3167_v61, %v3166_v54 }
 0x812   : > { %3751 = vtanh.f32 %v3168_v40 }
 0x81f   : > { %v3752_v19 = vpop.eup %3751 }
 0x820   : > { %v3170_v51 = vmul.f32 %v3752_v19, %v3750_v35 }
 0x822   : > { %v3178_v17 = vmul.f32 %v3534_v55, %v3170_v51 }
 0x824   : > { %v3180_v21 = vsel %vm3179_vm2, %v3178_v17, 0.0 }
 0x825   : > { %3181 = vadd.xlane.f32.xlu0 %v3180_v21 }
 0x8ae   : > { %v3182_v37 = vpop.xlane.xlu0 %3181 }
 0x8af   : > { %v3190_v7 = vadd.f32 %v3535_v62, %v3182_v37 }
 0x8b1   : > { %3192 = vst.msk [vmem:[%s5787_s9] sm:$0x3] %vm3191_vm3, %v3190_v7 }
 0x8b2 PF: > { %p23_p12 = scmp.ge.s32.totalorder %s3953_s15, 6   ;;  %s5940_s11 = smov %s3845_s12 }
 0x8b3   : > { %s5941_s12 = smov %s3849_s13  ;;  %s5942_s13 = smov %s3963_s18 }
 0x8b4   : > { %s5943_s14 = smov %s3953_s15  ;;  %25 = sbr.rel (!%p23_p12) target bundleno = 10 (0xa), region = 126 }
 0x8b9   :  { %3204 = vsyncpa [#allocation6], 1 }
 0x8ba   :  { %3206 = vsyncpa [#allocation6 + $0x1], 1 }
 0x8bb   :  { %3207 = vsyncpa [#allocation7], 1 }
 0x8bc   :  { %3209 = vsyncpa [#allocation7 + $0x1], 1 }
 0x8bd   :  { %3210 = vsyncpa [#allocation9], 1 }

</bundles_post_ra>
